<compile_context>
chip_gen: v7x
topology: tpu7x:2x2x1
jax: 0.10.0
libtpu: 0.0.40
codegen_flags: <defaults>
</compile_context>

<pallas_src>
import functools

import jax
import jax.numpy as jnp
from jax.experimental import pallas as pl
from jax.experimental.pallas import tpu as pltpu


# ----------------------------------------------------------------------------
# In-kernel math helpers (guaranteed-lowerable ops only)
# ----------------------------------------------------------------------------
_INV_SQRT2 = 0.7071067811865476


def _erf(x):
    # Abramowitz & Stegun 7.1.26 rational approximation, |abs err| < 1.5e-7.
    a1, a2, a3, a4, a5 = (0.254829592, -0.284496736, 1.421413741,
                          -1.453152027, 1.061405429)
    p = 0.3275911
    ax = jnp.abs(x)
    t = 1.0 / (1.0 + p * ax)
    poly = ((((a5 * t + a4) * t + a3) * t + a2) * t + a1) * t
    y = 1.0 - poly * jnp.exp(-(ax * ax))
    return jnp.where(x >= 0, y, -y)


def _gelu_exact(x):
    # PyTorch nn.GELU() default (approximate='none'): 0.5*x*(1+erf(x/sqrt(2)))
    return 0.5 * x * (1.0 + _erf(x * _INV_SQRT2))


# ----------------------------------------------------------------------------
# Fused ConvNeXt block kernel (one grid step == one batch image)
#
# Layouts inside the kernel:
#   xpf_ref : (1, C, Lp)   flat replicate-padded image, q' = a*Wp + b on lanes
#   acc/hn  : (C, Pacc)    Pacc = H*Wp "padded-width" pixel coords on lanes
#   z/g     : (F, Pacc)
#   o_ref   : (1, C, Pacc) NCHW-flat (wrapper drops the Wp-W garbage columns)
# Garbage columns (j >= W) never mix with valid pixels: the norm and both
# 1x1 convs are strictly per-pixel along the lane axis.
# ----------------------------------------------------------------------------
def _convnext_block_kernel(xpf_ref, wdw_ref, bdw_ref, gamma_ref, beta_ref,
                           w2_ref, b2_ref, w3_ref, b3_ref, o_ref,
                           *, ksize, Wp, Pacc, center, eps):
    C = wdw_ref.shape[0]

    # --- depthwise k x k conv: 49 static lane-offset windows of the flat ----
    # padded tile; per-tap (C,1) weight columns are sliced up-front (hoisted).
    wdw = wdw_ref[...]                                        # (C, k*k), 1 vreg
    w_cols = [wdw[:, t:t + 1] for t in range(ksize * ksize)]  # hoisted slices

    acc = jnp.zeros((C, Pacc), jnp.float32)
    for di in range(ksize):
        for dj in range(ksize):
            s = di * Wp + dj                                  # static lane shift
            tap = xpf_ref[0, :, s:s + Pacc]                   # (C, Pacc)
            acc = acc + tap * w_cols[di * ksize + dj]         # lane-bcast FMA
    acc = acc + bdw_ref[...]                                  # (C,1) lane-bcast

    # --- ChannelNorm: per-pixel mean/var over channels (sublane axis). ------
    # Done as (C,C) ones-matmuls on the MXU so no cross-sublane reduce is
    # needed; every row of m / v holds the per-pixel statistic.
    ones_cc = jnp.full((C, C), 1.0 / C, jnp.float32)
    m = jnp.dot(ones_cc, acc, preferred_element_type=jnp.float32)     # (C,Pacc)
    d = acc - m
    v = jnp.dot(ones_cc, d * d, preferred_element_type=jnp.float32)   # (C,Pacc)
    hn = d * jax.lax.rsqrt(v[:1, :] + eps)                    # (1,Pacc) rsqrt
    hn = hn * gamma_ref[...] + beta_ref[...]                  # (C,1) lane-bcast

    # --- pointwise conv 1: (F,C)@(C,P) on the MXU + exact GELU --------------
    z = jnp.dot(w2_ref[...], hn, preferred_element_type=jnp.float32)
    z = z + b2_ref[...]                                       # (F,1) lane-bcast
    g = _gelu_exact(z)

    # --- pointwise conv 2: (C,F)@(F,P) on the MXU + residual ----------------
    y = jnp.dot(w3_ref[...], g, preferred_element_type=jnp.float32)
    y = y + b3_ref[...]                                       # (C,1) lane-bcast

    # Residual = center tap of the already-resident padded tile (no 2nd DMA).
    res = xpf_ref[0, :, center:center + Pacc]
    o_ref[0] = (y + res).astype(o_ref.dtype)                  # lane-dense store


# ----------------------------------------------------------------------------
# Wrapper: NCHW in, NCHW out, no transposes.
# ----------------------------------------------------------------------------
def convnext_block_forward(x_nchw, params, kernel_size=7, eps=1e-6):
    """x_nchw: (N, C, H, W) float32 -> (N, C, H, W) float32."""
    N, C, H, W = x_nchw.shape
    pad = kernel_size // 2
    F = params["w_c2"].shape[0]                               # dim_ffn
    Hp, Wp = H + 2 * pad, W + 2 * pad
    Pacc = H * Wp                                             # padded-width pixel count
    center = pad * Wp + pad                                   # center-tap lane offset
    # Flat padded length: every tap window s + Pacc must stay in bounds.
    Lp = max(Hp * Wp, Pacc + (kernel_size - 1) * Wp + (kernel_size - 1))
    Lp = ((Lp + 127) // 128) * 128                            # lane-multiple

    # Replicate-pad the (tiny) input in NCHW and flatten to the lane-shift
    # friendly layout.  No activation transposes anywhere; the output reshape
    # below is a column slice only.  (At production H*W one would fuse this
    # pad into the kernel and row-tile the grid with a (k-1)-row halo.)
    x = x_nchw.astype(jnp.float32)
    xp = jnp.pad(x, ((0, 0), (0, 0), (pad, pad), (pad, pad)), mode="edge")
    xpf = xp.reshape(N, C, Hp * Wp)
    xpf = jnp.pad(xpf, ((0, 0), (0, 0), (0, Lp - Hp * Wp)))   # (N, C, Lp)

    # PyTorch parameter layouts -> kernel layouts (tiny, one shot).
    kk = kernel_size * kernel_size
    wdw = params["w_c1"].reshape(C, kk).astype(jnp.float32)          # (C, k*k)
    bdw = params["b_c1"].reshape(C, 1).astype(jnp.float32)
    gamma = params["norm_w"].reshape(C, 1).astype(jnp.float32)
    beta = params["norm_b"].reshape(C, 1).astype(jnp.float32)
    w2 = params["w_c2"][:, :, 0, 0].astype(jnp.float32)              # (F, C)
    b2 = params["b_c2"].reshape(F, 1).astype(jnp.float32)
    w3 = params["w_c3"][:, :, 0, 0].astype(jnp.float32)              # (C, F)
    b3 = params["b_c3"].reshape(C, 1).astype(jnp.float32)

    kernel = functools.partial(_convnext_block_kernel, ksize=kernel_size,
                               Wp=Wp, Pacc=Pacc, center=center, eps=eps)

    flops = N * (2 * kk * C * Pacc            # depthwise MACs
                 + 2 * 2 * C * C * Pacc       # mean/var matmuls
                 + 2 * 2 * C * F * Pacc       # two pointwise GEMMs
                 + 16 * C * Pacc)             # norm/GELU/residual elementwise
    cost = pl.CostEstimate(
        flops=flops,
        transcendentals=N * Pacc * (F + 1),   # GELU exp + rsqrt
        bytes_accessed=4 * (N * C * Lp + N * C * Pacc
                            + C * kk + 2 * C * F + 4 * C + 2 * F))

    out = pl.pallas_call(
        kernel,
        out_shape=jax.ShapeDtypeStruct((N, C, Pacc), jnp.float32),
        grid_spec=pltpu.PrefetchScalarGridSpec(
            num_scalar_prefetch=0,
            grid=(N,),
            in_specs=[
                pl.BlockSpec((1, C, Lp), lambda n: (n, 0, 0)),   # flat padded x
                pl.BlockSpec((C, kk), lambda n: (0, 0)),         # depthwise w
                pl.BlockSpec((C, 1), lambda n: (0, 0)),          # depthwise b
                pl.BlockSpec((C, 1), lambda n: (0, 0)),          # norm gamma
                pl.BlockSpec((C, 1), lambda n: (0, 0)),          # norm beta
                pl.BlockSpec((F, C), lambda n: (0, 0)),          # w2 (F,C)
                pl.BlockSpec((F, 1), lambda n: (0, 0)),          # b2
                pl.BlockSpec((C, F), lambda n: (0, 0)),          # w3 (C,F)
                pl.BlockSpec((C, 1), lambda n: (0, 0)),          # b3
            ],
            out_specs=pl.BlockSpec((1, C, Pacc), lambda n: (n, 0, 0)),
        ),
        compiler_params=pltpu.CompilerParams(
            dimension_semantics=("parallel",)),   # one image per TC on v7x
        cost_estimate=cost,
    )(xpf, wdw, bdw, gamma, beta, w2, b2, w3, b3)

    # NCHW-flat (padded-width coords) -> NCHW: drop the Wp-W garbage columns.
    return out.reshape(N, C, H, Wp)[:, :, :, :W]


# ----------------------------------------------------------------------------
# Pure-JAX reference (for a quiet correctness check) and parameter init
# ----------------------------------------------------------------------------
def convnext_block_reference(x, params, kernel_size=7, eps=1e-6):
    pad = kernel_size // 2
    N, C, H, W = x.shape
    xp = jnp.pad(x, ((0, 0), (0, 0), (pad, pad), (pad, pad)), mode="edge")
    y = jax.lax.conv_general_dilated(
        xp, params["w_c1"], (1, 1), "VALID",
        dimension_numbers=("NCHW", "OIHW", "NCHW"), feature_group_count=C)
    y = y + params["b_c1"][None, :, None, None]
    m = jnp.mean(y, axis=1, keepdims=True)
    s = jnp.mean((y - m) ** 2, axis=1, keepdims=True)
    y = (y - m) * jax.lax.rsqrt(s + eps)
    y = params["norm_w"][None, :, None, None] * y \
        + params["norm_b"][None, :, None, None]
    y = jax.lax.conv_general_dilated(
        y, params["w_c2"], (1, 1), "VALID",
        dimension_numbers=("NCHW", "OIHW", "NCHW"))
    y = y + params["b_c2"][None, :, None, None]
    y = jax.nn.gelu(y, approximate=False)
    y = jax.lax.conv_general_dilated(
        y, params["w_c3"], (1, 1), "VALID",
        dimension_numbers=("NCHW", "OIHW", "NCHW"))
    y = y + params["b_c3"][None, :, None, None]
    return y + x


def init_params(key, channels=8, dim_ffn=None, kernel_size=7):
    """PyTorch-layout parameters (Conv2d OIHW weights), deterministic init."""
    if dim_ffn is None:
        dim_ffn = channels * 4
    ks = jax.random.split(key, 6)

    def u(k, shape, fan_in):
        bound = 1.0 / (fan_in ** 0.5)
        return jax.random.uniform(k, shape, jnp.float32, -bound, bound)

    return {
        "w_c1": u(ks[0], (channels, 1, kernel_size, kernel_size),
                  kernel_size * kernel_size),
        "b_c1": u(ks[1], (channels,), kernel_size * kernel_size),
        "norm_w": jnp.ones((channels,), jnp.float32),
        "norm_b": jnp.zeros((channels,), jnp.float32),
        "w_c2": u(ks[2], (dim_ffn, channels, 1, 1), channels),
        "b_c2": u(ks[3], (dim_ffn,), channels),
        "w_c3": u(ks[4], (channels, dim_ffn, 1, 1), dim_ffn),
        "b_c3": u(ks[5], (channels,), dim_ffn),
    }


if __name__ == "__main__":
    key = jax.random.PRNGKey(0)
    k_x, k_p = jax.random.split(key)

    # Small shapes consistent with the module: batch=2, channels=8 (fills the
    # 8 sublanes), 16x16 spatial, kernel_size=7, dim_ffn=4*channels=32.
    N, C, H, W = 2, 8, 16, 16
    x = jax.random.normal(k_x, (N, C, H, W), jnp.float32)
    params = init_params(k_p, channels=C, kernel_size=7)

    out = convnext_block_forward(x, params, kernel_size=7)
    jax.block_until_ready(out)
    assert out.shape == (N, C, H, W)

    # Quiet correctness check against a pure-JAX reference.
    ref = convnext_block_reference(x, params, kernel_size=7)
    err = float(jnp.max(jnp.abs(out - ref)))
    assert err < 1e-3, f"max abs err vs reference: {err}"

    print("KERNEL_OK")
</pallas_src>

<mosaic_0001>
module attributes {stable_mosaic.version = 11 : i64} {
  func.func @_convnext_block_kernel(%arg0: i32, %arg1: memref<1x8x512xf32, #tpu.memory_space<vmem>>, %arg2: memref<8x49xf32, #tpu.memory_space<vmem>>, %arg3: memref<8x1xf32, #tpu.memory_space<vmem>>, %arg4: memref<8x1xf32, #tpu.memory_space<vmem>>, %arg5: memref<8x1xf32, #tpu.memory_space<vmem>>, %arg6: memref<32x8xf32, #tpu.memory_space<vmem>>, %arg7: memref<32x1xf32, #tpu.memory_space<vmem>>, %arg8: memref<8x32xf32, #tpu.memory_space<vmem>>, %arg9: memref<8x1xf32, #tpu.memory_space<vmem>>, %arg10: memref<1x8x352xf32, #tpu.memory_space<vmem>>) attributes {dimension_semantics = [#tpu.dimension_semantics<parallel>], iteration_bounds = array<i64: 2>, scalar_prefetch = 0 : i64, scratch_operands = 0 : i64, tpu.core_type = #tpu.core_type<tc>, window_params = [{transform_indices = @transform_0, window_bounds = array<i64: 1, 8, 512>}, {pipeline_mode = #tpu.pipeline_mode<synchronous>, transform_indices = @transform_1, window_bounds = array<i64: 8, 49>}, {pipeline_mode = #tpu.pipeline_mode<synchronous>, transform_indices = @transform_2, window_bounds = array<i64: 8, 1>}, {pipeline_mode = #tpu.pipeline_mode<synchronous>, transform_indices = @transform_3, window_bounds = array<i64: 8, 1>}, {pipeline_mode = #tpu.pipeline_mode<synchronous>, transform_indices = @transform_4, window_bounds = array<i64: 8, 1>}, {pipeline_mode = #tpu.pipeline_mode<synchronous>, transform_indices = @transform_5, window_bounds = array<i64: 32, 8>}, {pipeline_mode = #tpu.pipeline_mode<synchronous>, transform_indices = @transform_6, window_bounds = array<i64: 32, 1>}, {pipeline_mode = #tpu.pipeline_mode<synchronous>, transform_indices = @transform_7, window_bounds = array<i64: 8, 32>}, {pipeline_mode = #tpu.pipeline_mode<synchronous>, transform_indices = @transform_8, window_bounds = array<i64: 8, 1>}, {transform_indices = @transform_9, window_bounds = array<i64: 1, 8, 352>}]} {
    %c0 = arith.constant 0 : index
    %c0_0 = arith.constant 0 : index
    %0 = vector.load %arg2[%c0, %c0_0] : memref<8x49xf32, #tpu.memory_space<vmem>>, vector<8x49xf32>
    %1 = vector.extract_strided_slice %0 {offsets = [0, 0], sizes = [8, 1], strides = [1, 1]} : vector<8x49xf32> to vector<8x1xf32>
    %2 = vector.extract_strided_slice %0 {offsets = [0, 1], sizes = [8, 1], strides = [1, 1]} : vector<8x49xf32> to vector<8x1xf32>
    %3 = vector.extract_strided_slice %0 {offsets = [0, 2], sizes = [8, 1], strides = [1, 1]} : vector<8x49xf32> to vector<8x1xf32>
    %4 = vector.extract_strided_slice %0 {offsets = [0, 3], sizes = [8, 1], strides = [1, 1]} : vector<8x49xf32> to vector<8x1xf32>
    %5 = vector.extract_strided_slice %0 {offsets = [0, 4], sizes = [8, 1], strides = [1, 1]} : vector<8x49xf32> to vector<8x1xf32>
    %6 = vector.extract_strided_slice %0 {offsets = [0, 5], sizes = [8, 1], strides = [1, 1]} : vector<8x49xf32> to vector<8x1xf32>
    %7 = vector.extract_strided_slice %0 {offsets = [0, 6], sizes = [8, 1], strides = [1, 1]} : vector<8x49xf32> to vector<8x1xf32>
    %8 = vector.extract_strided_slice %0 {offsets = [0, 7], sizes = [8, 1], strides = [1, 1]} : vector<8x49xf32> to vector<8x1xf32>
    %9 = vector.extract_strided_slice %0 {offsets = [0, 8], sizes = [8, 1], strides = [1, 1]} : vector<8x49xf32> to vector<8x1xf32>
    %10 = vector.extract_strided_slice %0 {offsets = [0, 9], sizes = [8, 1], strides = [1, 1]} : vector<8x49xf32> to vector<8x1xf32>
    %11 = vector.extract_strided_slice %0 {offsets = [0, 10], sizes = [8, 1], strides = [1, 1]} : vector<8x49xf32> to vector<8x1xf32>
    %12 = vector.extract_strided_slice %0 {offsets = [0, 11], sizes = [8, 1], strides = [1, 1]} : vector<8x49xf32> to vector<8x1xf32>
    %13 = vector.extract_strided_slice %0 {offsets = [0, 12], sizes = [8, 1], strides = [1, 1]} : vector<8x49xf32> to vector<8x1xf32>
    %14 = vector.extract_strided_slice %0 {offsets = [0, 13], sizes = [8, 1], strides = [1, 1]} : vector<8x49xf32> to vector<8x1xf32>
    %15 = vector.extract_strided_slice %0 {offsets = [0, 14], sizes = [8, 1], strides = [1, 1]} : vector<8x49xf32> to vector<8x1xf32>
    %16 = vector.extract_strided_slice %0 {offsets = [0, 15], sizes = [8, 1], strides = [1, 1]} : vector<8x49xf32> to vector<8x1xf32>
    %17 = vector.extract_strided_slice %0 {offsets = [0, 16], sizes = [8, 1], strides = [1, 1]} : vector<8x49xf32> to vector<8x1xf32>
    %18 = vector.extract_strided_slice %0 {offsets = [0, 17], sizes = [8, 1], strides = [1, 1]} : vector<8x49xf32> to vector<8x1xf32>
    %19 = vector.extract_strided_slice %0 {offsets = [0, 18], sizes = [8, 1], strides = [1, 1]} : vector<8x49xf32> to vector<8x1xf32>
    %20 = vector.extract_strided_slice %0 {offsets = [0, 19], sizes = [8, 1], strides = [1, 1]} : vector<8x49xf32> to vector<8x1xf32>
    %21 = vector.extract_strided_slice %0 {offsets = [0, 20], sizes = [8, 1], strides = [1, 1]} : vector<8x49xf32> to vector<8x1xf32>
    %22 = vector.extract_strided_slice %0 {offsets = [0, 21], sizes = [8, 1], strides = [1, 1]} : vector<8x49xf32> to vector<8x1xf32>
    %23 = vector.extract_strided_slice %0 {offsets = [0, 22], sizes = [8, 1], strides = [1, 1]} : vector<8x49xf32> to vector<8x1xf32>
    %24 = vector.extract_strided_slice %0 {offsets = [0, 23], sizes = [8, 1], strides = [1, 1]} : vector<8x49xf32> to vector<8x1xf32>
    %25 = vector.extract_strided_slice %0 {offsets = [0, 24], sizes = [8, 1], strides = [1, 1]} : vector<8x49xf32> to vector<8x1xf32>
    %26 = vector.extract_strided_slice %0 {offsets = [0, 25], sizes = [8, 1], strides = [1, 1]} : vector<8x49xf32> to vector<8x1xf32>
    %27 = vector.extract_strided_slice %0 {offsets = [0, 26], sizes = [8, 1], strides = [1, 1]} : vector<8x49xf32> to vector<8x1xf32>
    %28 = vector.extract_strided_slice %0 {offsets = [0, 27], sizes = [8, 1], strides = [1, 1]} : vector<8x49xf32> to vector<8x1xf32>
    %29 = vector.extract_strided_slice %0 {offsets = [0, 28], sizes = [8, 1], strides = [1, 1]} : vector<8x49xf32> to vector<8x1xf32>
    %30 = vector.extract_strided_slice %0 {offsets = [0, 29], sizes = [8, 1], strides = [1, 1]} : vector<8x49xf32> to vector<8x1xf32>
    %31 = vector.extract_strided_slice %0 {offsets = [0, 30], sizes = [8, 1], strides = [1, 1]} : vector<8x49xf32> to vector<8x1xf32>
    %32 = vector.extract_strided_slice %0 {offsets = [0, 31], sizes = [8, 1], strides = [1, 1]} : vector<8x49xf32> to vector<8x1xf32>
    %33 = vector.extract_strided_slice %0 {offsets = [0, 32], sizes = [8, 1], strides = [1, 1]} : vector<8x49xf32> to vector<8x1xf32>
    %34 = vector.extract_strided_slice %0 {offsets = [0, 33], sizes = [8, 1], strides = [1, 1]} : vector<8x49xf32> to vector<8x1xf32>
    %35 = vector.extract_strided_slice %0 {offsets = [0, 34], sizes = [8, 1], strides = [1, 1]} : vector<8x49xf32> to vector<8x1xf32>
    %36 = vector.extract_strided_slice %0 {offsets = [0, 35], sizes = [8, 1], strides = [1, 1]} : vector<8x49xf32> to vector<8x1xf32>
    %37 = vector.extract_strided_slice %0 {offsets = [0, 36], sizes = [8, 1], strides = [1, 1]} : vector<8x49xf32> to vector<8x1xf32>
    %38 = vector.extract_strided_slice %0 {offsets = [0, 37], sizes = [8, 1], strides = [1, 1]} : vector<8x49xf32> to vector<8x1xf32>
    %39 = vector.extract_strided_slice %0 {offsets = [0, 38], sizes = [8, 1], strides = [1, 1]} : vector<8x49xf32> to vector<8x1xf32>
    %40 = vector.extract_strided_slice %0 {offsets = [0, 39], sizes = [8, 1], strides = [1, 1]} : vector<8x49xf32> to vector<8x1xf32>
    %41 = vector.extract_strided_slice %0 {offsets = [0, 40], sizes = [8, 1], strides = [1, 1]} : vector<8x49xf32> to vector<8x1xf32>
    %42 = vector.extract_strided_slice %0 {offsets = [0, 41], sizes = [8, 1], strides = [1, 1]} : vector<8x49xf32> to vector<8x1xf32>
    %43 = vector.extract_strided_slice %0 {offsets = [0, 42], sizes = [8, 1], strides = [1, 1]} : vector<8x49xf32> to vector<8x1xf32>
    %44 = vector.extract_strided_slice %0 {offsets = [0, 43], sizes = [8, 1], strides = [1, 1]} : vector<8x49xf32> to vector<8x1xf32>
    %45 = vector.extract_strided_slice %0 {offsets = [0, 44], sizes = [8, 1], strides = [1, 1]} : vector<8x49xf32> to vector<8x1xf32>
    %46 = vector.extract_strided_slice %0 {offsets = [0, 45], sizes = [8, 1], strides = [1, 1]} : vector<8x49xf32> to vector<8x1xf32>
    %47 = vector.extract_strided_slice %0 {offsets = [0, 46], sizes = [8, 1], strides = [1, 1]} : vector<8x49xf32> to vector<8x1xf32>
    %48 = vector.extract_strided_slice %0 {offsets = [0, 47], sizes = [8, 1], strides = [1, 1]} : vector<8x49xf32> to vector<8x1xf32>
    %49 = vector.extract_strided_slice %0 {offsets = [0, 48], sizes = [8, 1], strides = [1, 1]} : vector<8x49xf32> to vector<8x1xf32>
    %cst = arith.constant 0.000000e+00 : f32
    %50 = vector.broadcast %cst : f32 to vector<8x352xf32>
    %c0_1 = arith.constant 0 : index
    %c0_2 = arith.constant 0 : index
    %c0_3 = arith.constant 0 : index
    %51 = vector.load %arg1[%c0_1, %c0_2, %c0_3] : memref<1x8x512xf32, #tpu.memory_space<vmem>>, vector<1x8x352xf32>
    %52 = vector.shape_cast %51 : vector<1x8x352xf32> to vector<8x352xf32>
    %53 = vector.broadcast %1 : vector<8x1xf32> to vector<8x352xf32>
    %54 = arith.mulf %52, %53 : vector<8x352xf32>
    %55 = arith.addf %50, %54 : vector<8x352xf32>
    %c0_4 = arith.constant 0 : index
    %c0_5 = arith.constant 0 : index
    %c1 = arith.constant 1 : index
    %56 = vector.load %arg1[%c0_4, %c0_5, %c1] : memref<1x8x512xf32, #tpu.memory_space<vmem>>, vector<1x8x352xf32>
    %57 = vector.shape_cast %56 : vector<1x8x352xf32> to vector<8x352xf32>
    %58 = vector.broadcast %2 : vector<8x1xf32> to vector<8x352xf32>
    %59 = arith.mulf %57, %58 : vector<8x352xf32>
    %60 = arith.addf %55, %59 : vector<8x352xf32>
    %c0_6 = arith.constant 0 : index
    %c0_7 = arith.constant 0 : index
    %c2 = arith.constant 2 : index
    %61 = vector.load %arg1[%c0_6, %c0_7, %c2] : memref<1x8x512xf32, #tpu.memory_space<vmem>>, vector<1x8x352xf32>
    %62 = vector.shape_cast %61 : vector<1x8x352xf32> to vector<8x352xf32>
    %63 = vector.broadcast %3 : vector<8x1xf32> to vector<8x352xf32>
    %64 = arith.mulf %62, %63 : vector<8x352xf32>
    %65 = arith.addf %60, %64 : vector<8x352xf32>
    %c0_8 = arith.constant 0 : index
    %c0_9 = arith.constant 0 : index
    %c3 = arith.constant 3 : index
    %66 = vector.load %arg1[%c0_8, %c0_9, %c3] : memref<1x8x512xf32, #tpu.memory_space<vmem>>, vector<1x8x352xf32>
    %67 = vector.shape_cast %66 : vector<1x8x352xf32> to vector<8x352xf32>
    %68 = vector.broadcast %4 : vector<8x1xf32> to vector<8x352xf32>
    %69 = arith.mulf %67, %68 : vector<8x352xf32>
    %70 = arith.addf %65, %69 : vector<8x352xf32>
    %c0_10 = arith.constant 0 : index
    %c0_11 = arith.constant 0 : index
    %c4 = arith.constant 4 : index
    %71 = vector.load %arg1[%c0_10, %c0_11, %c4] : memref<1x8x512xf32, #tpu.memory_space<vmem>>, vector<1x8x352xf32>
    %72 = vector.shape_cast %71 : vector<1x8x352xf32> to vector<8x352xf32>
    %73 = vector.broadcast %5 : vector<8x1xf32> to vector<8x352xf32>
    %74 = arith.mulf %72, %73 : vector<8x352xf32>
    %75 = arith.addf %70, %74 : vector<8x352xf32>
    %c0_12 = arith.constant 0 : index
    %c0_13 = arith.constant 0 : index
    %c5 = arith.constant 5 : index
    %76 = vector.load %arg1[%c0_12, %c0_13, %c5] : memref<1x8x512xf32, #tpu.memory_space<vmem>>, vector<1x8x352xf32>
    %77 = vector.shape_cast %76 : vector<1x8x352xf32> to vector<8x352xf32>
    %78 = vector.broadcast %6 : vector<8x1xf32> to vector<8x352xf32>
    %79 = arith.mulf %77, %78 : vector<8x352xf32>
    %80 = arith.addf %75, %79 : vector<8x352xf32>
    %c0_14 = arith.constant 0 : index
    %c0_15 = arith.constant 0 : index
    %c6 = arith.constant 6 : index
    %81 = vector.load %arg1[%c0_14, %c0_15, %c6] : memref<1x8x512xf32, #tpu.memory_space<vmem>>, vector<1x8x352xf32>
    %82 = vector.shape_cast %81 : vector<1x8x352xf32> to vector<8x352xf32>
    %83 = vector.broadcast %7 : vector<8x1xf32> to vector<8x352xf32>
    %84 = arith.mulf %82, %83 : vector<8x352xf32>
    %85 = arith.addf %80, %84 : vector<8x352xf32>
    %c0_16 = arith.constant 0 : index
    %c0_17 = arith.constant 0 : index
    %c22 = arith.constant 22 : index
    %86 = vector.load %arg1[%c0_16, %c0_17, %c22] : memref<1x8x512xf32, #tpu.memory_space<vmem>>, vector<1x8x352xf32>
    %87 = vector.shape_cast %86 : vector<1x8x352xf32> to vector<8x352xf32>
    %88 = vector.broadcast %8 : vector<8x1xf32> to vector<8x352xf32>
    %89 = arith.mulf %87, %88 : vector<8x352xf32>
    %90 = arith.addf %85, %89 : vector<8x352xf32>
    %c0_18 = arith.constant 0 : index
    %c0_19 = arith.constant 0 : index
    %c23 = arith.constant 23 : index
    %91 = vector.load %arg1[%c0_18, %c0_19, %c23] : memref<1x8x512xf32, #tpu.memory_space<vmem>>, vector<1x8x352xf32>
    %92 = vector.shape_cast %91 : vector<1x8x352xf32> to vector<8x352xf32>
    %93 = vector.broadcast %9 : vector<8x1xf32> to vector<8x352xf32>
    %94 = arith.mulf %92, %93 : vector<8x352xf32>
    %95 = arith.addf %90, %94 : vector<8x352xf32>
    %c0_20 = arith.constant 0 : index
    %c0_21 = arith.constant 0 : index
    %c24 = arith.constant 24 : index
    %96 = vector.load %arg1[%c0_20, %c0_21, %c24] : memref<1x8x512xf32, #tpu.memory_space<vmem>>, vector<1x8x352xf32>
    %97 = vector.shape_cast %96 : vector<1x8x352xf32> to vector<8x352xf32>
    %98 = vector.broadcast %10 : vector<8x1xf32> to vector<8x352xf32>
    %99 = arith.mulf %97, %98 : vector<8x352xf32>
    %100 = arith.addf %95, %99 : vector<8x352xf32>
    %c0_22 = arith.constant 0 : index
    %c0_23 = arith.constant 0 : index
    %c25 = arith.constant 25 : index
    %101 = vector.load %arg1[%c0_22, %c0_23, %c25] : memref<1x8x512xf32, #tpu.memory_space<vmem>>, vector<1x8x352xf32>
    %102 = vector.shape_cast %101 : vector<1x8x352xf32> to vector<8x352xf32>
    %103 = vector.broadcast %11 : vector<8x1xf32> to vector<8x352xf32>
    %104 = arith.mulf %102, %103 : vector<8x352xf32>
    %105 = arith.addf %100, %104 : vector<8x352xf32>
    %c0_24 = arith.constant 0 : index
    %c0_25 = arith.constant 0 : index
    %c26 = arith.constant 26 : index
    %106 = vector.load %arg1[%c0_24, %c0_25, %c26] : memref<1x8x512xf32, #tpu.memory_space<vmem>>, vector<1x8x352xf32>
    %107 = vector.shape_cast %106 : vector<1x8x352xf32> to vector<8x352xf32>
    %108 = vector.broadcast %12 : vector<8x1xf32> to vector<8x352xf32>
    %109 = arith.mulf %107, %108 : vector<8x352xf32>
    %110 = arith.addf %105, %109 : vector<8x352xf32>
    %c0_26 = arith.constant 0 : index
    %c0_27 = arith.constant 0 : index
    %c27 = arith.constant 27 : index
    %111 = vector.load %arg1[%c0_26, %c0_27, %c27] : memref<1x8x512xf32, #tpu.memory_space<vmem>>, vector<1x8x352xf32>
    %112 = vector.shape_cast %111 : vector<1x8x352xf32> to vector<8x352xf32>
    %113 = vector.broadcast %13 : vector<8x1xf32> to vector<8x352xf32>
    %114 = arith.mulf %112, %113 : vector<8x352xf32>
    %115 = arith.addf %110, %114 : vector<8x352xf32>
    %c0_28 = arith.constant 0 : index
    %c0_29 = arith.constant 0 : index
    %c28 = arith.constant 28 : index
    %116 = vector.load %arg1[%c0_28, %c0_29, %c28] : memref<1x8x512xf32, #tpu.memory_space<vmem>>, vector<1x8x352xf32>
    %117 = vector.shape_cast %116 : vector<1x8x352xf32> to vector<8x352xf32>
    %118 = vector.broadcast %14 : vector<8x1xf32> to vector<8x352xf32>
    %119 = arith.mulf %117, %118 : vector<8x352xf32>
    %120 = arith.addf %115, %119 : vector<8x352xf32>
    %c0_30 = arith.constant 0 : index
    %c0_31 = arith.constant 0 : index
    %c44 = arith.constant 44 : index
    %121 = vector.load %arg1[%c0_30, %c0_31, %c44] : memref<1x8x512xf32, #tpu.memory_space<vmem>>, vector<1x8x352xf32>
    %122 = vector.shape_cast %121 : vector<1x8x352xf32> to vector<8x352xf32>
    %123 = vector.broadcast %15 : vector<8x1xf32> to vector<8x352xf32>
    %124 = arith.mulf %122, %123 : vector<8x352xf32>
    %125 = arith.addf %120, %124 : vector<8x352xf32>
    %c0_32 = arith.constant 0 : index
    %c0_33 = arith.constant 0 : index
    %c45 = arith.constant 45 : index
    %126 = vector.load %arg1[%c0_32, %c0_33, %c45] : memref<1x8x512xf32, #tpu.memory_space<vmem>>, vector<1x8x352xf32>
    %127 = vector.shape_cast %126 : vector<1x8x352xf32> to vector<8x352xf32>
    %128 = vector.broadcast %16 : vector<8x1xf32> to vector<8x352xf32>
    %129 = arith.mulf %127, %128 : vector<8x352xf32>
    %130 = arith.addf %125, %129 : vector<8x352xf32>
    %c0_34 = arith.constant 0 : index
    %c0_35 = arith.constant 0 : index
    %c46 = arith.constant 46 : index
    %131 = vector.load %arg1[%c0_34, %c0_35, %c46] : memref<1x8x512xf32, #tpu.memory_space<vmem>>, vector<1x8x352xf32>
    %132 = vector.shape_cast %131 : vector<1x8x352xf32> to vector<8x352xf32>
    %133 = vector.broadcast %17 : vector<8x1xf32> to vector<8x352xf32>
    %134 = arith.mulf %132, %133 : vector<8x352xf32>
    %135 = arith.addf %130, %134 : vector<8x352xf32>
    %c0_36 = arith.constant 0 : index
    %c0_37 = arith.constant 0 : index
    %c47 = arith.constant 47 : index
    %136 = vector.load %arg1[%c0_36, %c0_37, %c47] : memref<1x8x512xf32, #tpu.memory_space<vmem>>, vector<1x8x352xf32>
    %137 = vector.shape_cast %136 : vector<1x8x352xf32> to vector<8x352xf32>
    %138 = vector.broadcast %18 : vector<8x1xf32> to vector<8x352xf32>
    %139 = arith.mulf %137, %138 : vector<8x352xf32>
    %140 = arith.addf %135, %139 : vector<8x352xf32>
    %c0_38 = arith.constant 0 : index
    %c0_39 = arith.constant 0 : index
    %c48 = arith.constant 48 : index
    %141 = vector.load %arg1[%c0_38, %c0_39, %c48] : memref<1x8x512xf32, #tpu.memory_space<vmem>>, vector<1x8x352xf32>
    %142 = vector.shape_cast %141 : vector<1x8x352xf32> to vector<8x352xf32>
    %143 = vector.broadcast %19 : vector<8x1xf32> to vector<8x352xf32>
    %144 = arith.mulf %142, %143 : vector<8x352xf32>
    %145 = arith.addf %140, %144 : vector<8x352xf32>
    %c0_40 = arith.constant 0 : index
    %c0_41 = arith.constant 0 : index
    %c49 = arith.constant 49 : index
    %146 = vector.load %arg1[%c0_40, %c0_41, %c49] : memref<1x8x512xf32, #tpu.memory_space<vmem>>, vector<1x8x352xf32>
    %147 = vector.shape_cast %146 : vector<1x8x352xf32> to vector<8x352xf32>
    %148 = vector.broadcast %20 : vector<8x1xf32> to vector<8x352xf32>
    %149 = arith.mulf %147, %148 : vector<8x352xf32>
    %150 = arith.addf %145, %149 : vector<8x352xf32>
    %c0_42 = arith.constant 0 : index
    %c0_43 = arith.constant 0 : index
    %c50 = arith.constant 50 : index
    %151 = vector.load %arg1[%c0_42, %c0_43, %c50] : memref<1x8x512xf32, #tpu.memory_space<vmem>>, vector<1x8x352xf32>
    %152 = vector.shape_cast %151 : vector<1x8x352xf32> to vector<8x352xf32>
    %153 = vector.broadcast %21 : vector<8x1xf32> to vector<8x352xf32>
    %154 = arith.mulf %152, %153 : vector<8x352xf32>
    %155 = arith.addf %150, %154 : vector<8x352xf32>
    %c0_44 = arith.constant 0 : index
    %c0_45 = arith.constant 0 : index
    %c66 = arith.constant 66 : index
    %156 = vector.load %arg1[%c0_44, %c0_45, %c66] : memref<1x8x512xf32, #tpu.memory_space<vmem>>, vector<1x8x352xf32>
    %157 = vector.shape_cast %156 : vector<1x8x352xf32> to vector<8x352xf32>
    %158 = vector.broadcast %22 : vector<8x1xf32> to vector<8x352xf32>
    %159 = arith.mulf %157, %158 : vector<8x352xf32>
    %160 = arith.addf %155, %159 : vector<8x352xf32>
    %c0_46 = arith.constant 0 : index
    %c0_47 = arith.constant 0 : index
    %c67 = arith.constant 67 : index
    %161 = vector.load %arg1[%c0_46, %c0_47, %c67] : memref<1x8x512xf32, #tpu.memory_space<vmem>>, vector<1x8x352xf32>
    %162 = vector.shape_cast %161 : vector<1x8x352xf32> to vector<8x352xf32>
    %163 = vector.broadcast %23 : vector<8x1xf32> to vector<8x352xf32>
    %164 = arith.mulf %162, %163 : vector<8x352xf32>
    %165 = arith.addf %160, %164 : vector<8x352xf32>
    %c0_48 = arith.constant 0 : index
    %c0_49 = arith.constant 0 : index
    %c68 = arith.constant 68 : index
    %166 = vector.load %arg1[%c0_48, %c0_49, %c68] : memref<1x8x512xf32, #tpu.memory_space<vmem>>, vector<1x8x352xf32>
    %167 = vector.shape_cast %166 : vector<1x8x352xf32> to vector<8x352xf32>
    %168 = vector.broadcast %24 : vector<8x1xf32> to vector<8x352xf32>
    %169 = arith.mulf %167, %168 : vector<8x352xf32>
    %170 = arith.addf %165, %169 : vector<8x352xf32>
    %c0_50 = arith.constant 0 : index
    %c0_51 = arith.constant 0 : index
    %c69 = arith.constant 69 : index
    %171 = vector.load %arg1[%c0_50, %c0_51, %c69] : memref<1x8x512xf32, #tpu.memory_space<vmem>>, vector<1x8x352xf32>
    %172 = vector.shape_cast %171 : vector<1x8x352xf32> to vector<8x352xf32>
    %173 = vector.broadcast %25 : vector<8x1xf32> to vector<8x352xf32>
    %174 = arith.mulf %172, %173 : vector<8x352xf32>
    %175 = arith.addf %170, %174 : vector<8x352xf32>
    %c0_52 = arith.constant 0 : index
    %c0_53 = arith.constant 0 : index
    %c70 = arith.constant 70 : index
    %176 = vector.load %arg1[%c0_52, %c0_53, %c70] : memref<1x8x512xf32, #tpu.memory_space<vmem>>, vector<1x8x352xf32>
    %177 = vector.shape_cast %176 : vector<1x8x352xf32> to vector<8x352xf32>
    %178 = vector.broadcast %26 : vector<8x1xf32> to vector<8x352xf32>
    %179 = arith.mulf %177, %178 : vector<8x352xf32>
    %180 = arith.addf %175, %179 : vector<8x352xf32>
    %c0_54 = arith.constant 0 : index
    %c0_55 = arith.constant 0 : index
    %c71 = arith.constant 71 : index
    %181 = vector.load %arg1[%c0_54, %c0_55, %c71] : memref<1x8x512xf32, #tpu.memory_space<vmem>>, vector<1x8x352xf32>
    %182 = vector.shape_cast %181 : vector<1x8x352xf32> to vector<8x352xf32>
    %183 = vector.broadcast %27 : vector<8x1xf32> to vector<8x352xf32>
    %184 = arith.mulf %182, %183 : vector<8x352xf32>
    %185 = arith.addf %180, %184 : vector<8x352xf32>
    %c0_56 = arith.constant 0 : index
    %c0_57 = arith.constant 0 : index
    %c72 = arith.constant 72 : index
    %186 = vector.load %arg1[%c0_56, %c0_57, %c72] : memref<1x8x512xf32, #tpu.memory_space<vmem>>, vector<1x8x352xf32>
    %187 = vector.shape_cast %186 : vector<1x8x352xf32> to vector<8x352xf32>
    %188 = vector.broadcast %28 : vector<8x1xf32> to vector<8x352xf32>
    %189 = arith.mulf %187, %188 : vector<8x352xf32>
    %190 = arith.addf %185, %189 : vector<8x352xf32>
    %c0_58 = arith.constant 0 : index
    %c0_59 = arith.constant 0 : index
    %c88 = arith.constant 88 : index
    %191 = vector.load %arg1[%c0_58, %c0_59, %c88] : memref<1x8x512xf32, #tpu.memory_space<vmem>>, vector<1x8x352xf32>
    %192 = vector.shape_cast %191 : vector<1x8x352xf32> to vector<8x352xf32>
    %193 = vector.broadcast %29 : vector<8x1xf32> to vector<8x352xf32>
    %194 = arith.mulf %192, %193 : vector<8x352xf32>
    %195 = arith.addf %190, %194 : vector<8x352xf32>
    %c0_60 = arith.constant 0 : index
    %c0_61 = arith.constant 0 : index
    %c89 = arith.constant 89 : index
    %196 = vector.load %arg1[%c0_60, %c0_61, %c89] : memref<1x8x512xf32, #tpu.memory_space<vmem>>, vector<1x8x352xf32>
    %197 = vector.shape_cast %196 : vector<1x8x352xf32> to vector<8x352xf32>
    %198 = vector.broadcast %30 : vector<8x1xf32> to vector<8x352xf32>
    %199 = arith.mulf %197, %198 : vector<8x352xf32>
    %200 = arith.addf %195, %199 : vector<8x352xf32>
    %c0_62 = arith.constant 0 : index
    %c0_63 = arith.constant 0 : index
    %c90 = arith.constant 90 : index
    %201 = vector.load %arg1[%c0_62, %c0_63, %c90] : memref<1x8x512xf32, #tpu.memory_space<vmem>>, vector<1x8x352xf32>
    %202 = vector.shape_cast %201 : vector<1x8x352xf32> to vector<8x352xf32>
    %203 = vector.broadcast %31 : vector<8x1xf32> to vector<8x352xf32>
    %204 = arith.mulf %202, %203 : vector<8x352xf32>
    %205 = arith.addf %200, %204 : vector<8x352xf32>
    %c0_64 = arith.constant 0 : index
    %c0_65 = arith.constant 0 : index
    %c91 = arith.constant 91 : index
    %206 = vector.load %arg1[%c0_64, %c0_65, %c91] : memref<1x8x512xf32, #tpu.memory_space<vmem>>, vector<1x8x352xf32>
    %207 = vector.shape_cast %206 : vector<1x8x352xf32> to vector<8x352xf32>
    %208 = vector.broadcast %32 : vector<8x1xf32> to vector<8x352xf32>
    %209 = arith.mulf %207, %208 : vector<8x352xf32>
    %210 = arith.addf %205, %209 : vector<8x352xf32>
    %c0_66 = arith.constant 0 : index
    %c0_67 = arith.constant 0 : index
    %c92 = arith.constant 92 : index
    %211 = vector.load %arg1[%c0_66, %c0_67, %c92] : memref<1x8x512xf32, #tpu.memory_space<vmem>>, vector<1x8x352xf32>
    %212 = vector.shape_cast %211 : vector<1x8x352xf32> to vector<8x352xf32>
    %213 = vector.broadcast %33 : vector<8x1xf32> to vector<8x352xf32>
    %214 = arith.mulf %212, %213 : vector<8x352xf32>
    %215 = arith.addf %210, %214 : vector<8x352xf32>
    %c0_68 = arith.constant 0 : index
    %c0_69 = arith.constant 0 : index
    %c93 = arith.constant 93 : index
    %216 = vector.load %arg1[%c0_68, %c0_69, %c93] : memref<1x8x512xf32, #tpu.memory_space<vmem>>, vector<1x8x352xf32>
    %217 = vector.shape_cast %216 : vector<1x8x352xf32> to vector<8x352xf32>
    %218 = vector.broadcast %34 : vector<8x1xf32> to vector<8x352xf32>
    %219 = arith.mulf %217, %218 : vector<8x352xf32>
    %220 = arith.addf %215, %219 : vector<8x352xf32>
    %c0_70 = arith.constant 0 : index
    %c0_71 = arith.constant 0 : index
    %c94 = arith.constant 94 : index
    %221 = vector.load %arg1[%c0_70, %c0_71, %c94] : memref<1x8x512xf32, #tpu.memory_space<vmem>>, vector<1x8x352xf32>
    %222 = vector.shape_cast %221 : vector<1x8x352xf32> to vector<8x352xf32>
    %223 = vector.broadcast %35 : vector<8x1xf32> to vector<8x352xf32>
    %224 = arith.mulf %222, %223 : vector<8x352xf32>
    %225 = arith.addf %220, %224 : vector<8x352xf32>
    %c0_72 = arith.constant 0 : index
    %c0_73 = arith.constant 0 : index
    %c110 = arith.constant 110 : index
    %226 = vector.load %arg1[%c0_72, %c0_73, %c110] : memref<1x8x512xf32, #tpu.memory_space<vmem>>, vector<1x8x352xf32>
    %227 = vector.shape_cast %226 : vector<1x8x352xf32> to vector<8x352xf32>
    %228 = vector.broadcast %36 : vector<8x1xf32> to vector<8x352xf32>
    %229 = arith.mulf %227, %228 : vector<8x352xf32>
    %230 = arith.addf %225, %229 : vector<8x352xf32>
    %c0_74 = arith.constant 0 : index
    %c0_75 = arith.constant 0 : index
    %c111 = arith.constant 111 : index
    %231 = vector.load %arg1[%c0_74, %c0_75, %c111] : memref<1x8x512xf32, #tpu.memory_space<vmem>>, vector<1x8x352xf32>
    %232 = vector.shape_cast %231 : vector<1x8x352xf32> to vector<8x352xf32>
    %233 = vector.broadcast %37 : vector<8x1xf32> to vector<8x352xf32>
    %234 = arith.mulf %232, %233 : vector<8x352xf32>
    %235 = arith.addf %230, %234 : vector<8x352xf32>
    %c0_76 = arith.constant 0 : index
    %c0_77 = arith.constant 0 : index
    %c112 = arith.constant 112 : index
    %236 = vector.load %arg1[%c0_76, %c0_77, %c112] : memref<1x8x512xf32, #tpu.memory_space<vmem>>, vector<1x8x352xf32>
    %237 = vector.shape_cast %236 : vector<1x8x352xf32> to vector<8x352xf32>
    %238 = vector.broadcast %38 : vector<8x1xf32> to vector<8x352xf32>
    %239 = arith.mulf %237, %238 : vector<8x352xf32>
    %240 = arith.addf %235, %239 : vector<8x352xf32>
    %c0_78 = arith.constant 0 : index
    %c0_79 = arith.constant 0 : index
    %c113 = arith.constant 113 : index
    %241 = vector.load %arg1[%c0_78, %c0_79, %c113] : memref<1x8x512xf32, #tpu.memory_space<vmem>>, vector<1x8x352xf32>
    %242 = vector.shape_cast %241 : vector<1x8x352xf32> to vector<8x352xf32>
    %243 = vector.broadcast %39 : vector<8x1xf32> to vector<8x352xf32>
    %244 = arith.mulf %242, %243 : vector<8x352xf32>
    %245 = arith.addf %240, %244 : vector<8x352xf32>
    %c0_80 = arith.constant 0 : index
    %c0_81 = arith.constant 0 : index
    %c114 = arith.constant 114 : index
    %246 = vector.load %arg1[%c0_80, %c0_81, %c114] : memref<1x8x512xf32, #tpu.memory_space<vmem>>, vector<1x8x352xf32>
    %247 = vector.shape_cast %246 : vector<1x8x352xf32> to vector<8x352xf32>
    %248 = vector.broadcast %40 : vector<8x1xf32> to vector<8x352xf32>
    %249 = arith.mulf %247, %248 : vector<8x352xf32>
    %250 = arith.addf %245, %249 : vector<8x352xf32>
    %c0_82 = arith.constant 0 : index
    %c0_83 = arith.constant 0 : index
    %c115 = arith.constant 115 : index
    %251 = vector.load %arg1[%c0_82, %c0_83, %c115] : memref<1x8x512xf32, #tpu.memory_space<vmem>>, vector<1x8x352xf32>
    %252 = vector.shape_cast %251 : vector<1x8x352xf32> to vector<8x352xf32>
    %253 = vector.broadcast %41 : vector<8x1xf32> to vector<8x352xf32>
    %254 = arith.mulf %252, %253 : vector<8x352xf32>
    %255 = arith.addf %250, %254 : vector<8x352xf32>
    %c0_84 = arith.constant 0 : index
    %c0_85 = arith.constant 0 : index
    %c116 = arith.constant 116 : index
    %256 = vector.load %arg1[%c0_84, %c0_85, %c116] : memref<1x8x512xf32, #tpu.memory_space<vmem>>, vector<1x8x352xf32>
    %257 = vector.shape_cast %256 : vector<1x8x352xf32> to vector<8x352xf32>
    %258 = vector.broadcast %42 : vector<8x1xf32> to vector<8x352xf32>
    %259 = arith.mulf %257, %258 : vector<8x352xf32>
    %260 = arith.addf %255, %259 : vector<8x352xf32>
    %c0_86 = arith.constant 0 : index
    %c0_87 = arith.constant 0 : index
    %c132 = arith.constant 132 : index
    %261 = vector.load %arg1[%c0_86, %c0_87, %c132] : memref<1x8x512xf32, #tpu.memory_space<vmem>>, vector<1x8x352xf32>
    %262 = vector.shape_cast %261 : vector<1x8x352xf32> to vector<8x352xf32>
    %263 = vector.broadcast %43 : vector<8x1xf32> to vector<8x352xf32>
    %264 = arith.mulf %262, %263 : vector<8x352xf32>
    %265 = arith.addf %260, %264 : vector<8x352xf32>
    %c0_88 = arith.constant 0 : index
    %c0_89 = arith.constant 0 : index
    %c133 = arith.constant 133 : index
    %266 = vector.load %arg1[%c0_88, %c0_89, %c133] : memref<1x8x512xf32, #tpu.memory_space<vmem>>, vector<1x8x352xf32>
    %267 = vector.shape_cast %266 : vector<1x8x352xf32> to vector<8x352xf32>
    %268 = vector.broadcast %44 : vector<8x1xf32> to vector<8x352xf32>
    %269 = arith.mulf %267, %268 : vector<8x352xf32>
    %270 = arith.addf %265, %269 : vector<8x352xf32>
    %c0_90 = arith.constant 0 : index
    %c0_91 = arith.constant 0 : index
    %c134 = arith.constant 134 : index
    %271 = vector.load %arg1[%c0_90, %c0_91, %c134] : memref<1x8x512xf32, #tpu.memory_space<vmem>>, vector<1x8x352xf32>
    %272 = vector.shape_cast %271 : vector<1x8x352xf32> to vector<8x352xf32>
    %273 = vector.broadcast %45 : vector<8x1xf32> to vector<8x352xf32>
    %274 = arith.mulf %272, %273 : vector<8x352xf32>
    %275 = arith.addf %270, %274 : vector<8x352xf32>
    %c0_92 = arith.constant 0 : index
    %c0_93 = arith.constant 0 : index
    %c135 = arith.constant 135 : index
    %276 = vector.load %arg1[%c0_92, %c0_93, %c135] : memref<1x8x512xf32, #tpu.memory_space<vmem>>, vector<1x8x352xf32>
    %277 = vector.shape_cast %276 : vector<1x8x352xf32> to vector<8x352xf32>
    %278 = vector.broadcast %46 : vector<8x1xf32> to vector<8x352xf32>
    %279 = arith.mulf %277, %278 : vector<8x352xf32>
    %280 = arith.addf %275, %279 : vector<8x352xf32>
    %c0_94 = arith.constant 0 : index
    %c0_95 = arith.constant 0 : index
    %c136 = arith.constant 136 : index
    %281 = vector.load %arg1[%c0_94, %c0_95, %c136] : memref<1x8x512xf32, #tpu.memory_space<vmem>>, vector<1x8x352xf32>
    %282 = vector.shape_cast %281 : vector<1x8x352xf32> to vector<8x352xf32>
    %283 = vector.broadcast %47 : vector<8x1xf32> to vector<8x352xf32>
    %284 = arith.mulf %282, %283 : vector<8x352xf32>
    %285 = arith.addf %280, %284 : vector<8x352xf32>
    %c0_96 = arith.constant 0 : index
    %c0_97 = arith.constant 0 : index
    %c137 = arith.constant 137 : index
    %286 = vector.load %arg1[%c0_96, %c0_97, %c137] : memref<1x8x512xf32, #tpu.memory_space<vmem>>, vector<1x8x352xf32>
    %287 = vector.shape_cast %286 : vector<1x8x352xf32> to vector<8x352xf32>
    %288 = vector.broadcast %48 : vector<8x1xf32> to vector<8x352xf32>
    %289 = arith.mulf %287, %288 : vector<8x352xf32>
    %290 = arith.addf %285, %289 : vector<8x352xf32>
    %c0_98 = arith.constant 0 : index
    %c0_99 = arith.constant 0 : index
    %c138 = arith.constant 138 : index
    %291 = vector.load %arg1[%c0_98, %c0_99, %c138] : memref<1x8x512xf32, #tpu.memory_space<vmem>>, vector<1x8x352xf32>
    %292 = vector.shape_cast %291 : vector<1x8x352xf32> to vector<8x352xf32>
    %293 = vector.broadcast %49 : vector<8x1xf32> to vector<8x352xf32>
    %294 = arith.mulf %292, %293 : vector<8x352xf32>
    %295 = arith.addf %290, %294 : vector<8x352xf32>
    %c0_100 = arith.constant 0 : index
    %c0_101 = arith.constant 0 : index
    %296 = vector.load %arg3[%c0_100, %c0_101] : memref<8x1xf32, #tpu.memory_space<vmem>>, vector<8x1xf32>
    %297 = vector.broadcast %296 : vector<8x1xf32> to vector<8x352xf32>
    %298 = arith.addf %295, %297 : vector<8x352xf32>
    %cst_102 = arith.constant 1.250000e-01 : f32
    %299 = vector.broadcast %cst_102 : f32 to vector<8x8xf32>
    %cst_103 = arith.constant dense<0.000000e+00> : vector<8x352xf32>
    %300 = tpu.matmul %299, %298, %cst_103 {dimension_numbers = #tpu.dot_dimension_numbers<[1], [0], [0], [1], [0, 0, 1, 1], [], []>} : vector<8x8xf32>, vector<8x352xf32>, vector<8x352xf32> -> vector<8x352xf32>
    %301 = arith.subf %298, %300 : vector<8x352xf32>
    %302 = arith.mulf %301, %301 : vector<8x352xf32>
    %cst_104 = arith.constant dense<0.000000e+00> : vector<8x352xf32>
    %303 = tpu.matmul %299, %302, %cst_104 {dimension_numbers = #tpu.dot_dimension_numbers<[1], [0], [0], [1], [0, 0, 1, 1], [], []>} : vector<8x8xf32>, vector<8x352xf32>, vector<8x352xf32> -> vector<8x352xf32>
    %304 = vector.extract_strided_slice %303 {offsets = [0, 0], sizes = [1, 352], strides = [1, 1]} : vector<8x352xf32> to vector<1x352xf32>
    %cst_105 = arith.constant 9.99999997E-7 : f32
    %305 = vector.broadcast %cst_105 : f32 to vector<1x352xf32>
    %306 = arith.addf %304, %305 : vector<1x352xf32>
    %307 = math.rsqrt %306 : vector<1x352xf32>
    %308 = vector.broadcast %307 : vector<1x352xf32> to vector<8x352xf32>
    %309 = arith.mulf %301, %308 : vector<8x352xf32>
    %c0_106 = arith.constant 0 : index
    %c0_107 = arith.constant 0 : index
    %310 = vector.load %arg4[%c0_106, %c0_107] : memref<8x1xf32, #tpu.memory_space<vmem>>, vector<8x1xf32>
    %311 = vector.broadcast %310 : vector<8x1xf32> to vector<8x352xf32>
    %312 = arith.mulf %309, %311 : vector<8x352xf32>
    %c0_108 = arith.constant 0 : index
    %c0_109 = arith.constant 0 : index
    %313 = vector.load %arg5[%c0_108, %c0_109] : memref<8x1xf32, #tpu.memory_space<vmem>>, vector<8x1xf32>
    %314 = vector.broadcast %313 : vector<8x1xf32> to vector<8x352xf32>
    %315 = arith.addf %312, %314 : vector<8x352xf32>
    %c0_110 = arith.constant 0 : index
    %c0_111 = arith.constant 0 : index
    %316 = vector.load %arg6[%c0_110, %c0_111] : memref<32x8xf32, #tpu.memory_space<vmem>>, vector<32x8xf32>
    %cst_112 = arith.constant dense<0.000000e+00> : vector<32x352xf32>
    %317 = tpu.matmul %316, %315, %cst_112 {dimension_numbers = #tpu.dot_dimension_numbers<[1], [0], [0], [1], [0, 0, 1, 1], [], []>} : vector<32x8xf32>, vector<8x352xf32>, vector<32x352xf32> -> vector<32x352xf32>
    %c0_113 = arith.constant 0 : index
    %c0_114 = arith.constant 0 : index
    %318 = vector.load %arg7[%c0_113, %c0_114] : memref<32x1xf32, #tpu.memory_space<vmem>>, vector<32x1xf32>
    %319 = vector.broadcast %318 : vector<32x1xf32> to vector<32x352xf32>
    %320 = arith.addf %317, %319 : vector<32x352xf32>
    %cst_115 = arith.constant 5.000000e-01 : f32
    %321 = vector.broadcast %cst_115 : f32 to vector<32x352xf32>
    %322 = arith.mulf %321, %320 : vector<32x352xf32>
    %cst_116 = arith.constant 0.707106769 : f32
    %323 = vector.broadcast %cst_116 : f32 to vector<32x352xf32>
    %324 = arith.mulf %320, %323 : vector<32x352xf32>
    %325 = math.absf %324 : vector<32x352xf32>
    %cst_117 = arith.constant 0.327591091 : f32
    %326 = vector.broadcast %cst_117 : f32 to vector<32x352xf32>
    %327 = arith.mulf %326, %325 : vector<32x352xf32>
    %cst_118 = arith.constant 1.000000e+00 : f32
    %328 = vector.broadcast %cst_118 : f32 to vector<32x352xf32>
    %329 = arith.addf %328, %327 : vector<32x352xf32>
    %cst_119 = arith.constant 1.000000e+00 : f32
    %330 = vector.broadcast %cst_119 : f32 to vector<32x352xf32>
    %331 = arith.divf %330, %329 : vector<32x352xf32>
    %cst_120 = arith.constant 1.06140542 : f32
    %332 = vector.broadcast %cst_120 : f32 to vector<32x352xf32>
    %333 = arith.mulf %332, %331 : vector<32x352xf32>
    %cst_121 = arith.constant -1.45315206 : f32
    %334 = vector.broadcast %cst_121 : f32 to vector<32x352xf32>
    %335 = arith.addf %333, %334 : vector<32x352xf32>
    %336 = arith.mulf %335, %331 : vector<32x352xf32>
    %cst_122 = arith.constant 1.42141378 : f32
    %337 = vector.broadcast %cst_122 : f32 to vector<32x352xf32>
    %338 = arith.addf %336, %337 : vector<32x352xf32>
    %339 = arith.mulf %338, %331 : vector<32x352xf32>
    %cst_123 = arith.constant -0.284496725 : f32
    %340 = vector.broadcast %cst_123 : f32 to vector<32x352xf32>
    %341 = arith.addf %339, %340 : vector<32x352xf32>
    %342 = arith.mulf %341, %331 : vector<32x352xf32>
    %cst_124 = arith.constant 0.254829586 : f32
    %343 = vector.broadcast %cst_124 : f32 to vector<32x352xf32>
    %344 = arith.addf %342, %343 : vector<32x352xf32>
    %345 = arith.mulf %344, %331 : vector<32x352xf32>
    %346 = arith.mulf %325, %325 : vector<32x352xf32>
    %cst_125 = arith.constant 0.000000e+00 : f32
    %347 = vector.broadcast %cst_125 : f32 to vector<32x352xf32>
    %348 = arith.subf %347, %346 : vector<32x352xf32>
    %349 = math.exp %348 : vector<32x352xf32>
    %350 = arith.mulf %345, %349 : vector<32x352xf32>
    %cst_126 = arith.constant 1.000000e+00 : f32
    %351 = vector.broadcast %cst_126 : f32 to vector<32x352xf32>
    %352 = arith.subf %351, %350 : vector<32x352xf32>
    %cst_127 = arith.constant 0.000000e+00 : f32
    %353 = vector.broadcast %cst_127 : f32 to vector<32x352xf32>
    %354 = arith.cmpf oge, %324, %353 : vector<32x352xf32>
    %cst_128 = arith.constant 0.000000e+00 : f32
    %355 = vector.broadcast %cst_128 : f32 to vector<32x352xf32>
    %356 = arith.subf %355, %352 : vector<32x352xf32>
    %357 = arith.select %354, %352, %356 : vector<32x352xi1>, vector<32x352xf32>
    %cst_129 = arith.constant 1.000000e+00 : f32
    %358 = vector.broadcast %cst_129 : f32 to vector<32x352xf32>
    %359 = arith.addf %358, %357 : vector<32x352xf32>
    %360 = arith.mulf %322, %359 : vector<32x352xf32>
    %c0_130 = arith.constant 0 : index
    %c0_131 = arith.constant 0 : index
    %361 = vector.load %arg8[%c0_130, %c0_131] : memref<8x32xf32, #tpu.memory_space<vmem>>, vector<8x32xf32>
    %cst_132 = arith.constant dense<0.000000e+00> : vector<8x352xf32>
    %362 = tpu.matmul %361, %360, %cst_132 {dimension_numbers = #tpu.dot_dimension_numbers<[1], [0], [0], [1], [0, 0, 1, 1], [], []>} : vector<8x32xf32>, vector<32x352xf32>, vector<8x352xf32> -> vector<8x352xf32>
    %c0_133 = arith.constant 0 : index
    %c0_134 = arith.constant 0 : index
    %363 = vector.load %arg9[%c0_133, %c0_134] : memref<8x1xf32, #tpu.memory_space<vmem>>, vector<8x1xf32>
    %364 = vector.broadcast %363 : vector<8x1xf32> to vector<8x352xf32>
    %365 = arith.addf %362, %364 : vector<8x352xf32>
    %c0_135 = arith.constant 0 : index
    %c0_136 = arith.constant 0 : index
    %c69_137 = arith.constant 69 : index
    %366 = vector.load %arg1[%c0_135, %c0_136, %c69_137] : memref<1x8x512xf32, #tpu.memory_space<vmem>>, vector<1x8x352xf32>
    %367 = vector.shape_cast %366 : vector<1x8x352xf32> to vector<8x352xf32>
    %368 = arith.addf %365, %367 : vector<8x352xf32>
    %c0_138 = arith.constant 0 : index
    %c0_139 = arith.constant 0 : index
    %c0_140 = arith.constant 0 : index
    %369 = vector.load %arg10[%c0_138, %c0_139, %c0_140] : memref<1x8x352xf32, #tpu.memory_space<vmem>>, vector<1x8x352xf32>
    %370 = vector.shape_cast %369 : vector<1x8x352xf32> to vector<8x352xf32>
    %371 = vector.shape_cast %368 : vector<8x352xf32> to vector<1x8x352xf32>
    tpu.vector_store %arg10[%c0_138, %c0_139, %c0_140], %371 {strides = array<i32>} : memref<1x8x352xf32, #tpu.memory_space<vmem>>, vector<1x8x352xf32>,
    return
  }
  func.func @transform_0(%arg0: i32) -> (i32, i32, i32) {
    %c0_i32 = arith.constant 0 : i32
    %c0_i32_0 = arith.constant 0 : i32
    %c0_i32_1 = arith.constant 0 : i32
    return %arg0, %c0_i32, %c0_i32_0 : i32, i32, i32
  }
  func.func @transform_1(%arg0: i32) -> (i32, i32) {
    %c0_i32 = arith.constant 0 : i32
    %c0_i32_0 = arith.constant 0 : i32
    %c0_i32_1 = arith.constant 0 : i32
    return %c0_i32, %c0_i32_0 : i32, i32
  }
  func.func @transform_2(%arg0: i32) -> (i32, i32) {
    %c0_i32 = arith.constant 0 : i32
    %c0_i32_0 = arith.constant 0 : i32
    %c0_i32_1 = arith.constant 0 : i32
    return %c0_i32, %c0_i32_0 : i32, i32
  }
  func.func @transform_3(%arg0: i32) -> (i32, i32) {
    %c0_i32 = arith.constant 0 : i32
    %c0_i32_0 = arith.constant 0 : i32
    %c0_i32_1 = arith.constant 0 : i32
    return %c0_i32, %c0_i32_0 : i32, i32
  }
  func.func @transform_4(%arg0: i32) -> (i32, i32) {
    %c0_i32 = arith.constant 0 : i32
    %c0_i32_0 = arith.constant 0 : i32
    %c0_i32_1 = arith.constant 0 : i32
    return %c0_i32, %c0_i32_0 : i32, i32
  }
  func.func @transform_5(%arg0: i32) -> (i32, i32) {
    %c0_i32 = arith.constant 0 : i32
    %c0_i32_0 = arith.constant 0 : i32
    %c0_i32_1 = arith.constant 0 : i32
    return %c0_i32, %c0_i32_0 : i32, i32
  }
  func.func @transform_6(%arg0: i32) -> (i32, i32) {
    %c0_i32 = arith.constant 0 : i32
    %c0_i32_0 = arith.constant 0 : i32
    %c0_i32_1 = arith.constant 0 : i32
    return %c0_i32, %c0_i32_0 : i32, i32
  }
  func.func @transform_7(%arg0: i32) -> (i32, i32) {
    %c0_i32 = arith.constant 0 : i32
    %c0_i32_0 = arith.constant 0 : i32
    %c0_i32_1 = arith.constant 0 : i32
    return %c0_i32, %c0_i32_0 : i32, i32
  }
  func.func @transform_8(%arg0: i32) -> (i32, i32) {
    %c0_i32 = arith.constant 0 : i32
    %c0_i32_0 = arith.constant 0 : i32
    %c0_i32_1 = arith.constant 0 : i32
    return %c0_i32, %c0_i32_0 : i32, i32
  }
  func.func @transform_9(%arg0: i32) -> (i32, i32, i32) {
    %c0_i32 = arith.constant 0 : i32
    %c0_i32_0 = arith.constant 0 : i32
    %c0_i32_1 = arith.constant 0 : i32
    return %arg0, %c0_i32, %c0_i32_0 : i32, i32, i32
  }
}

</mosaic_0001>

<bundles_post_ra>
// kernel: tpu_custom_call.1
= control target key start
LH: loop header
LB: loop body
LE: loop exit
PB: predicated region body
PF: predicated region fallthrough
CT: control target
= control target key end

     0   :  { %14 = vsyncpa [#allocation3], 0  ;;  %s4832_s0 = inlined_call_operand.vmem [shape: f32[2,8,512], index: 0, kind: input, shape index: {}]   ;;  %s4833_s1 = inlined_call_operand.vmem [shape: f32[8,49], index: 1, kind: input, shape index: {}]   ;;  %s4834_s2 = inlined_call_operand.vmem [shape: f32[8,1], index: 2, kind: input, shape index: {}]   ;;  %s4835_s3 = inlined_call_operand.vmem [shape: f32[8,1], index: 3, kind: input, shape index: {}]   ;;  %s4836_s4 = inlined_call_operand.vmem [shape: f32[8,1], index: 4, kind: input, shape index: {}]   ;;  %s4837_s5 = inlined_call_operand.vmem [shape: f32[32,8], index: 5, kind: input, shape index: {}]   ;;  %s4838_s6 = inlined_call_operand.vmem [shape: f32[32,1], index: 6, kind: input, shape index: {}]   ;;  %s4839_s7 = inlined_call_operand.vmem [shape: f32[8,32], index: 7, kind: input, shape index: {}]   ;;  %s4840_s8 = inlined_call_operand.vmem [shape: f32[8,1], index: 8, kind: input, shape index: {}]   ;;  %s4841_s9 = inlined_call_operand.hbm [shape: f32[2,8,352], index: 9, kind: output, shape index: {}]  }
   0x1   :  { %16 = vsyncpa [#allocation3 + $0x1], 0  ;;  %s3358_s30 = smov 0   ;;  %s3360_s10 = smov 0  }
   0x2   :  { %s3362_s11 = smov 0   ;;  %s3364_s12 = smov 0  }
   0x3 LB: > { %s3379_s13 = sadd.s32 4294967295, %s3207_s12   ;;  %s2816_s14 = sadd.s32 4294967294, %s3207_s12   ;;  %s3207_s12 = sphi %s3364_s12, %s4953_s12   ;;  %s3203_s11 = sphi %s3362_s11, %s4952_s11   ;;  %s3199_s10 = sphi %s3360_s10, %s4951_s10   ;;  %s3195_s30 = sphi %s3358_s30, %s4950_s30  }
   0x4   : > { %s3383_s15 = sadd.s32 1, %s3207_s12   ;;  %s223_s16 = sadd.s32 1, %s3203_s11 }
   0x5   : > { %s220_s17 = ssub.s32 %s3207_s12, %s3383_s15  ;;  %p233_p0 = scmp.ne.s32.totalorder %s3203_s11, %s3199_s10 }
   0x6   : > { %p221_p1 = scmp.eq.s32.totalorder %s220_s17, 0  ;;  %p234_p2 = scmp.eq.s32.totalorder %s3379_s13, 1 }
   0x7   : > { %p239_p3 = scmp.ne.s32.totalorder %s3199_s10, %s3195_s30  ;;  %p240_p4 = scmp.eq.s32.totalorder %s2816_s14, 1 }
   0x8   : > { %s3394_s18 = scalar_select %p221_p1, %s3203_s11, %s223_s16  }
   0x9   : > { %p3396_p5 = por %p234_p2, %p233_p0  ;;  %p3400_p6 = por %p240_p4, %p239_p3 }
   0xa   : > { %p2819_p7 = scmp.ge.s32.totalorder %s3207_s12, 1  ;;  %p290_p8 = scmp.lt.s32.totalorder %s3207_s12, 3 }
   0xc   : > { %p291_p9 = pnand %p2819_p7, %p290_p8 }
   0xe   : > { %294 = sbr.rel (%p291_p9) target bundleno = 1657 (0x679), region = 56 }
  0x15   : > { %v3409_v0 = vld [vmem:[%s4833_s1] sm:$0xff]  ;;  %v3209_v1 = vmov 3   ;;  %v3210_v2 = vmov 1   ;;  %v3211_v3 = vmov 4   ;;  %v3212_v4 = vmov 2   ;;  %p326_p10 = scmp.lt.s32.totalorder %s3379_s13, 1 }
  0x16   : > { %3038 = vset.pattern.permute.xlu1 %v3209_v1  ;;  %3036 = vset.pattern.permute.xlu0 %v3210_v2  ;;  %v3213_v5 = vmov 5   ;;  %v3214_v6 = vmov 6   ;;  %v3215_v7 = vmov 7   ;;  %v3216_v8 = vmov 9   ;;  %s3248_s28 = smov 127   ;;  %s3250_s29 = smov 126  }
  0x17   : > { %397 = vperm.xlu1 %3038, %v3409_v0   ;;  %347 = vperm.xlu0 %3036, %v3409_v0   ;;  %v3217_v9 = vmov 8   ;;  %v3218_v10 = vmov 12   ;;  %v3219_v11 = vmov 10   ;;  %v3220_v12 = vmov 15   ;;  %s327_s23 = scalar_select %p326_p10, %s3379_s13, 1 }
  0x18   : > { %v3221_v13 = vmov 11   ;;  %v3222_v14 = vmov 18   ;;  %v3223_v15 = vmov 13   ;;  %v3224_v16 = vmov 21   ;;  %s3252_s14 = smov 125   ;;  %s3253_s16 = smov 124  }
  0x19   : > { %v3225_v17 = vmov 14   ;;  %v3226_v18 = vmov 24   ;;  %v3227_v19 = vmov 16   ;;  %v3228_v20 = vmov 27   ;;  %s2839_s24 = sshll.u32 %s327_s23, 5  ;;  %s4844_s17 = smov 123  }
  0x1a   : > { %v3229_v21 = vmov 17   ;;  %v3230_v22 = vmov 30   ;;  %v3231_v23 = vmov 19   ;;  %v3232_v24 = vmov 32   ;;  %s3455_s27 = scalar_lea.vmem %s4832_s0, %s2839_s24  ;;  %s4842_s21 = smov 122  }
  0x1b   : > { %3039 = vset.pattern.permute.xlu1 %v3211_v3  ;;  %3037 = vset.pattern.permute.xlu0 %v3212_v4  ;;  %v3233_v25 = vmov 20   ;;  %v3234_v26 = vmov 0   ;;  %v3235_v27 = vmov 22   ;;  %v3236_v28 = vmov 23   ;;  %v3459_v39 = vld [vmem:[%s3455_s27 + $0x8] sm:$0xff]  ;;  %v3463_v44 = vld [vmem:[%s3455_s27] sm:$0xff] }
  0x1c   : > { %422 = vperm.xlu1 %3039, %v3409_v0   ;;  %372 = vperm.xlu0 %3037, %v3409_v0   ;;  %v3237_v29 = vmov 25   ;;  %v3238_v30 = vmov 26   ;;  %v3239_v31 = vmov 28   ;;  %v3240_v32 = vmov 29   ;;  %v3468_v48 = vld [vmem:[%s3455_s27 + $0x10] sm:$0xff]  ;;  %s3256_s22 = smov 106  }
  0x1d   : > { %v3241_v33 = vmov 31   ;;  %v3242_v34 = vmov 33   ;;  %v3243_v35 = vmov 34   ;;  %v3244_v36 = vmov 35   ;;  %s3258_s23 = smov 105   ;;  %s3260_s24 = smov 104  }
  0x1e   : > { %v3245_v37 = vmov 36   ;;  %v3246_v38 = vmov 37   ;;  %v3247_v43 = vmov 38   ;;  %v3249_v49 = vmov 39   ;;  %s3262_s25 = smov 103   ;;  %s3264_s26 = smov 102  }
  0x1f   : > { %v3251_v54 = vmov 40   ;;  %vm362_vm0 = vcmask 1039360   ;;  %vm387_vm1 = vcmask 1031168   ;;  %vm412_vm2 = vcmask 1022976  }
  0x20   : > { %3040 = vset.pattern.permute.xlu1 %v3213_v5  ;;  %3041 = vset.pattern.permute.xlu0 %v3214_v6  ;;  %vm437_vm3 = vcmask 1014784   ;;  %vm462_vm4 = vcmask 1006592   ;;  %vm487_vm5 = vcmask 998400   ;;  %vm512_vm6 = vcmask 867328  }
  0x21   : > { %447 = vperm.xlu1 %3040, %v3409_v0   ;;  %472 = vperm.xlu0 %3041, %v3409_v0   ;;  %vm537_vm7 = vcmask 859136   ;;  %vm562_vm8 = vcmask 850944   ;;  %vm587_vm9 = vcmask 842752   ;;  %vm612_vm10 = vcmask 834560  }
  0x22   : > { %vm637_vm11 = vcmask 826368   ;;  %vm662_vm12 = vcmask 818176   ;;  %vm695_vm13 = vcmask 687104   ;;  %vm725_vm14 = vcmask 678912  }
  0x23   : > { %vm755_vm15 = vcmask 670720  }
  0x25   : > { %3042 = vset.pattern.permute.xlu1 %v3215_v7  ;;  %3044 = vset.pattern.permute.xlu0 %v3216_v8 }
  0x26   : > { %497 = vperm.xlu1 %3042, %v3409_v0   ;;  %547 = vperm.xlu0 %3044, %v3409_v0  }
  0x2a   : > { %3043 = vset.pattern.permute.xlu1 %v3217_v9  ;;  %3047 = vset.pattern.permute.xlu0 %v3218_v10 }
  0x2b   : > { %522 = vperm.xlu1 %3043, %v3409_v0   ;;  %622 = vperm.xlu0 %3047, %v3409_v0  }
  0x2f   : > { %3045 = vset.pattern.permute.xlu1 %v3219_v11  ;;  %3050 = vset.pattern.permute.xlu0 %v3220_v12  ;;  %v3257_v11 = vmov 41  }
  0x30   : > { %572 = vperm.xlu1 %3045, %v3409_v0   ;;  %706 = vperm.xlu0 %3050, %v3409_v0  }
  0x34   : > { %3046 = vset.pattern.permute.xlu1 %v3221_v13  ;;  %3053 = vset.pattern.permute.xlu0 %v3222_v14 }
  0x35   : > { %597 = vperm.xlu1 %3046, %v3409_v0   ;;  %796 = vperm.xlu0 %3053, %v3409_v0  }
  0x39   : > { %3048 = vset.pattern.permute.xlu1 %v3223_v15  ;;  %3056 = vset.pattern.permute.xlu0 %v3224_v16  ;;  %v3259_v16 = vmov 42  }
  0x3a   : > { %647 = vperm.xlu1 %3048, %v3409_v0   ;;  %886 = vperm.xlu0 %3056, %v3409_v0  }
  0x3e   : > { %3049 = vset.pattern.permute.xlu1 %v3225_v17  ;;  %3059 = vset.pattern.permute.xlu0 %v3226_v18 }
  0x3f   : > { %676 = vperm.xlu1 %3049, %v3409_v0   ;;  %976 = vperm.xlu0 %3059, %v3409_v0  }
  0x43   : > { %3051 = vset.pattern.permute.xlu1 %v3227_v19  ;;  %3062 = vset.pattern.permute.xlu0 %v3228_v20 }
  0x44   : > { %736 = vperm.xlu1 %3051, %v3409_v0   ;;  %1066 = vperm.xlu0 %3062, %v3409_v0  }
  0x48   : > { %3052 = vset.pattern.permute.xlu1 %v3229_v21  ;;  %3065 = vset.pattern.permute.xlu0 %v3230_v22 }
  0x49   : > { %766 = vperm.xlu1 %3052, %v3409_v0   ;;  %1156 = vperm.xlu0 %3065, %v3409_v0  }
  0x4d   : > { %3054 = vset.pattern.permute.xlu1 %v3231_v23  ;;  %3068 = vset.pattern.permute.xlu0 %v3232_v24  ;;  %v3261_v23 = vmov 43  }
  0x4e   : > { %826 = vperm.xlu1 %3054, %v3409_v0   ;;  %1216 = vperm.xlu0 %3068, %v3409_v0  }
  0x52   : > { %3055 = vset.pattern.permute.xlu1 %v3233_v25  ;;  %3086 = vset.pattern.permute.xlu0 %v3234_v26 }
  0x53   : > { %856 = vperm.xlu1 %3055, %v3409_v0  }
  0x57   : > { %3057 = vset.pattern.permute.xlu1 %v3235_v27 }
  0x58   : > { %916 = vperm.xlu1 %3057, %v3409_v0  }
  0x5c   : > { %3058 = vset.pattern.permute.xlu1 %v3236_v28 }
  0x5d   : > { %946 = vperm.xlu1 %3058, %v3409_v0  }
  0x61   : > { %3060 = vset.pattern.permute.xlu1 %v3237_v29 }
  0x62   : > { %1006 = vperm.xlu1 %3060, %v3409_v0  }
  0x66   : > { %3061 = vset.pattern.permute.xlu1 %v3238_v30  ;;  %v3263_v30 = vmov 44  }
  0x67   : > { %1036 = vperm.xlu1 %3061, %v3409_v0  }
  0x6b   : > { %3063 = vset.pattern.permute.xlu1 %v3239_v31 }
  0x6c   : > { %1096 = vperm.xlu1 %3063, %v3409_v0  }
  0x70   : > { %3064 = vset.pattern.permute.xlu1 %v3240_v32 }
  0x71   : > { %1126 = vperm.xlu1 %3064, %v3409_v0  }
  0x75   : > { %3066 = vset.pattern.permute.xlu1 %v3234_v26 }
  0x76   : > { %337 = vperm.xlu1 %3066, %v3409_v0  }
  0x7a   : > { %3067 = vset.pattern.permute.xlu1 %v3241_v33 }
  0x7b   : > { %1186 = vperm.xlu1 %3067, %v3409_v0  }
  0x7f   : > { %3069 = vset.pattern.permute.xlu1 %v3242_v34 }
  0x80   : > { %1246 = vperm.xlu1 %3069, %v3409_v0  }
  0x84   : > { %3070 = vset.pattern.permute.xlu1 %v3243_v35 }
  0x85   : > { %1276 = vperm.xlu1 %3070, %v3409_v0  }
  0x89   : > { %3071 = vset.pattern.permute.xlu1 %v3244_v36  ;;  %v3265_v36 = vmov 45  }
  0x8a   : > { %1306 = vperm.xlu1 %3071, %v3409_v0  }
  0x8e   : > { %3072 = vset.pattern.permute.xlu1 %v3245_v37 }
  0x8f   : > { %1336 = vperm.xlu1 %3072, %v3409_v0  }
  0x93   : > { %3073 = vset.pattern.permute.xlu1 %v3246_v38 }
  0x94   : > { %1366 = vperm.xlu1 %3073, %v3409_v0  }
  0x96   : > { %v398_v40 = vpop.permute.xlu1 %397  ;;  %v348_v41 = vpop.permute.xlu0 %347 }
  0x97   : > { %v351_v42 = vmul.f32 %v348_v41, %v3459_v39  ;;  %v350_v46 = vmul.f32 %v3463_v44, %v348_v41  ;;  %v352_v52 = vmul.f32 %v3468_v48, %v348_v41  ;;  %v401_v57 = vmul.f32 %v398_v40, %v3459_v39 }
  0x98   : > { %3074 = vset.pattern.permute.xlu1 %v3247_v43  ;;  %v402_v58 = vmul.f32 %v3468_v48, %v398_v40  ;;  %v400_v60 = vmul.f32 %v3463_v44, %v398_v40 }
  0x99   : > { %1396 = vperm.xlu1 %3074, %v3409_v0   ;;  %358 = vrot.lane.b32.xlu0 %v351_v42, %s3248_s28 }
  0x9b   : > { %v423_v45 = vpop.permute.xlu1 %422  ;;  %v373_v47 = vpop.permute.xlu0 %372 }
  0x9c   : > { %v376_v50 = vmul.f32 %v373_v47, %v3459_v39  ;;  %v375_v53 = vmul.f32 %v3463_v44, %v373_v47  ;;  %v377_v55 = vmul.f32 %v3468_v48, %v373_v47  ;;  %v427_v61 = vmul.f32 %v3468_v48, %v423_v45 }
  0x9d   : > { %3075 = vset.pattern.permute.xlu1 %v3249_v49  ;;  %356 = vrot.lane.b32.xlu0 %v350_v46, %s3248_s28  ;;  %v426_v63 = vmul.f32 %v423_v45, %v3459_v39  ;;  %v425_v4 = vmul.f32 %v3463_v44, %v423_v45  ;;  %v3267_v45 = vmov 46  }
  0x9e   : > { %1426 = vperm.xlu1 %3075, %v3409_v0  }
  0xa0   : > { %v448_v51 = vpop.permute.xlu1 %447  ;;  %v473_v1 = vpop.permute.xlu0 %472 }
  0xa1   : > { %383 = vrot.lane.b32.xlu0 %v376_v50, %s3250_s29  ;;  %v452_v2 = vmul.f32 %v3468_v48, %v448_v51  ;;  %v477_v3 = vmul.f32 %v3468_v48, %v473_v1  ;;  %v451_v6 = vmul.f32 %v448_v51, %v3459_v39  ;;  %v450_v8 = vmul.f32 %v3463_v44, %v448_v51 }
  0xa2   : > { %360 = vrot.lane.b32.xlu1 %v352_v52, %s3248_s28  ;;  %v476_v12 = vmul.f32 %v473_v1, %v3459_v39  ;;  %v475_v14 = vmul.f32 %v3463_v44, %v473_v1  ;;  %s3266_s28 = smov 101  }
  0xa3   : > { %3076 = vset.pattern.permute.xlu1 %v3251_v54 }
  0xa5   : > { %v498_v56 = vpop.permute.xlu1 %497  ;;  %381 = vrot.lane.b32.xlu0 %v375_v53, %s3250_s29  ;;  %v548_v18 = vpop.permute.xlu0 %547  ;;  %v3269_v53 = vmov 47  }
  0xa6   : > { %385 = vrot.lane.b32.xlu1 %v377_v55, %s3250_s29  ;;  %v502_v9 = vmul.f32 %v3468_v48, %v498_v56  ;;  %v501_v17 = vmul.f32 %v498_v56, %v3459_v39  ;;  %v552_v20 = vmul.f32 %v3468_v48, %v548_v18  ;;  %v500_v21 = vmul.f32 %v3463_v44, %v498_v56  ;;  %s3268_s29 = smov 100  }
  0xa7   : > { %v551_v31 = vmul.f32 %v548_v18, %v3459_v39  ;;  %v550_v32 = vmul.f32 %v3463_v44, %v548_v18 }
  0xa9   : > { %408 = vrot.lane.b32.xlu0 %v401_v57, %s3252_s14 }
  0xaa   : > { %v523_v59 = vpop.permute.xlu1 %522  ;;  %410 = vrot.lane.b32.xlu1 %v402_v58, %s3252_s14  ;;  %v623_v35 = vpop.permute.xlu0 %622 }
  0xab   : > { %v527_v15 = vmul.f32 %v3468_v48, %v523_v59  ;;  %v526_v24 = vmul.f32 %v523_v59, %v3459_v39  ;;  %v525_v27 = vmul.f32 %v3463_v44, %v523_v59  ;;  %v627_v41 = vmul.f32 %v3468_v48, %v623_v35 }
  0xac   : > { %v626_v54 = vmul.f32 %v623_v35, %v3459_v39  ;;  %v625_v56 = vmul.f32 %v3463_v44, %v623_v35 }
  0xad   : > { %406 = vrot.lane.b32.xlu0 %v400_v60, %s3252_s14  ;;  %s3270_s14 = smov 84   ;;  %v3271_v60 = vmov 48  }
  0xae   : > { %435 = vrot.lane.b32.xlu1 %v427_v61, %s3253_s16 }
  0xaf   : > { %v3480_v62 = vpop.permute.xlu1 %572  ;;  %v3538_v40 = vpop.permute.xlu0 %706 }
  0xb0   : > { %v577_v28 = vmul.f32 %v3468_v48, %v3480_v62  ;;  %v576_v37 = vmul.f32 %v3480_v62, %v3459_v39  ;;  %v575_v42 = vmul.f32 %v3463_v44, %v3480_v62 }
  0xb1   : > { %433 = vrot.lane.b32.xlu0 %v426_v63, %s3253_s16 }
  0xb2   : > { %460 = vrot.lane.b32.xlu1 %v452_v2, %s4844_s17  ;;  %v711_v2 = vmul.f32 %v3538_v40, %v3468_v48 }
  0xb4   : > { %v3488_v5 = vpop.permute.xlu1 %597  ;;  %v3548_v47 = vpop.permute.xlu0 %796 }
  0xb5   : > { %431 = vrot.lane.b32.xlu0 %v425_v4, %s3253_s16  ;;  %v602_v34 = vmul.f32 %v3468_v48, %v3488_v5  ;;  %v601_v46 = vmul.f32 %v3488_v5, %v3459_v39  ;;  %v600_v50 = vmul.f32 %v3463_v44, %v3488_v5 }
  0xb6   : > { %485 = vrot.lane.b32.xlu1 %v477_v3, %s4842_s21 }
  0xb9   : > { %v3493_v7 = vpop.permute.xlu1 %647  ;;  %458 = vrot.lane.b32.xlu0 %v451_v6, %s4844_s17  ;;  %v3557_v52 = vpop.permute.xlu0 %886 }
  0xba   : > { %1456 = vperm.xlu1 %3076, %v3409_v0   ;;  %v652_v51 = vmul.f32 %v3468_v48, %v3493_v7  ;;  %v651_v61 = vmul.f32 %v3493_v7, %v3459_v39  ;;  %v650_v1 = vmul.f32 %v3463_v44, %v3493_v7 }
  0xbd   : > { %456 = vrot.lane.b32.xlu0 %v450_v8, %s4844_s17  ;;  %s3280_s17 = smov 60  }
  0xbe   : > { %v3500_v10 = vpop.permute.xlu1 %676  ;;  %510 = vrot.lane.b32.xlu1 %v502_v9, %s3256_s22  ;;  %v3564_v57 = vpop.permute.xlu0 %976 }
  0xbf   : > { %3077 = vset.pattern.permute.xlu1 %v3257_v11  ;;  %v681_v58 = vmul.f32 %v3500_v10, %v3468_v48  ;;  %v680_v4 = vmul.f32 %v3500_v10, %v3459_v39  ;;  %v679_v6 = vmul.f32 %v3500_v10, %v3463_v44 }
  0xc1   : > { %483 = vrot.lane.b32.xlu0 %v476_v12, %s4842_s21 }
  0xc2   : > { %1486 = vperm.xlu1 %3077, %v3409_v0  }
  0xc3   : > { %v3505_v13 = vpop.permute.xlu1 %736  ;;  %v3573_v62 = vpop.permute.xlu0 %1066 }
  0xc4   : > { %v739_v8 = vmul.f32 %v3505_v13, %v3463_v44 }
  0xc5   : > { %481 = vrot.lane.b32.xlu0 %v475_v14, %s4842_s21  ;;  %s3279_s21 = smov 61  }
  0xc6   : > { %535 = vrot.lane.b32.xlu1 %v527_v15, %s3258_s23  ;;  %v709_v15 = vmul.f32 %v3538_v40, %v3463_v44 }
  0xc7   : > { %3078 = vset.pattern.permute.xlu1 %v3259_v16  ;;  %v800_v16 = vmul.f32 %v3548_v47, %v3459_v39 }
  0xc8   : > { %v3511_v19 = vpop.permute.xlu1 %766  ;;  %v3587_v5 = vpop.permute.xlu0 %1156 }
  0xc9   : > { %508 = vrot.lane.b32.xlu0 %v501_v17, %s3256_s22  ;;  %v771_v11 = vmul.f32 %v3511_v19, %v3468_v48 }
  0xca   : > { %1516 = vperm.xlu1 %3078, %v3409_v0  }
  0xcd   : > { %v3516_v22 = vpop.permute.xlu1 %826  ;;  %506 = vrot.lane.b32.xlu0 %v500_v21, %s3256_s22  ;;  %s3272_s22 = smov 83   ;;  %v3601_v9 = vpop.permute.xlu0 %1216  ;;  %v799_v21 = vmul.f32 %v3548_v47, %v3463_v44 }
  0xce   : > { %560 = vrot.lane.b32.xlu1 %v552_v20, %s3260_s24  ;;  %v741_v20 = vmul.f32 %v3505_v13, %v3468_v48 }
  0xcf   : > { %3079 = vset.pattern.permute.xlu1 %v3261_v23 }
  0xd1   : > { %533 = vrot.lane.b32.xlu0 %v526_v24, %s3258_s23 }
  0xd2   : > { %v3519_v25 = vpop.permute.xlu1 %856  ;;  %1540 = vperm.xlu1 %3079, %v3409_v0  }
  0xd5   : > { %531 = vrot.lane.b32.xlu0 %v525_v27, %s3258_s23  ;;  %s3273_s23 = smov 82   ;;  %v770_v27 = vmul.f32 %v3511_v19, %v3459_v39 }
  0xd6   : > { %585 = vrot.lane.b32.xlu1 %v577_v28, %s3262_s25  ;;  %v831_v28 = vmul.f32 %v3516_v22, %v3468_v48 }
  0xd7   : > { %v3525_v29 = vpop.permute.xlu1 %916  ;;  %3080 = vset.pattern.permute.xlu1 %v3263_v30 }
  0xd9   : > { %558 = vrot.lane.b32.xlu0 %v551_v31, %s3260_s24  ;;  %v769_v31 = vmul.f32 %v3511_v19, %v3463_v44 }
  0xda   : > { %1564 = vperm.xlu1 %3080, %v3409_v0  }
  0xdc   : > { %v3530_v33 = vpop.permute.xlu1 %946 }
  0xdd   : > { %556 = vrot.lane.b32.xlu0 %v550_v32, %s3260_s24  ;;  %s3274_s24 = smov 81  }
  0xde   : > { %610 = vrot.lane.b32.xlu1 %v602_v34, %s3264_s26  ;;  %v860_v34 = vmul.f32 %v3519_v25, %v3459_v39 }
  0xdf   : > { %3081 = vset.pattern.permute.xlu1 %v3265_v36  ;;  %v801_v36 = vmul.f32 %v3548_v47, %v3468_v48 }
  0xe1   : > { %v3536_v38 = vpop.permute.xlu1 %1006  ;;  %583 = vrot.lane.b32.xlu0 %v576_v37, %s3262_s25  ;;  %v859_v37 = vmul.f32 %v3519_v25, %v3463_v44 }
  0xe2   : > { %1588 = vperm.xlu1 %3081, %v3409_v0  }
  0xe5   : > { %581 = vrot.lane.b32.xlu0 %v575_v42, %s3262_s25  ;;  %s3275_s25 = smov 80  }
  0xe6   : > { %v3544_v43 = vpop.permute.xlu1 %1036  ;;  %635 = vrot.lane.b32.xlu1 %v627_v41, %s3266_s28 }
  0xe7   : > { %3082 = vset.pattern.permute.xlu1 %v3267_v45  ;;  %v830_v45 = vmul.f32 %v3516_v22, %v3459_v39 }
  0xe9   : > { %608 = vrot.lane.b32.xlu0 %v601_v46, %s3264_s26  ;;  %v890_v46 = vmul.f32 %v3557_v52, %v3459_v39 }
  0xea   : > { %1613 = vperm.xlu1 %3082, %v3409_v0  }
  0xeb   : > { %v3551_v49 = vpop.permute.xlu1 %1096 }
  0xed   : > { %606 = vrot.lane.b32.xlu0 %v600_v50, %s3264_s26  ;;  %s3276_s26 = smov 79  }
  0xee   : > { %660 = vrot.lane.b32.xlu1 %v652_v51, %s3268_s29 }
  0xef   : > { %3083 = vset.pattern.permute.xlu1 %v3269_v53  ;;  %v829_v53 = vmul.f32 %v3516_v22, %v3463_v44 }
  0xf0   : > { %v3560_v55 = vpop.permute.xlu1 %1126 }
  0xf1   : > { %633 = vrot.lane.b32.xlu0 %v626_v54, %s3266_s28  ;;  %v889_v54 = vmul.f32 %v3557_v52, %v3463_v44 }
  0xf2   : > { %1638 = vperm.xlu1 %3083, %v3409_v0  }
  0xf5   : > { %v3568_v59 = vpop.permute.xlu1 %337  ;;  %631 = vrot.lane.b32.xlu0 %v625_v56, %s3266_s28  ;;  %s3277_s28 = smov 78  }
  0xf6   : > { %691 = vrot.lane.b32.xlu1 %v681_v58, %s3270_s14 }
  0xf7   : > { %3084 = vset.pattern.permute.xlu1 %v3271_v60  ;;  %v861_v60 = vmul.f32 %v3519_v25, %v3468_v48 }
  0xf9   : > { %658 = vrot.lane.b32.xlu0 %v651_v61, %s3268_s29  ;;  %v3685_v61 = vld [vmem:[%s3455_s27 + $0x18] sm:$0xff] }
  0xfa   : > { %v3575_v63 = vpop.permute.xlu1 %1186  ;;  %1663 = vperm.xlu1 %3084, %v3409_v0   ;;  %v740_v0 = vmul.f32 %v3505_v13, %v3459_v39 }
  0xfd   : > { %656 = vrot.lane.b32.xlu0 %v650_v1, %s3268_s29  ;;  %s3278_s29 = smov 62   ;;  %v920_v1 = vmul.f32 %v3525_v29, %v3459_v39 }
  0xfe   : > { %721 = vrot.lane.b32.xlu1 %v711_v2, %s3272_s22 }
  0xff   : > { %v3583_v3 = vpop.permute.xlu1 %1246  ;;  %3085 = vset.pattern.permute.xlu1 %v3234_v26  ;;  %v710_v26 = vmul.f32 %v3538_v40, %v3459_v39 }
 0x101   : > { %689 = vrot.lane.b32.xlu0 %v680_v4, %s3270_s14 }
 0x102   : > { %749 = vrot.lane.b32.xlu1 %v740_v0, %s3273_s23  ;;  %v682_v0 = vmul.f32 %v3500_v10, %v3685_v61 }
 0x104   : > { %v3596_v7 = vpop.permute.xlu1 %1276 }
 0x105   : > { %4875 = vst [vmem:[#allocation5_spill] sm:$0xff] %v3596_v7  ;;  %687 = vrot.lane.b32.xlu0 %v679_v6, %s3270_s14  ;;  %v919_v6 = vmul.f32 %v3525_v29, %v3463_v44 }
 0x106   : > { %747 = vrot.lane.b32.xlu1 %v739_v8, %s3273_s23 }
 0x109   : > { %v3608_v12 = vpop.permute.xlu1 %1306  ;;  %719 = vrot.lane.b32.xlu0 %v710_v26, %s3272_s22 }
 0x10a   : > { %4876 = vst [vmem:[#allocation6_spill] sm:$0xff] %v3608_v12  ;;  %781 = vrot.lane.b32.xlu1 %v771_v11, %s3274_s24  ;;  %v891_v11 = vmul.f32 %v3557_v52, %v3468_v48 }
 0x10b   : > { %v3612_v14 = vpop.permute.xlu0 %358 }
 0x10d   : > { %717 = vrot.lane.b32.xlu0 %v709_v15, %s3272_s22  ;;  %v950_v15 = vmul.f32 %v3530_v33, %v3459_v39 }
 0x10e   : > { %v3619_v17 = vpop.permute.xlu1 %1336  ;;  %809 = vrot.lane.b32.xlu1 %v800_v16, %s3275_s25 }
 0x10f   : > { %v3622_v18 = vpop.permute.xlu0 %356 }
 0x111   : > { %751 = vrot.lane.b32.xlu0 %v741_v20, %s3273_s23  ;;  %v712_v20 = vmul.f32 %v3538_v40, %v3685_v61 }
 0x112   : > { %807 = vrot.lane.b32.xlu1 %v799_v21, %s3275_s25  ;;  %v949_v21 = vmul.f32 %v3530_v33, %v3463_v44 }
 0x113   : > { %v3630_v23 = vpop.permute.xlu1 %1366  ;;  %v3632_v24 = vpop.permute.xlu0 %383 }
 0x115   : > { %779 = vrot.lane.b32.xlu0 %v770_v27, %s3274_s24 }
 0x116   : > { %841 = vrot.lane.b32.xlu1 %v831_v28, %s3276_s26 }
 0x117   : > { %v3640_v30 = vpop.permute.xlu0 %381 }
 0x118   : > { %v3644_v32 = vpop.permute.xlu1 %1396 }
 0x119   : > { %777 = vrot.lane.b32.xlu0 %v769_v31, %s3274_s24  ;;  %v921_v31 = vmul.f32 %v3525_v29, %v3468_v48 }
 0x11a   : > { %869 = vrot.lane.b32.xlu1 %v860_v34, %s3277_s28  ;;  %v980_v34 = vmul.f32 %v3564_v57, %v3459_v39 }
 0x11b   : > { %v3650_v35 = vpop.permute.xlu0 %408 }
 0x11d   : > { %v3656_v41 = vpop.permute.xlu1 %1426  ;;  %811 = vrot.lane.b32.xlu0 %v801_v36, %s3275_s25 }
 0x11e   : > { %867 = vrot.lane.b32.xlu1 %v859_v37, %s3277_s28  ;;  %v742_v37 = vmul.f32 %v3505_v13, %v3685_v61 }
 0x11f   : > { %v3660_v42 = vpop.permute.xlu0 %406 }
 0x121   : > { %v3666_v50 = vpop.permute.xlu1 %360  ;;  %839 = vrot.lane.b32.xlu0 %v830_v45, %s3276_s26  ;;  %v979_v45 = vmul.f32 %v3564_v57, %v3463_v44 }
 0x122   : > { %899 = vrot.lane.b32.xlu1 %v890_v46, %s3278_s29 }
 0x123   : > { %v3670_v51 = vpop.permute.xlu0 %433 }
 0x125   : > { %v3676_v56 = vpop.permute.xlu1 %385  ;;  %837 = vrot.lane.b32.xlu0 %v829_v53, %s3276_s26 }
 0x126   : > { %897 = vrot.lane.b32.xlu1 %v889_v54, %s3278_s29  ;;  %v951_v54 = vmul.f32 %v3530_v33, %v3468_v48 }
 0x127   : > { %v3680_v58 = vpop.permute.xlu0 %431 }
 0x129   : > { %v3689_v2 = vpop.permute.xlu1 %410  ;;  %871 = vrot.lane.b32.xlu0 %v861_v60, %s3277_s28  ;;  %v1010_v60 = vmul.f32 %v3536_v38, %v3459_v39 }
 0x12a   : > { %929 = vrot.lane.b32.xlu1 %v920_v1, %s3279_s21 }
 0x12b   : > { %v3693_v4 = vpop.permute.xlu0 %458 }
 0x12d   : > { %v3699_v8 = vpop.permute.xlu1 %435  ;;  %693 = vrot.lane.b32.xlu0 %v682_v0, %s3270_s14  ;;  %s4860_s14 = smov 59   ;;  %v772_v0 = vmul.f32 %v3511_v19, %v3685_v61 }
 0x12e   : > { %927 = vrot.lane.b32.xlu1 %v919_v6, %s3279_s21  ;;  %v1009_v6 = vmul.f32 %v3536_v38, %v3463_v44 }
 0x12f   : > { %v3703_v26 = vpop.permute.xlu0 %456 }
 0x131   : > { %v3709_v16 = vpop.permute.xlu1 %460  ;;  %901 = vrot.lane.b32.xlu0 %v891_v11, %s3278_s29 }
 0x132   : > { %959 = vrot.lane.b32.xlu1 %v950_v15, %s3280_s17 }
 0x133   : > { %v3713_v10 = vpop.permute.xlu0 %483 }
 0x135   : > { %v3719_v27 = vpop.permute.xlu1 %485  ;;  %723 = vrot.lane.b32.xlu0 %v712_v20, %s3272_s22  ;;  %s3282_s22 = smov 58   ;;  %v981_v20 = vmul.f32 %v3564_v57, %v3468_v48 }
 0x136   : > { %957 = vrot.lane.b32.xlu1 %v949_v21, %s3280_s17  ;;  %v1040_v21 = vmul.f32 %v3544_v43, %v3459_v39 }
 0x137   : > { %v3723_v28 = vpop.permute.xlu0 %481 }
 0x139   : > { %v3729_v36 = vpop.permute.xlu1 %1456  ;;  %931 = vrot.lane.b32.xlu0 %v921_v31, %s3279_s21 }
 0x13a   : > { %989 = vrot.lane.b32.xlu1 %v980_v34, %s4860_s14  ;;  %v802_v34 = vmul.f32 %v3548_v47, %v3685_v61 }
 0x13b   : > { %v3733_v40 = vpop.permute.xlu0 %508 }
 0x13d   : > { %v3739_v46 = vpop.permute.xlu1 %510  ;;  %753 = vrot.lane.b32.xlu0 %v742_v37, %s3273_s23  ;;  %s3283_s23 = smov 57   ;;  %v1039_v37 = vmul.f32 %v3544_v43, %v3463_v44 }
 0x13e   : > { %987 = vrot.lane.b32.xlu1 %v979_v45, %s4860_s14 }
 0x13f   : > { %v3743_v53 = vpop.permute.xlu0 %506 }
 0x141   : > { %v3749_v1 = vpop.permute.xlu1 %1486  ;;  %961 = vrot.lane.b32.xlu0 %v951_v54, %s3280_s17 }
 0x142   : > { %4877 = vst [vmem:[#allocation7_spill] sm:$0xff] %v3749_v1  ;;  %1019 = vrot.lane.b32.xlu1 %v1010_v60, %s3282_s22  ;;  %v1011_v60 = vmul.f32 %v3536_v38, %v3468_v48 }
 0x143   : > { %v3753_v13 = vpop.permute.xlu0 %533 }
 0x145   : > { %v3759_v11 = vpop.permute.xlu1 %535  ;;  %783 = vrot.lane.b32.xlu0 %v772_v0, %s3274_s24  ;;  %v1070_v0 = vmul.f32 %v3573_v62, %v3459_v39  ;;  %s3284_s24 = smov 56  }
 0x146   : > { %1017 = vrot.lane.b32.xlu1 %v1009_v6, %s3282_s22 }
 0x147   : > { %v3763_v15 = vpop.permute.xlu0 %531 }
 0x149   : > { %v3769_v31 = vpop.permute.xlu1 %1516  ;;  %991 = vrot.lane.b32.xlu0 %v981_v20, %s4860_s14  ;;  %v832_v20 = vmul.f32 %v3516_v22, %v3685_v61 }
 0x14a   : > { %4878 = vst [vmem:[#allocation8_spill] sm:$0xff] %v3769_v31  ;;  %1049 = vrot.lane.b32.xlu1 %v1040_v21, %s3283_s23  ;;  %v1069_v21 = vmul.f32 %v3573_v62, %v3463_v44 }
 0x14b   : > { %v3773_v19 = vpop.permute.xlu0 %558 }
 0x14d   : > { %v3779_v45 = vpop.permute.xlu1 %560  ;;  %813 = vrot.lane.b32.xlu0 %v802_v34, %s3275_s25  ;;  %s3285_s25 = smov 40  }
 0x14e   : > { %1047 = vrot.lane.b32.xlu1 %v1039_v37, %s3283_s23 }
 0x14f   : > { %v3783_v54 = vpop.permute.xlu0 %556 }
 0x151   : > { %v3789_v6 = vpop.permute.xlu1 %1540  ;;  %1021 = vrot.lane.b32.xlu0 %v1011_v60, %s3282_s22  ;;  %v1041_v60 = vmul.f32 %v3544_v43, %v3468_v48 }
 0x152   : > { %4879 = vst [vmem:[#allocation9_spill] sm:$0xff] %v3789_v6  ;;  %1079 = vrot.lane.b32.xlu1 %v1070_v0, %s3284_s24  ;;  %v1100_v0 = vmul.f32 %v3551_v49, %v3459_v39 }
 0x153   : > { %v3793_v47 = vpop.permute.xlu0 %583 }
 0x155   : > { %v3799_v34 = vpop.permute.xlu1 %585  ;;  %843 = vrot.lane.b32.xlu0 %v832_v20, %s3276_s26  ;;  %v862_v20 = vmul.f32 %v3519_v25, %v3685_v61  ;;  %s3286_s26 = smov 39  }
 0x156   : > { %1077 = vrot.lane.b32.xlu1 %v1069_v21, %s3284_s24  ;;  %v1099_v21 = vmul.f32 %v3551_v49, %v3463_v44 }
 0x157   : > { %v3803_v37 = vpop.permute.xlu0 %581 }
 0x159   : > { %v3809_v6 = vpop.permute.xlu1 %1564  ;;  %1051 = vrot.lane.b32.xlu0 %v1041_v60, %s3283_s23  ;;  %v1071_v60 = vmul.f32 %v3573_v62, %v3468_v48 }
 0x15a   : > { %4880 = vst [vmem:[#allocation10_spill] sm:$0xff] %v3809_v6  ;;  %1109 = vrot.lane.b32.xlu1 %v1100_v0, %s3285_s25  ;;  %v1130_v0 = vmul.f32 %v3560_v55, %v3459_v39 }
 0x15b   : > { %v3813_v22 = vpop.permute.xlu0 %608 }
 0x15d   : > { %v3819_v31 = vpop.permute.xlu1 %610  ;;  %873 = vrot.lane.b32.xlu0 %v862_v20, %s3277_s28  ;;  %v892_v20 = vmul.f32 %v3557_v52, %v3685_v61  ;;  %s3287_s28 = smov 38  }
 0x15e   : > { %1107 = vrot.lane.b32.xlu1 %v1099_v21, %s3285_s25  ;;  %v1129_v21 = vmul.f32 %v3560_v55, %v3463_v44 }
 0x15f   : > { %v3823_v6 = vpop.permute.xlu0 %606 }
 0x160   : > { %4881 = vst [vmem:[#allocation11_spill] sm:$0xff] %v3823_v6 }
 0x161   : > { %v3829_v1 = vpop.permute.xlu1 %1588  ;;  %1081 = vrot.lane.b32.xlu0 %v1071_v60, %s3284_s24  ;;  %v1101_v60 = vmul.f32 %v3551_v49, %v3468_v48 }
 0x162   : > { %4882 = vst [vmem:[#allocation12_spill] sm:$0xff] %v3829_v1  ;;  %1139 = vrot.lane.b32.xlu1 %v1130_v0, %s3286_s26  ;;  %v1160_v0 = vmul.f32 %v3587_v5, %v3459_v39 }
 0x163   : > { %v3833_v25 = vpop.permute.xlu0 %633 }
 0x164   : > { %4883 = vst [vmem:[#allocation13_spill] sm:$0xff] %v3833_v25 }
 0x165   : > { %v3839_v6 = vpop.permute.xlu1 %635  ;;  %903 = vrot.lane.b32.xlu0 %v892_v20, %s3278_s29  ;;  %v922_v20 = vmul.f32 %v3525_v29, %v3685_v61  ;;  %s3288_s29 = smov 37  }
 0x166   : > { %1137 = vrot.lane.b32.xlu1 %v1129_v21, %s3286_s26  ;;  %v1159_v21 = vmul.f32 %v3587_v5, %v3463_v44 }
 0x167   : > { %v3843_v1 = vpop.permute.xlu0 %631 }
 0x168   : > { %4884 = vst [vmem:[#allocation14_spill] sm:$0xff] %v3843_v1 }
 0x169   : > { %v3849_v25 = vpop.permute.xlu1 %1613  ;;  %1111 = vrot.lane.b32.xlu0 %v1101_v60, %s3285_s25  ;;  %v1131_v60 = vmul.f32 %v3560_v55, %v3468_v48 }
 0x16a   : > { %4885 = vst [vmem:[#allocation15_spill] sm:$0xff] %v3849_v25  ;;  %1169 = vrot.lane.b32.xlu1 %v1160_v0, %s3287_s28  ;;  %v1190_v0 = vmul.f32 %v3575_v63, %v3459_v39 }
 0x16b   : > { %v3853_v52 = vpop.permute.xlu0 %658 }
 0x16c   : > { %4886 = vst [vmem:[#allocation16_spill] sm:$0xff] %v3853_v52 }
 0x16d   : > { %v3859_v1 = vpop.permute.xlu1 %660  ;;  %933 = vrot.lane.b32.xlu0 %v922_v20, %s3279_s21  ;;  %v952_v20 = vmul.f32 %v3530_v33, %v3685_v61  ;;  %s3289_s21 = smov 36  }
 0x16e   : > { %1167 = vrot.lane.b32.xlu1 %v1159_v21, %s3287_s28  ;;  %v1189_v21 = vmul.f32 %v3575_v63, %v3463_v44 }
 0x16f   : > { %v3863_v25 = vpop.permute.xlu0 %656 }
 0x170   : > { %4887 = vst [vmem:[#allocation17_spill] sm:$0xff] %v3863_v25 }
 0x171   : > { %v3869_v52 = vpop.permute.xlu1 %1638  ;;  %1141 = vrot.lane.b32.xlu0 %v1131_v60, %s3286_s26  ;;  %v1161_v60 = vmul.f32 %v3587_v5, %v3468_v48 }
 0x172   : > { %4888 = vst [vmem:[#allocation18_spill] sm:$0xff] %v3869_v52  ;;  %1199 = vrot.lane.b32.xlu1 %v1190_v0, %s3288_s29  ;;  %v1220_v0 = vmul.f32 %v3601_v9, %v3459_v39 }
 0x173   : > { %v3873_v29 = vpop.permute.xlu0 %689 }
 0x174   : > { %4889 = vst [vmem:[#allocation19_spill] sm:$0xff] %v3873_v29 }
 0x175   : > { %v3879_v25 = vpop.permute.xlu1 %691  ;;  %963 = vrot.lane.b32.xlu0 %v952_v20, %s3280_s17  ;;  %v982_v20 = vmul.f32 %v3564_v57, %v3685_v61  ;;  %s3290_s17 = smov 35  }
 0x176   : > { %1197 = vrot.lane.b32.xlu1 %v1189_v21, %s3288_s29  ;;  %v1219_v21 = vmul.f32 %v3601_v9, %v3463_v44 }
 0x177   : > { %v3883_v52 = vpop.permute.xlu0 %687 }
 0x178   : > { %4890 = vst [vmem:[#allocation20_spill] sm:$0xff] %v3883_v52 }
 0x179   : > { %v3889_v29 = vpop.permute.xlu1 %1663  ;;  %1171 = vrot.lane.b32.xlu0 %v1161_v60, %s3287_s28  ;;  %v1191_v60 = vmul.f32 %v3575_v63, %v3468_v48 }
 0x17a   : > { %4891 = vst [vmem:[#allocation21_spill] sm:$0xff] %v3889_v29  ;;  %1229 = vrot.lane.b32.xlu1 %v1220_v0, %s3289_s21  ;;  %v1250_v0 = vmul.f32 %v3583_v3, %v3459_v39 }
 0x17b   : > { %v3893_v33 = vpop.permute.xlu0 %719 }
 0x17c   : > { %4892 = vst [vmem:[#allocation22_spill] sm:$0xff] %v3893_v33 }
 0x17d   : > { %v3899_v52 = vpop.permute.xlu1 %721  ;;  %993 = vrot.lane.b32.xlu0 %v982_v20, %s4860_s14  ;;  %v1012_v20 = vmul.f32 %v3536_v38, %v3685_v61  ;;  %s3291_s14 = smov 34  }
 0x17e   : > { %1227 = vrot.lane.b32.xlu1 %v1219_v21, %s3289_s21  ;;  %v1249_v21 = vmul.f32 %v3583_v3, %v3463_v44 }
 0x17f   : > { %v3903_v29 = vpop.permute.xlu0 %717 }
 0x180   : > { %4893 = vst [vmem:[#allocation23_spill] sm:$0xff] %v3903_v29 }
 0x181   : > { %v3909_v33 = vpop.permute.xlu1 %749  ;;  %1201 = vrot.lane.b32.xlu0 %v1191_v60, %s3288_s29  ;;  %v1221_v60 = vmul.f32 %v3601_v9, %v3468_v48 }
 0x182   : > { %4894 = vst [vmem:[#allocation24_spill] sm:$0xff] %v3909_v33  ;;  %1259 = vrot.lane.b32.xlu1 %v1250_v0, %s3290_s17  ;;  %v1280_v0 = vmul.f32 %v3596_v7, %v3459_v39 }
 0x183   : > { %v3913_v57 = vpop.permute.xlu0 %751 }
 0x184   : > { %4895 = vst [vmem:[#allocation25_spill] sm:$0xff] %v3913_v57 }
 0x185   : > { %v3919_v29 = vpop.permute.xlu1 %747  ;;  %1023 = vrot.lane.b32.xlu0 %v1012_v20, %s3282_s22  ;;  %v1042_v20 = vmul.f32 %v3544_v43, %v3685_v61  ;;  %s3292_s22 = smov 18  }
 0x186   : > { %1257 = vrot.lane.b32.xlu1 %v1249_v21, %s3290_s17  ;;  %v1279_v21 = vmul.f32 %v3596_v7, %v3463_v44 }
 0x187   : > { %v3923_v33 = vpop.permute.xlu0 %779 }
 0x188   : > { %4896 = vst [vmem:[#allocation26_spill] sm:$0xff] %v3923_v33 }
 0x189   : > { %v3929_v57 = vpop.permute.xlu1 %781  ;;  %1231 = vrot.lane.b32.xlu0 %v1221_v60, %s3289_s21  ;;  %v1251_v60 = vmul.f32 %v3583_v3, %v3468_v48 }
 0x18a   : > { %4897 = vst [vmem:[#allocation27_spill] sm:$0xff] %v3929_v57  ;;  %1289 = vrot.lane.b32.xlu1 %v1280_v0, %s3291_s14  ;;  %v1310_v0 = vmul.f32 %v3608_v12, %v3459_v39 }
 0x18b   : > { %v3933_v38 = vpop.permute.xlu0 %777 }
 0x18c   : > { %4898 = vst [vmem:[#allocation28_spill] sm:$0xff] %v3933_v38 }
 0x18d   : > { %v3939_v33 = vpop.permute.xlu1 %809  ;;  %1053 = vrot.lane.b32.xlu0 %v1042_v20, %s3283_s23  ;;  %v1072_v20 = vmul.f32 %v3573_v62, %v3685_v61  ;;  %s3293_s23 = smov 17  }
 0x18e   : > { %4899 = vst [vmem:[#allocation29_spill] sm:$0xff] %v3939_v33  ;;  %1287 = vrot.lane.b32.xlu1 %v1279_v21, %s3291_s14  ;;  %v1309_v21 = vmul.f32 %v3608_v12, %v3463_v44 }
 0x18f   : > { %v3943_v57 = vpop.permute.xlu0 %811 }
 0x191   : > { %v3949_v38 = vpop.permute.xlu1 %807  ;;  %1261 = vrot.lane.b32.xlu0 %v1251_v60, %s3290_s17  ;;  %v1281_v60 = vmul.f32 %v3596_v7, %v3468_v48 }
 0x192   : > { %4900 = vst [vmem:[#allocation30_spill] sm:$0xff] %v3949_v38  ;;  %1319 = vrot.lane.b32.xlu1 %v1310_v0, %s3292_s22  ;;  %v1340_v0 = vmul.f32 %v3619_v17, %v3459_v39 }
 0x193   : > { %v3953_v43 = vpop.permute.xlu0 %839 }
 0x194   : > { %4901 = vst [vmem:[#allocation31_spill] sm:$0xff] %v3953_v43 }
 0x195   : > { %v3959_v33 = vpop.permute.xlu1 %841  ;;  %1083 = vrot.lane.b32.xlu0 %v1072_v20, %s3284_s24  ;;  %v1102_v20 = vmul.f32 %v3551_v49, %v3685_v61  ;;  %s3294_s24 = smov 16  }
 0x196   : > { %4902 = vst [vmem:[#allocation32_spill] sm:$0xff] %v3959_v33  ;;  %1317 = vrot.lane.b32.xlu1 %v1309_v21, %s3292_s22  ;;  %v1339_v21 = vmul.f32 %v3619_v17, %v3463_v44 }
 0x197   : > { %v3963_v38 = vpop.permute.xlu0 %837 }
 0x198   : > { %4903 = vst [vmem:[#allocation33_spill] sm:$0xff] %v3963_v38 }
 0x199   : > { %v3969_v43 = vpop.permute.xlu1 %869  ;;  %1291 = vrot.lane.b32.xlu0 %v1281_v60, %s3291_s14  ;;  %v1311_v60 = vmul.f32 %v3608_v12, %v3468_v48  ;;  %v1369_v12 = vmul.f32 %v3630_v23, %v3463_v44 }
 0x19a   : > { %4904 = vst [vmem:[#allocation34_spill] sm:$0xff] %v3969_v43  ;;  %1349 = vrot.lane.b32.xlu1 %v1340_v0, %s3293_s23  ;;  %v1370_v0 = vmul.f32 %v3630_v23, %v3459_v39 }
 0x19b   : > { %v3973_v62 = vpop.permute.xlu0 %871 }
 0x19c   : > { %4905 = vst [vmem:[#allocation35_spill] sm:$0xff] %v3973_v62 }
 0x19d   : > { %v3979_v38 = vpop.permute.xlu1 %867  ;;  %1113 = vrot.lane.b32.xlu0 %v1102_v20, %s3285_s25  ;;  %v1132_v20 = vmul.f32 %v3560_v55, %v3685_v61  ;;  %v389_v55 = vsel %vm387_vm1, %v3632_v24, %v3676_v56  ;;  %s3295_s25 = smov 15  }
 0x19e   : > { %4906 = vst [vmem:[#allocation36_spill] sm:$0xff] %v3979_v38  ;;  %1347 = vrot.lane.b32.xlu1 %v1339_v21, %s3293_s23  ;;  %v364_v21 = vsel %vm362_vm0, %v3612_v14, %v3666_v50 }
 0x19f   : > { %v3983_v7 = vpop.permute.xlu0 %693 }
 0x1a0   : > { %4907 = vst [vmem:[#allocation37_spill] sm:$0xff] %v3983_v7  ;;  %v341_v7 = vmul.f32 %v3568_v59, %v3459_v39 }
 0x1a1   : > { %v3989_v43 = vpop.permute.xlu1 %899  ;;  %1321 = vrot.lane.b32.xlu0 %v1311_v60, %s3292_s22 }
 0x1a2   : > { %4908 = vst [vmem:[#allocation38_spill] sm:$0xff] %v3989_v43  ;;  %1379 = vrot.lane.b32.xlu1 %v1370_v0, %s3294_s24  ;;  %v363_v0 = vsel %vm362_vm0, %v3622_v18, %v3612_v14  ;;  %v340_v43 = vmul.f32 %v3463_v44, %v3568_v59  ;;  %v414_v14 = vsel %vm412_vm2, %v3650_v35, %v3689_v2  ;;  %vm785_vm0 = vcmask 662528  }
 0x1a3   : > { %v3993_v49 = vpop.permute.xlu0 %901  ;;  %v1400_v18 = vmul.f32 %v3644_v32, %v3459_v39 }
 0x1a4   : > { %4909 = vst [vmem:[#allocation39_spill] sm:$0xff] %v3993_v49  ;;  %v369_v49 = vadd.f32 %v364_v21, %v341_v7  ;;  %v413_v7 = vsel %vm412_vm2, %v3660_v42, %v3650_v35  ;;  %v438_v35 = vsel %vm437_vm3, %v3680_v58, %v3670_v51  ;;  %v464_v42 = vsel %vm462_vm4, %v3693_v4, %v3709_v16 }
 0x1a5   : > { %v4003_v60 = vpop.permute.xlu1 %897  ;;  %1143 = vrot.lane.b32.xlu0 %v1132_v20, %s3286_s26  ;;  %v388_v20 = vsel %vm387_vm1, %v3640_v30, %v3632_v24  ;;  %v439_v24 = vsel %vm437_vm3, %v3670_v51, %v3699_v8  ;;  %v489_v51 = vsel %vm487_vm5, %v3713_v10, %v3719_v27  ;;  %s3296_s26 = smov 14   ;;  %vm815_vm1 = vcmask 654336  }
 0x1a6   : > { %4910 = vst [vmem:[#allocation40_spill] sm:$0xff] %v4003_v60  ;;  %1377 = vrot.lane.b32.xlu1 %v1369_v12, %s3294_s24  ;;  %v1341_v60 = vmul.f32 %v3619_v17, %v3468_v48  ;;  %v368_v12 = vadd.f32 %v363_v0, %v340_v43  ;;  %v394_v62 = vadd.f32 %v389_v55, %v369_v49  ;;  %vm845_vm2 = vcmask 646144  }
 0x1a7   : > { %v4013_v38 = vpop.permute.xlu0 %723  ;;  %v1162_v49 = vmul.f32 %v3587_v5, %v3685_v61  ;;  %v463_v5 = vsel %vm462_vm4, %v3703_v26, %v3693_v4  ;;  %v514_v4 = vsel %vm512_vm6, %v3733_v40, %v3739_v46  ;;  %v1430_v26 = vmul.f32 %v3656_v41, %v3459_v39 }
 0x1a8   : > { %v393_v30 = vadd.f32 %v388_v20, %v368_v12  ;;  %v419_v21 = vadd.f32 %v414_v14, %v394_v62  ;;  %v488_v12 = vsel %vm487_vm5, %v3723_v28, %v3713_v10  ;;  %v539_v10 = vsel %vm537_vm7, %v3753_v13, %v3759_v11 }
 0x1a9   : > { %v4023_v33 = vpop.permute.xlu1 %929  ;;  %1351 = vrot.lane.b32.xlu0 %v1341_v60, %s3293_s23  ;;  %v1399_v60 = vmul.f32 %v3644_v32, %v3463_v44 }
 0x1aa   : > { %1409 = vrot.lane.b32.xlu1 %v1400_v18, %s3295_s25  ;;  %v418_v0 = vadd.f32 %v413_v7, %v393_v30  ;;  %v444_v55 = vadd.f32 %v439_v24, %v419_v21  ;;  %v1371_v18 = vmul.f32 %v3630_v23, %v3468_v48  ;;  %v513_v21 = vsel %vm512_vm6, %v3743_v53, %v3733_v40 }
 0x1ab   : > { %v4032_v43 = vpop.permute.xlu0 %931  ;;  %v564_v40 = vsel %vm562_vm8, %v3773_v19, %v3779_v45  ;;  %v1429_v53 = vmul.f32 %v3656_v41, %v3463_v44  ;;  %vm875_vm6 = vcmask 637952  }
 0x1ac   : > { %v443_v58 = vadd.f32 %v438_v35, %v418_v0  ;;  %v469_v20 = vadd.f32 %v464_v42, %v444_v55  ;;  %v1192_v35 = vmul.f32 %v3575_v63, %v3685_v61  ;;  %v538_v42 = vsel %vm537_vm7, %v3763_v15, %v3753_v13 }
 0x1ad   : > { %v4044_v62 = vpop.permute.xlu1 %927  ;;  %1173 = vrot.lane.b32.xlu0 %v1162_v49, %s3287_s28  ;;  %v563_v63 = vsel %vm562_vm8, %v3783_v54, %v3773_v19  ;;  %v589_v13 = vsel %vm587_vm9, %v3793_v47, %v3799_v34  ;;  %v588_v19 = vsel %vm587_vm9, %v3803_v37, %v3793_v47  ;;  %v614_v54 = vsel %vm612_vm10, %v3813_v22, %v3819_v31  ;;  %v4911_v47 = vld [vmem:[#allocation11_spill] sm:$0xff]  ;;  %s3297_s28 = smov 13  }
 0x1ae   : > { %1407 = vrot.lane.b32.xlu1 %v1399_v60, %s3295_s25  ;;  %v468_v7 = vadd.f32 %v463_v5, %v443_v58  ;;  %v494_v24 = vadd.f32 %v489_v51, %v469_v20  ;;  %v342_v60 = vmul.f32 %v3468_v48, %v3568_v59  ;;  %v1401_v58 = vmul.f32 %v3644_v32, %v3468_v48  ;;  %v4112_v20 = vld [vmem:[%s3455_s27 + $0x8] sm:$0xff] }
 0x1af   : > { %v4054_v14 = vpop.permute.xlu0 %753  ;;  %v613_v37 = vsel %vm612_vm10, %v4911_v47, %v3813_v22  ;;  %v4919_v47 = vld [vmem:[#allocation7_spill] sm:$0xff]  ;;  %vm905_vm7 = vcmask 506880   ;;  %vm935_vm8 = vcmask 498688   ;;  %vm965_vm9 = vcmask 490496  }
 0x1b0   : > { %v493_v28 = vadd.f32 %v488_v12, %v468_v7  ;;  %v519_v39 = vadd.f32 %v514_v4, %v494_v24  ;;  %v370_v44 = vadd.f32 %v3666_v50, %v342_v60  ;;  %v1460_v50 = vmul.f32 %v4112_v20, %v3729_v36 }
 0x1b1   : > { %v4066_v30 = vpop.permute.xlu1 %959  ;;  %1381 = vrot.lane.b32.xlu0 %v1371_v18, %s3294_s24  ;;  %vm995_vm10 = vcmask 482304  }
 0x1b2   : > { %1439 = vrot.lane.b32.xlu1 %v1430_v26, %s3296_s26  ;;  %v518_v0 = vadd.f32 %v513_v21, %v493_v28  ;;  %v544_v55 = vadd.f32 %v539_v10, %v519_v39  ;;  %v395_v18 = vadd.f32 %v3676_v56, %v370_v44  ;;  %v4912_v26 = vld [vmem:[#allocation13_spill] sm:$0xff]  ;;  %v1222_v56 = vmul.f32 %v3601_v9, %v3685_v61  ;;  %v4913_v39 = vld [vmem:[#allocation14_spill] sm:$0xff] }
 0x1b3   : > { %v4076_v49 = vpop.permute.xlu0 %961  ;;  %v639_v7 = vsel %vm637_vm11, %v4912_v26, %v3839_v6  ;;  %v638_v22 = vsel %vm637_vm11, %v4913_v39, %v4912_v26  ;;  %v4922_v39 = vld [vmem:[#allocation24_spill] sm:$0xff]  ;;  %vm1025_vm11 = vcmask 474112  }
 0x1b4   : > { %v543_v59 = vadd.f32 %v538_v42, %v518_v0  ;;  %v569_v15 = vadd.f32 %v564_v40, %v544_v55  ;;  %v420_v24 = vadd.f32 %v3689_v2, %v395_v18  ;;  %v4139_v40 = vld [vmem:[%s3455_s27] sm:$0xff]  ;;  %v4915_v55 = vld [vmem:[#allocation17_spill] sm:$0xff] }
 0x1b5   : > { %v4090_v5 = vpop.permute.xlu1 %957  ;;  %1203 = vrot.lane.b32.xlu0 %v1192_v35, %s3288_s29  ;;  %v4914_v35 = vld [vmem:[#allocation16_spill] sm:$0xff]  ;;  %v1459_v9 = vmul.f32 %v4139_v40, %v3729_v36  ;;  %s3298_s29 = smov 12  }
 0x1b6   : > { %1437 = vrot.lane.b32.xlu1 %v1429_v53, %s3296_s26  ;;  %v568_v12 = vadd.f32 %v563_v63, %v543_v59  ;;  %v594_v4 = vadd.f32 %v589_v13, %v569_v15  ;;  %v664_v42 = vsel %vm662_vm12, %v4914_v35, %v3859_v1  ;;  %v445_v2 = vadd.f32 %v3699_v8, %v420_v24  ;;  %v4916_v13 = vld [vmem:[#allocation19_spill] sm:$0xff] }
 0x1b7   : > { %v4101_v51 = vpop.permute.xlu0 %783  ;;  %v663_v63 = vsel %vm662_vm12, %v4915_v55, %v4914_v35  ;;  %v697_v44 = vsel %vm695_vm13, %v4916_v13, %v3879_v25  ;;  %v4920_v24 = vld [vmem:[#allocation23_spill] sm:$0xff]  ;;  %v4924_v55 = vld [vmem:[#allocation26_spill] sm:$0xff]  ;;  %vm1055_vm12 = vcmask 465920  }
 0x1b8   : > { %v593_v21 = vadd.f32 %v588_v19, %v568_v12  ;;  %v619_v10 = vadd.f32 %v614_v54, %v594_v4  ;;  %v470_v8 = vadd.f32 %v3709_v16, %v445_v2  ;;  %v4158_v19 = vld [vmem:[%s3455_s27 + $0x10] sm:$0xff]  ;;  %v4918_v12 = vld [vmem:[#allocation22_spill] sm:$0xff]  ;;  %v1490_v16 = vmul.f32 %v4112_v20, %v4919_v47 }
 0x1b9   : > { %v4117_v48 = vpop.permute.xlu1 %989  ;;  %1411 = vrot.lane.b32.xlu0 %v1401_v58, %s3295_s25  ;;  %v1431_v54 = vmul.f32 %v4158_v19, %v3656_v41  ;;  %v727_v4 = vsel %vm725_vm14, %v4918_v12, %v3899_v52 }
 0x1ba   : > { %1469 = vrot.lane.b32.xlu1 %v1460_v50, %s3297_s28  ;;  %v618_v53 = vadd.f32 %v613_v37, %v593_v21  ;;  %v644_v60 = vadd.f32 %v639_v7, %v619_v10  ;;  %v4917_v50 = vld [vmem:[#allocation20_spill] sm:$0xff]  ;;  %v495_v37 = vadd.f32 %v3719_v27, %v470_v8  ;;  %v726_v21 = vsel %vm725_vm14, %v4920_v24, %v4918_v12  ;;  %v4921_v10 = vld [vmem:[#allocation25_spill] sm:$0xff] }
 0x1bb   : > { %v4130_v28 = vpop.permute.xlu0 %991  ;;  %v696_v18 = vsel %vm695_vm13, %v4917_v50, %v4916_v13  ;;  %v1252_v27 = vmul.f32 %v3583_v3, %v3685_v61  ;;  %v1489_v13 = vmul.f32 %v4139_v40, %v4919_v47  ;;  %v4929_v24 = vld [vmem:[#allocation32_spill] sm:$0xff] }
 0x1bc   : > { %v643_v59 = vadd.f32 %v638_v22, %v618_v53  ;;  %v669_v15 = vadd.f32 %v664_v42, %v644_v60  ;;  %v757_v22 = vsel %vm755_vm15, %v4922_v39, %v4921_v10  ;;  %v520_v35 = vadd.f32 %v3739_v46, %v495_v37  ;;  %v4923_v60 = vld [vmem:[#allocation27_spill] sm:$0xff] }
 0x1bd   : > { %v4144_v0 = vpop.permute.xlu1 %987  ;;  %1233 = vrot.lane.b32.xlu0 %v1222_v56, %s3289_s21  ;;  %v756_v53 = vsel %vm755_vm15, %v3919_v29, %v4922_v39  ;;  %s4944_s21 = smov 122  }
 0x1be   : > { %1467 = vrot.lane.b32.xlu1 %v1459_v9, %s3297_s28  ;;  %v668_v26 = vadd.f32 %v663_v63, %v643_v59  ;;  %v703_v7 = vadd.f32 %v697_v44, %v669_v15  ;;  %v787_v63 = vsel %vm785_vm0, %v4924_v55, %v4923_v60  ;;  %v545_v3 = vadd.f32 %v3759_v11, %v520_v35  ;;  %v4925_v59 = vld [vmem:[#allocation28_spill] sm:$0xff]  ;;  %v4926_v15 = vld [vmem:[#allocation29_spill] sm:$0xff] }
 0x1bf   : > { %v4155_v58 = vpop.permute.xlu0 %813  ;;  %v786_v29 = vsel %vm785_vm0, %v4925_v59, %v4924_v55  ;;  %v4933_v55 = vld [vmem:[#allocation34_spill] sm:$0xff] }
 0x1c0   : > { %v702_v42 = vadd.f32 %v696_v18, %v668_v26  ;;  %v733_v9 = vadd.f32 %v727_v4, %v703_v7  ;;  %v570_v11 = vadd.f32 %v3779_v45, %v545_v3  ;;  %v1461_v4 = vmul.f32 %v4158_v19, %v3729_v36  ;;  %v4928_v26 = vld [vmem:[#allocation30_spill] sm:$0xff] }
 0x1c1   : > { %v4171_v56 = vpop.permute.xlu1 %1019  ;;  %1441 = vrot.lane.b32.xlu0 %v1431_v54, %s3296_s26  ;;  %v817_v54 = vsel %vm815_vm1, %v4926_v15, %v3943_v57  ;;  %v816_v7 = vsel %vm815_vm1, %v4928_v26, %v4926_v15  ;;  %v4935_v15 = vld [vmem:[#allocation36_spill] sm:$0xff] }
 0x1c2   : > { %1499 = vrot.lane.b32.xlu1 %v1490_v16, %s3298_s29  ;;  %v732_v44 = vadd.f32 %v726_v21, %v702_v42  ;;  %v763_v46 = vadd.f32 %v757_v22, %v733_v9  ;;  %v4927_v16 = vld [vmem:[#allocation8_spill] sm:$0xff]  ;;  %v4930_v21 = vld [vmem:[#allocation31_spill] sm:$0xff]  ;;  %v595_v45 = vadd.f32 %v3799_v34, %v570_v11  ;;  %v4931_v42 = vld [vmem:[#allocation33_spill] sm:$0xff] }
 0x1c3   : > { %v4184_v2 = vpop.permute.xlu0 %1021  ;;  %v1520_v37 = vmul.f32 %v4158_v19, %v4927_v16  ;;  %v847_v39 = vsel %vm845_vm2, %v4930_v21, %v4929_v24  ;;  %v846_v9 = vsel %vm845_vm2, %v4931_v42, %v4930_v21  ;;  %v4936_v11 = vld [vmem:[#allocation39_spill] sm:$0xff] }
 0x1c4   : > { %v762_v50 = vadd.f32 %v756_v53, %v732_v44  ;;  %v793_v18 = vadd.f32 %v787_v63, %v763_v46  ;;  %v4932_v53 = vld [vmem:[#allocation35_spill] sm:$0xff]  ;;  %v620_v3 = vadd.f32 %v3819_v31, %v595_v45 }
 0x1c5   : > { %v4195_v8 = vpop.permute.xlu1 %1017  ;;  %1263 = vrot.lane.b32.xlu0 %v1252_v27, %s3290_s17  ;;  %v877_v63 = vsel %vm875_vm6, %v4933_v55, %v4932_v53  ;;  %s3300_s17 = smov 120  }
 0x1c6   : > { %1497 = vrot.lane.b32.xlu1 %v1489_v13, %s3298_s29  ;;  %v792_v22 = vadd.f32 %v786_v29, %v762_v50  ;;  %v823_v27 = vadd.f32 %v817_v54, %v793_v18  ;;  %v4934_v13 = vld [vmem:[#allocation5_spill] sm:$0xff]  ;;  %v1519_v29 = vmul.f32 %v4112_v20, %v4927_v16  ;;  %v876_v54 = vsel %vm875_vm6, %v4935_v15, %v4933_v55  ;;  %v4937_v50 = vld [vmem:[#allocation38_spill] sm:$0xff] }
 0x1c7   : > { %v4206_v12 = vpop.permute.xlu0 %843  ;;  %v1282_v34 = vmul.f32 %v4934_v13, %v3685_v61  ;;  %v907_v18 = vsel %vm905_vm7, %v4937_v50, %v4936_v11  ;;  %v1491_v55 = vmul.f32 %v4158_v19, %v4919_v47  ;;  %v728_v13 = vsel %vm725_vm14, %v3899_v52, %v4013_v38  ;;  %v4942_v38 = vld [vmem:[#allocation6_spill] sm:$0xff] }
 0x1c8   : > { %v822_v44 = vadd.f32 %v816_v7, %v792_v22  ;;  %v853_v46 = vadd.f32 %v847_v39, %v823_v27  ;;  %v4938_v7 = vld [vmem:[#allocation37_spill] sm:$0xff]  ;;  %v4939_v39 = vld [vmem:[#allocation40_spill] sm:$0xff]  ;;  %v937_v22 = vsel %vm935_vm8, %v4023_v33, %v4032_v43  ;;  %v758_v15 = vsel %vm755_vm15, %v4921_v10, %v4054_v14 }
 0x1c9   : > { %v4219_v35 = vpop.permute.xlu1 %1049  ;;  %1471 = vrot.lane.b32.xlu0 %v1461_v4, %s3297_s28  ;;  %v645_v4 = vadd.f32 %v3839_v6, %v620_v3  ;;  %v698_v21 = vsel %vm695_vm13, %v3879_v25, %v4938_v7  ;;  %v906_v45 = vsel %vm905_vm7, %v4939_v39, %v4937_v50  ;;  %v4940_v25 = vld [vmem:[#allocation9_spill] sm:$0xff]  ;;  %v966_v52 = vsel %vm965_vm9, %v4090_v5, %v4066_v30 }
 0x1ca   : > { %1527 = vrot.lane.b32.xlu1 %v1520_v37, %s3253_s16  ;;  %v852_v37 = vadd.f32 %v846_v9, %v822_v44  ;;  %v883_v31 = vadd.f32 %v877_v63, %v853_v46  ;;  %v1544_v63 = vmul.f32 %v4158_v19, %v4940_v25  ;;  %v1543_v14 = vmul.f32 %v4112_v20, %v4940_v25 }
 0x1cb   : > { %v4232_v59 = vpop.permute.xlu0 %1051  ;;  %v670_v6 = vadd.f32 %v3859_v1, %v645_v4  ;;  %v967_v1 = vsel %vm965_vm9, %v4066_v30, %v4076_v49  ;;  %v788_v30 = vsel %vm785_vm0, %v4923_v60, %v4101_v51  ;;  %v996_v5 = vsel %vm995_vm10, %v4144_v0, %v4117_v48 }
 0x1cc   : > { %v882_v27 = vadd.f32 %v876_v54, %v852_v37  ;;  %v913_v42 = vadd.f32 %v907_v18, %v883_v31  ;;  %v1027_v10 = vsel %vm1025_vm11, %v4171_v56, %v4184_v2  ;;  %vm1085_vm13 = vcmask 457728  }
 0x1cd   : > { %v1048_v26 = vpop.permute.xlu1 %1047  ;;  %1293 = vrot.lane.b32.xlu0 %v1282_v34, %s3291_s14  ;;  %v936_v34 = vsel %vm935_vm8, %v4044_v62, %v4023_v33  ;;  %v704_v3 = vadd.f32 %v698_v21, %v670_v6  ;;  %v997_v33 = vsel %vm995_vm10, %v4117_v48, %v4130_v28  ;;  %s4941_s14 = smov 123   ;;  %v1312_v62 = vmul.f32 %v4942_v38, %v3685_v61 }
 0x1ce   : > { %1525 = vrot.lane.b32.xlu1 %v1519_v29, %s3253_s16  ;;  %v912_v44 = vadd.f32 %v906_v45, %v882_v27  ;;  %v943_v46 = vadd.f32 %v937_v22, %v913_v42  ;;  %v818_v39 = vsel %vm815_vm1, %v3943_v57, %v4155_v58  ;;  %v1026_v51 = vsel %vm1025_vm11, %v4195_v8, %v4171_v56  ;;  %v4943_v27 = vld [vmem:[#allocation10_spill] sm:$0xff] }
 0x1cf   : > { %v874_v9 = vpop.permute.xlu0 %873  ;;  %v734_v54 = vadd.f32 %v728_v13, %v704_v3  ;;  %v1057_v48 = vsel %vm1055_vm12, %v4219_v35, %v4232_v59  ;;  %v1521_v0 = vmul.f32 %v4927_v16, %v3685_v61  ;;  %v1568_v57 = vmul.f32 %v4158_v19, %v4943_v27 }
 0x1d0   : > { %v942_v50 = vadd.f32 %v936_v34, %v912_v44  ;;  %v973_v18 = vadd.f32 %v967_v1, %v943_v46  ;;  %v848_v58 = vsel %vm845_vm2, %v4929_v24, %v4206_v12  ;;  %v1056_v56 = vsel %vm1055_vm12, %v1048_v26, %v4219_v35 }
 0x1d1   : > { %v1080_v29 = vpop.permute.xlu1 %1079  ;;  %1501 = vrot.lane.b32.xlu0 %v1491_v55, %s3298_s29  ;;  %v764_v37 = vadd.f32 %v758_v15, %v734_v54  ;;  %vm1115_vm14 = vcmask 326656   ;;  %v878_v13 = vsel %vm875_vm6, %v4932_v53, %v874_v9  ;;  %v1342_v1 = vmul.f32 %v3619_v17, %v3685_v61 }
 0x1d2   : > { %1551 = vrot.lane.b32.xlu1 %v1544_v63, %s4941_s14  ;;  %v972_v31 = vadd.f32 %v966_v52, %v942_v50  ;;  %v1003_v7 = vadd.f32 %v997_v33, %v973_v18  ;;  %v1567_v3 = vmul.f32 %v4112_v20, %v4943_v27  ;;  %v1545_v17 = vmul.f32 %v4940_v25, %v3685_v61 }
 0x1d3   : > { %v4281_v4 = vpop.permute.xlu0 %1081  ;;  %v794_v60 = vadd.f32 %v788_v30, %v764_v37  ;;  %vm1145_vm15 = vcmask 318464   ;;  %v1372_v25 = vmul.f32 %v3630_v23, %v3685_v61  ;;  %v4946_v23 = vld [vmem:[#allocation15_spill] sm:$0xff]  ;;  %vm1175_vm0 = vcmask 310272  }
 0x1d4   : > { %v1002_v45 = vadd.f32 %v996_v5, %v972_v31  ;;  %v1033_v22 = vadd.f32 %v1027_v10, %v1003_v7  ;;  %v1087_v8 = vsel %vm1085_vm13, %v1080_v29, %v4281_v4  ;;  %v1569_v7 = vmul.f32 %v4943_v27, %v3685_v61 }
 0x1d5   : > { %v1078_v21 = vpop.permute.xlu1 %1077  ;;  %1323 = vrot.lane.b32.xlu0 %v1312_v62, %s3292_s22  ;;  %v824_v42 = vadd.f32 %v818_v39, %v794_v60  ;;  %vm1205_vm1 = vcmask 302080   ;;  %vm1235_vm2 = vcmask 293888   ;;  %vm1265_vm6 = vcmask 285696   ;;  %s4949_s22 = smov 59  }
 0x1d6   : > { %1549 = vrot.lane.b32.xlu1 %v1543_v14, %s4941_s14  ;;  %v1032_v55 = vadd.f32 %v1026_v51, %v1002_v45  ;;  %v1063_v16 = vadd.f32 %v1057_v48, %v1033_v22  ;;  %v1086_v34 = vsel %vm1085_vm13, %v1078_v21, %v1080_v29  ;;  %v1617_v51 = vmul.f32 %v4158_v19, %v4946_v23 }
 0x1d7   : > { %v904_v6 = vpop.permute.xlu0 %903  ;;  %v854_v12 = vadd.f32 %v848_v58, %v824_v42  ;;  %v1402_v22 = vmul.f32 %v3644_v32, %v3685_v61 }
 0x1d8   : > { %v1062_v24 = vadd.f32 %v1056_v56, %v1032_v55  ;;  %v1093_v35 = vadd.f32 %v1087_v8, %v1063_v16  ;;  %v908_v44 = vsel %vm905_vm7, %v4936_v11, %v904_v6  ;;  %v4945_v11 = vld [vmem:[#allocation12_spill] sm:$0xff]  ;;  %v1687_v6 = vld [vmem:[%s4834_s2] sm:$0xff]  ;;  %v1462_v55 = vmul.f32 %v3729_v36, %v3685_v61 }
 0x1d9   : > { %v1110_v63 = vpop.permute.xlu1 %1109  ;;  %1529 = vrot.lane.b32.xlu0 %v1521_v0, %s3253_s16  ;;  %v884_v9 = vadd.f32 %v878_v13, %v854_v12  ;;  %v1592_v54 = vmul.f32 %v4158_v19, %v4945_v11  ;;  %s3299_s16 = smov 121   ;;  %v1591_v5 = vmul.f32 %v4112_v20, %v4945_v11  ;;  %v1593_v56 = vmul.f32 %v4945_v11, %v3685_v61 }
 0x1da   : > { %1575 = vrot.lane.b32.xlu1 %v1568_v57, %s4944_s21  ;;  %v1092_v46 = vadd.f32 %v1086_v34, %v1062_v24  ;;  %v4383_v34 = vld [vmem:[%s3455_s27 + $0x18] sm:$0xff]  ;;  %s3302_s27 = smov 118   ;;  %vm1295_vm7 = vcmask 277504  }
 0x1db   : > { %v4321_v26 = vpop.permute.xlu0 %1111  ;;  %v914_v33 = vadd.f32 %v908_v44, %v884_v9  ;;  %v1432_v12 = vmul.f32 %v4383_v34, %v3656_v41  ;;  %v4947_v24 = vld [vmem:[#allocation18_spill] sm:$0xff]  ;;  %v1492_v9 = vmul.f32 %v4383_v34, %v4919_v47 }
 0x1dc   : > { %v1117_v53 = vsel %vm1115_vm14, %v1110_v63, %v4321_v26  ;;  %v1642_v11 = vmul.f32 %v4158_v19, %v4947_v24 }
 0x1dd   : > { %v1123_v29 = vadd.f32 %v1117_v53, %v1093_v35  ;;  %v1108_v15 = vpop.permute.xlu1 %1107  ;;  %1353 = vrot.lane.b32.xlu0 %v1342_v1, %s3293_s23 }
 0x1de   : > { %v1116_v52 = vsel %vm1115_vm14, %v1108_v15, %v1110_v63  ;;  %1573 = vrot.lane.b32.xlu1 %v1567_v3, %s4944_s21  ;;  %v1618_v3 = vmul.f32 %v4383_v34, %v4946_v23  ;;  %v1616_v15 = vmul.f32 %v4112_v20, %v4946_v23 }
 0x1df   : > { %v1122_v38 = vadd.f32 %v1116_v52, %v1092_v46  ;;  %v934_v62 = vpop.permute.xlu0 %933 }
 0x1e0   : > { %v938_v50 = vsel %vm935_vm8, %v4032_v43, %v934_v62  ;;  %vm1325_vm8 = vcmask 146432  }
 0x1e1   : > { %v944_v18 = vadd.f32 %v938_v50, %v914_v33  ;;  %v1140_v14 = vpop.permute.xlu1 %1139  ;;  %1553 = vrot.lane.b32.xlu0 %v1545_v17, %s4941_s14  ;;  %v4948_v17 = vld [vmem:[#allocation21_spill] sm:$0xff]  ;;  %s2898_s14 = smul.u32 384, %s3379_s13 }
 0x1e2   : > { %1599 = vrot.lane.b32.xlu1 %v1592_v54, %s3299_s16  ;;  %v1668_v33 = vmul.f32 %v4383_v34, %v4948_v17  ;;  %v1667_v23 = vmul.f32 %v4158_v19, %v4948_v17 }
 0x1e3   : > { %v4342_v30 = vpop.permute.xlu0 %1141 }
 0x1e4   : > { %v1147_v10 = vsel %vm1145_vm15, %v1140_v14, %v4342_v30 }
 0x1e5   : > { %v1153_v43 = vadd.f32 %v1147_v10, %v1123_v29  ;;  %v1138_v37 = vpop.permute.xlu1 %1137  ;;  %1383 = vrot.lane.b32.xlu0 %v1372_v25, %s3294_s24  ;;  %s3301_s24 = smov 119   ;;  %v1641_v10 = vmul.f32 %v4112_v20, %v4947_v24 }
 0x1e6   : > { %v1146_v31 = vsel %vm1145_vm15, %v1138_v37, %v1140_v14  ;;  %1597 = vrot.lane.b32.xlu1 %v1591_v5, %s3299_s16  ;;  %v2031_v37 = vld [vmem:[%s4838_s6] sm:$0xff] }
 0x1e7   : > { %v1152_v21 = vadd.f32 %v1146_v31, %v1122_v38  ;;  %v964_v39 = vpop.permute.xlu0 %963 }
 0x1e8   : > { %v968_v48 = vsel %vm965_vm9, %v4076_v49, %v964_v39  ;;  %vm1355_vm9 = vcmask 138240  }
 0x1e9   : > { %v974_v0 = vadd.f32 %v968_v48, %v944_v18  ;;  %v1170_v60 = vpop.permute.xlu1 %1169  ;;  %1577 = vrot.lane.b32.xlu0 %v1569_v7, %s4944_s21  ;;  %v2009_v18 = vld [vmem:[%s4835_s3] sm:$0xff] }
 0x1ea   : > { %1624 = vrot.lane.b32.xlu1 %v1617_v51, %s3300_s17 }
 0x1eb   : > { %v4361_v45 = vpop.permute.xlu0 %1171 }
 0x1ec   : > { %v1177_v49 = vsel %vm1175_vm0, %v1170_v60, %v4361_v45 }
 0x1ed   : > { %v1183_v27 = vadd.f32 %v1177_v49, %v1153_v43  ;;  %v1168_v57 = vpop.permute.xlu1 %1167  ;;  %1413 = vrot.lane.b32.xlu0 %v1402_v22, %s3295_s25  ;;  %v1666_v49 = vmul.f32 %v4112_v20, %v4948_v17 }
 0x1ee   : > { %v1176_v58 = vsel %vm1175_vm0, %v1168_v57, %v1170_v60  ;;  %1690 = vperm.xlu1 %3085, %v1687_v6   ;;  %v2034_v57 = vld [vmem:[%s4838_s6 + $0x18] sm:$0xff] }
 0x1ef   : > { %v1182_v8 = vadd.f32 %v1176_v58, %v1152_v21  ;;  %v994_v32 = vpop.permute.xlu0 %993  ;;  %v3303_v21 = vmov 0.0  }
 0x1f0   : > { %v998_v42 = vsel %vm995_vm10, %v4130_v28, %v994_v32  ;;  %v1643_v28 = vmul.f32 %v4383_v34, %v4947_v24  ;;  %1764 = vmatprep.mubr.f32.mxu1 %v3303_v21  ;;  %1911 = vmatprep.mubr.f32.mxu0 %v3303_v21 }
 0x1f1   : > { %v1004_v16 = vadd.f32 %v998_v42, %v974_v0  ;;  %v1200_v63 = vpop.permute.xlu1 %1199  ;;  %1601 = vrot.lane.b32.xlu0 %v1593_v56, %s3299_s16  ;;  %v2032_v0 = vld [vmem:[%s4838_s6 + $0x8] sm:$0xff] }
 0x1f2   : > { %1473 = vrot.lane.b32.xlu1 %v1462_v55, %s3297_s28 }
 0x1f3   : > { %v4380_v13 = vpop.permute.xlu0 %1201 }
 0x1f4   : > { %v1207_v61 = vsel %vm1205_vm1, %v1200_v63, %v4380_v13 }
 0x1f5   : > { %v1213_v36 = vadd.f32 %v1207_v61, %v1183_v27  ;;  %v1198_v35 = vpop.permute.xlu1 %1197  ;;  %1443 = vrot.lane.b32.xlu0 %v1432_v12, %s3296_s26  ;;  %s323_s26 = sand.u32 1, %s3199_s10  }
 0x1f6   : > { %v1206_v1 = vsel %vm1205_vm1, %v1198_v35, %v1200_v63  ;;  %1651 = vrot.lane.b32.xlu1 %v1643_v28, %s3301_s24  ;;  %s2897_s28 = smul.u32 24, %s323_s26  ;;  %s2743_s13 = scalar_lea.sflag [#allocation3], %s323_s26 }
 0x1f7   : > { %v1212_v44 = vadd.f32 %v1206_v1, %v1182_v8  ;;  %v1024_v41 = vpop.permute.xlu0 %1023 }
 0x1f8   : > { %v1028_v53 = vsel %vm1025_vm11, %v4184_v2, %v1024_v41  ;;  %vm1385_vm11 = vcmask 130048  }
 0x1f9   : > { %v1034_v46 = vadd.f32 %v1028_v53, %v1004_v16  ;;  %v1230_v29 = vpop.permute.xlu1 %1229  ;;  %1626 = vrot.lane.b32.xlu0 %v1618_v3, %s3300_s17 }
 0x1fa   : > { %1503 = vrot.lane.b32.xlu1 %v1492_v9, %s3298_s29  ;;  %s325_s29 = scalar_lea.vmem [#allocation2], %s2897_s28 }
 0x1fb   : > { %v4404_v52 = vpop.permute.xlu0 %1231  ;;  %s2757_s21 = sshll.u32 %s325_s29, 4  ;;  %s4792_s21 = int_to_ptr.vmem [resolvable:$true] %s2757_s21 }
 0x1fc   : > { %v1237_v2 = vsel %vm1235_vm2, %v1230_v29, %v4404_v52  ;;  %s3145_s23 = scalar_lea.vmem %s4792_s21, 384 }
 0x1fd   : > { %v1243_v38 = vadd.f32 %v1237_v2, %v1213_v36  ;;  %v1228_v47 = vpop.permute.xlu1 %1227  ;;  %1622 = vrot.lane.b32.xlu0 %v1616_v15, %s3300_s17  ;;  %p3146_p11 = scmp.ne.s32.totalorder %s4792_s21, %s3145_s23 }
 0x1fe   : > { %v1236_v62 = vsel %vm1235_vm2, %v1228_v47, %v1230_v29  ;;  %1676 = vrot.lane.b32.xlu1 %v1668_v33, %s3302_s27 }
 0x1ff   : > { %v1242_v54 = vadd.f32 %v1236_v62, %v1212_v44  ;;  %v1054_v50 = vpop.permute.xlu0 %1053  ;;  %p3147_p12 = pnand %p3146_p11, %p3396_p5 }
 0x200   : > { %v1058_v14 = vsel %vm1055_vm12, %v4232_v59, %v1054_v50  ;;  %vm1415_vm12 = vcmask 121856  }
 0x201   : > { %v1064_v25 = vadd.f32 %v1058_v14, %v1034_v46  ;;  %v1260_v5 = vpop.permute.xlu1 %1259  ;;  %1649 = vrot.lane.b32.xlu0 %v1642_v11, %s3301_s24  ;;  %p3148_p13 = pneg %p3147_p12 }
 0x202   : > { %2012 = vperm.xlu1 %3085, %v2009_v18  }
 0x203   : > { %v4423_v43 = vpop.permute.xlu0 %1261 }
 0x204   : > { %v1267_v31 = vsel %vm1265_vm6, %v1260_v5, %v4423_v43 }
 0x205   : > { %v1273_v7 = vadd.f32 %v1267_v31, %v1243_v38  ;;  %v1258_v59 = vpop.permute.xlu1 %1257  ;;  %1647 = vrot.lane.b32.xlu0 %v1641_v10, %s3301_s24  ;;  %s3307_s24 = smov [#allocation2]  }
 0x206   : > { %v1266_v39 = vsel %vm1265_vm6, %v1258_v59, %v1260_v5  ;;  %2037 = vperm.xlu1 %3085, %v2031_v37  }
 0x207   : > { %v1272_v51 = vadd.f32 %v1266_v39, %v1242_v54  ;;  %v1084_v48 = vpop.permute.xlu0 %1083 }
 0x208   : > { %v1088_v60 = vsel %vm1085_vm13, %v4281_v4, %v1084_v48  ;;  %vm1445_vm13 = vcmask 113664  }
 0x209   : > { %v1094_v22 = vadd.f32 %v1088_v60, %v1064_v25  ;;  %v1290_v6 = vpop.permute.xlu1 %1289  ;;  %1674 = vrot.lane.b32.xlu0 %v1667_v23, %s3302_s27 }
 0x20a   : > { %2042 = vperm.xlu1 %3085, %v2032_v0  }
 0x20b   : > { %v4444_v27 = vpop.permute.xlu0 %1291 }
 0x20c   : > { %v1297_v58 = vsel %vm1295_vm7, %v1290_v6, %v4444_v27 }
 0x20d   : > { %v1303_v56 = vadd.f32 %v1297_v58, %v1273_v7  ;;  %v1288_v4 = vpop.permute.xlu1 %1287  ;;  %1672 = vrot.lane.b32.xlu0 %v1666_v49, %s3302_s27  ;;  %s3149_s27 = sshll.u32 %s3307_s24, 4  ;;  %s3150_s27 = int_to_ptr.vmem [resolvable:$false] %s3149_s27 }
 0x20e   : > { %v1296_v8 = vsel %vm1295_vm7, %v1288_v4, %v1290_v6  ;;  %2052 = vperm.xlu1 %3085, %v2034_v57   ;;  %s3151_s25 = scalar_lea.vmem %s3150_s27, 768  ;;  %p3152_p0 = scmp.lt.s32.totalorder %s4792_s21, %s3150_s27 }
 0x20f   : > { %v1302_v32 = vadd.f32 %v1296_v8, %v1272_v51  ;;  %v1114_v42 = vpop.permute.xlu0 %1113  ;;  %p3153_p1 = scmp.lt.s32.totalorder %s3151_s25, %s3145_s23 }
 0x210   : > { %v1118_v55 = vsel %vm1115_vm14, %v4321_v26, %v1114_v42  ;;  %vm1475_vm14 = vcmask 105472  }
 0x211   : > { %v1124_v16 = vadd.f32 %v1118_v55, %v1094_v22  ;;  %v1320_v63 = vpop.permute.xlu1 %1319  ;;  %p3154_p2 = por %p3153_p1, %p3152_p0 }
 0x212   : > { %2721 = vrot.lane.b32.xlu1 %v4139_v40, %s4949_s22 }
 0x213   : > { %v1322_v12 = vpop.permute.xlu0 %1321  ;;  %p3155_p3 = pnand %p3154_p2, %p3148_p13 }
 0x214   : > { %v1327_v24 = vsel %vm1325_vm8, %v1320_v63, %v1322_v12 }
 0x215   : > { %v1333_v28 = vadd.f32 %v1327_v24, %v1303_v56  ;;  %v1318_v61 = vpop.permute.xlu1 %1317 }
 0x216   : > { %v1326_v36 = vsel %vm1325_vm8, %v1318_v61, %v1320_v63  ;;  %2725 = vrot.lane.b32.xlu1 %v4158_v19, %s4949_s22 }
 0x217   : > { %v1332_v35 = vadd.f32 %v1326_v36, %v1302_v32  ;;  %v1144_v1 = vpop.permute.xlu0 %1143 }
 0x218   : > { %v1148_v26 = vsel %vm1145_vm15, %v4342_v30, %v1144_v1  ;;  %vm1505_vm15 = vcmask 97280  }
 0x219   : > { %v1154_v3 = vadd.f32 %v1148_v26, %v1124_v16  ;;  %v1350_v44 = vpop.permute.xlu1 %1349 }
 0x21b   : > { %v1352_v41 = vpop.permute.xlu0 %1351 }
 0x21c   : > { %v1357_v40 = vsel %vm1355_vm9, %v1350_v44, %v1352_v41 }
 0x21d   : > { %v1363_v53 = vadd.f32 %v1357_v40, %v1333_v28  ;;  %v1348_v9 = vpop.permute.xlu1 %1347 }
 0x21e   : > { %v1356_v46 = vsel %vm1355_vm9, %v1348_v9, %v1350_v44 }
 0x21f   : > { %v1362_v29 = vadd.f32 %v1356_v46, %v1332_v35  ;;  %v1174_v15 = vpop.permute.xlu0 %1173 }
 0x220   : > { %v1178_v19 = vsel %vm1175_vm0, %v4361_v45, %v1174_v15  ;;  %vm1603_vm0 = vcmask 990208  }
 0x221   : > { %v1184_v17 = vadd.f32 %v1178_v19, %v1154_v3  ;;  %v1380_v33 = vpop.permute.xlu1 %1379 }
 0x223   : > { %v1382_v2 = vpop.permute.xlu0 %1381 }
 0x224   : > { %v1387_v30 = vsel %vm1385_vm11, %v1380_v33, %v1382_v2 }
 0x225   : > { %v1393_v38 = vadd.f32 %v1387_v30, %v1363_v53  ;;  %v1378_v47 = vpop.permute.xlu1 %1377 }
 0x226   : > { %v1386_v62 = vsel %vm1385_vm11, %v1378_v47, %v1380_v33 }
 0x227   : > { %v1392_v11 = vadd.f32 %v1386_v62, %v1362_v29  ;;  %v1204_v54 = vpop.permute.xlu0 %1203 }
 0x228   : > { %v1208_v50 = vsel %vm1205_vm1, %v4380_v13, %v1204_v54  ;;  %vm1628_vm1 = vcmask 982016  }
 0x229   : > { %v1214_v18 = vadd.f32 %v1208_v50, %v1184_v17  ;;  %v1410_v14 = vpop.permute.xlu1 %1409 }
 0x22b   : > { %v1412_v25 = vpop.permute.xlu0 %1411 }
 0x22c   : > { %v1417_v45 = vsel %vm1415_vm12, %v1410_v14, %v1412_v25 }
 0x22d   : > { %v1423_v5 = vadd.f32 %v1417_v45, %v1393_v38  ;;  %v1408_v10 = vpop.permute.xlu1 %1407 }
 0x22e   : > { %v1416_v37 = vsel %vm1415_vm12, %v1408_v10, %v1410_v14 }
 0x22f   : > { %v1422_v31 = vadd.f32 %v1416_v37, %v1392_v11  ;;  %v1234_v7 = vpop.permute.xlu0 %1233 }
 0x230   : > { %v1238_v59 = vsel %vm1235_vm2, %v4404_v52, %v1234_v7  ;;  %vm3305_vm2 = vmmov 0  }
 0x231   : > { %v1244_v39 = vadd.f32 %v1238_v59, %v1214_v18  ;;  %v1440_v23 = vpop.permute.xlu1 %1439 }
 0x233   : > { %v1442_v51 = vpop.permute.xlu0 %1441 }
 0x235   : > { %v1438_v48 = vpop.permute.xlu1 %1437 }
 0x236   : > { %v1446_v47 = vsel %vm1445_vm13, %v1438_v48, %v1440_v23 }
 0x237   : > { %v1264_v13 = vpop.permute.xlu0 %1263  ;;  %v1452_v14 = vadd.f32 %v1446_v47, %v1422_v31 }
 0x238   : > { %v1268_v0 = vsel %vm1265_vm6, %v4423_v43, %v1264_v13 }
 0x239   : > { %v1274_v60 = vadd.f32 %v1268_v0, %v1244_v39  ;;  %v1470_v22 = vpop.permute.xlu1 %1469 }
 0x23b   : > { %v4477_v6 = vpop.permute.xlu0 %1471 }
 0x23c   : > { %v1477_v62 = vsel %vm1475_vm14, %v1470_v22, %v4477_v6 }
 0x23d   : > { %v1468_v49 = vpop.permute.xlu1 %1467 }
 0x23e   : > { %v1476_v50 = vsel %vm1475_vm14, %v1468_v49, %v1470_v22 }
 0x23f   : > { %v1294_v57 = vpop.permute.xlu0 %1293  ;;  %v1482_v7 = vadd.f32 %v1476_v50, %v1452_v14  ;;  %v3304_v50 = vmov 0.125  }
 0x240   : > { %v1298_v58 = vsel %vm1295_vm7, %v4444_v27, %v1294_v57 }
 0x241   : > { %v1304_v56 = vadd.f32 %v1298_v58, %v1274_v60  ;;  %v1500_v4 = vpop.permute.xlu1 %1499 }
 0x243   : > { %v4481_v52 = vpop.permute.xlu0 %1501 }
 0x244   : > { %v1507_v18 = vsel %vm1505_vm15, %v1500_v4, %v4481_v52 }
 0x245   : > { %v1498_v8 = vpop.permute.xlu1 %1497 }
 0x246   : > { %v1506_v10 = vsel %vm1505_vm15, %v1498_v8, %v1500_v4 }
 0x247   : > { %v1324_v32 = vpop.permute.xlu0 %1323 }
 0x248   : > { %v1328_v42 = vsel %vm1325_vm8, %v1322_v12, %v1324_v32 }
 0x249   : > { %v1334_v55 = vadd.f32 %v1328_v42, %v1304_v56  ;;  %v1528_v16 = vpop.permute.xlu1 %1527 }
 0x24b   : > { %v4484_v43 = vpop.permute.xlu0 %1529 }
 0x24c   : > { %v1532_v37 = vsel %vm437_vm3, %v1528_v16, %v4484_v43 }
 0x24d   : > { %v1526_v63 = vpop.permute.xlu1 %1525 }
 0x24f   : > { %v1354_v24 = vpop.permute.xlu0 %1353 }
 0x250   : > { %v1358_v28 = vsel %vm1355_vm9, %v1352_v41, %v1354_v24 }
 0x251   : > { %v1364_v61 = vadd.f32 %v1358_v28, %v1334_v55  ;;  %v1552_v36 = vpop.permute.xlu1 %1551 }
 0x253   : > { %v4487_v35 = vpop.permute.xlu0 %1553 }
 0x255   : > { %v1550_v27 = vpop.permute.xlu1 %1549 }
 0x256   : > { %v1555_v31 = vsel %vm462_vm4, %v1550_v27, %v1552_v36 }
 0x257   : > { %v1384_v1 = vpop.permute.xlu0 %1383 }
 0x258   : > { %v1388_v26 = vsel %vm1385_vm11, %v1382_v2, %v1384_v1  ;;  %v1447_v2 = vsel %vm1445_vm13, %v1440_v23, %v1442_v51  ;;  %v1556_v23 = vsel %vm462_vm4, %v1552_v36, %v4487_v35  ;;  %vm1678_vm4 = vcmask 965632  }
 0x259   : > { %v1394_v3 = vadd.f32 %v1388_v26, %v1364_v61  ;;  %v1576_v44 = vpop.permute.xlu1 %1575  ;;  %v1453_v11 = vadd.f32 %v1447_v2, %v1423_v5  ;;  %v1531_v5 = vsel %vm437_vm3, %v1526_v63, %v1528_v16  ;;  %vm1653_vm3 = vcmask 973824  }
 0x25b   : > { %v4490_v40 = vpop.permute.xlu0 %1577 }
 0x25c   : > { %v1580_v0 = vsel %vm487_vm5, %v1576_v44, %v4490_v40 }
 0x25d   : > { %v1574_v12 = vpop.permute.xlu1 %1573 }
 0x25e   : > { %v1579_v57 = vsel %vm487_vm5, %v1574_v12, %v1576_v44  ;;  %vm1696_vm5 = vcmask 64512  }
 0x25f   : > { %v1414_v53 = vpop.permute.xlu0 %1413 }
 0x260   : > { %v1418_v9 = vsel %vm1415_vm12, %v1412_v25, %v1414_v53  ;;  %v1483_v25 = vadd.f32 %v1477_v62, %v1453_v11 }
 0x261   : > { %v1424_v46 = vadd.f32 %v1418_v9, %v1394_v3  ;;  %v1600_v29 = vpop.permute.xlu1 %1599 }
 0x262   : > { %v1513_v59 = vadd.f32 %v1507_v18, %v1483_v25  ;;  %v2033_v18 = vld [vmem:[%s4838_s6 + $0x10] sm:$0xff] }
 0x263   : > { %v4493_v15 = vpop.permute.xlu0 %1601 }
 0x264   : > { %v1537_v48 = vadd.f32 %v1532_v37, %v1513_v59  ;;  %v1605_v58 = vsel %vm1603_vm0, %v1600_v29, %v4493_v15 }
 0x265   : > { %v1598_v41 = vpop.permute.xlu1 %1597 }
 0x266   : > { %v1561_v22 = vadd.f32 %v1556_v23, %v1537_v48  ;;  %v1604_v42 = vsel %vm1603_vm0, %v1598_v41, %v1600_v29 }
 0x267   : > { %v1444_v19 = vpop.permute.xlu0 %1443 }
 0x268   : > { %v1448_v17 = vsel %vm1445_vm13, %v1442_v51, %v1444_v19  ;;  %v1512_v51 = vadd.f32 %v1506_v10, %v1482_v7  ;;  %v1585_v8 = vadd.f32 %v1580_v0, %v1561_v22 }
 0x269   : > { %v1454_v33 = vadd.f32 %v1448_v17, %v1424_v46  ;;  %v1625_v30 = vpop.permute.xlu1 %1624 }
 0x26a   : > { %v1536_v60 = vadd.f32 %v1531_v5, %v1512_v51  ;;  %v1610_v63 = vadd.f32 %v1605_v58, %v1585_v8 }
 0x26b   : > { %v4495_v38 = vpop.permute.xlu0 %1626 }
 0x26c   : > { %v1560_v4 = vadd.f32 %v1555_v31, %v1536_v60  ;;  %v1630_v55 = vsel %vm1628_vm1, %v1625_v30, %v4495_v38  ;;  %v1994_v31 = vlaneseq }
 0x26d   : > { %v4499_v54 = vpop.permute.xlu1 %1690  ;;  %v1635_v26 = vadd.f32 %v1630_v55, %v1610_v63 }
 0x26e   : > { %v1584_v16 = vadd.f32 %v1579_v57, %v1560_v4  ;;  %v1995_v60 = vshrl.u32 %v1994_v31, 7 }
 0x26f   : > { %v1623_v45 = vpop.permute.xlu0 %1622 }
 0x270   : > { %v1629_v61 = vsel %vm1628_vm1, %v1623_v45, %v1625_v30  ;;  %v1609_v1 = vadd.f32 %v1604_v42, %v1584_v16  ;;  %v1996_v57 = vsub.s32 0, %v1995_v60 }
 0x271   : > { %v1474_v39 = vpop.permute.xlu1 %1473 }
 0x272   : > { %v1478_v56 = vsel %vm1475_vm14, %v4477_v6, %v1474_v39  ;;  %v1634_v12 = vadd.f32 %v1629_v61, %v1609_v1 }
 0x273   : > { %v1650_v13 = vpop.permute.xlu0 %1649  ;;  %v1484_v24 = vadd.f32 %v1478_v56, %v1454_v33 }
 0x275   : > { %v1652_v49 = vpop.permute.xlu1 %1651 }
 0x276   : > { %v1655_v36 = vsel %vm1653_vm3, %v1650_v13, %v1652_v49 }
 0x277   : > { %v1648_v32 = vpop.permute.xlu0 %1647  ;;  %v1660_v53 = vadd.f32 %v1655_v36, %v1635_v26 }
 0x278   : > { %v1654_v44 = vsel %vm1653_vm3, %v1648_v32, %v1650_v13  ;;  %vm2572_vm3 = vcmask 261120  }
 0x279   : > { %v1504_v28 = vpop.permute.xlu1 %1503  ;;  %v1659_v41 = vadd.f32 %v1654_v44, %v1634_v12  ;;  %v2029_v44 = vld [vmem:[%s4837_s5 + $0x10] sm:$0xff]  ;;  %v2030_v12 = vld [vmem:[%s4837_s5 + $0x18] sm:$0xff] }
 0x27a   : > { %v1508_v27 = vsel %vm1505_vm15, %v4481_v52, %v1504_v28 }
 0x27b   : > { %v1514_v6 = vadd.f32 %v1508_v27, %v1484_v24  ;;  %v1675_v3 = vpop.permute.xlu0 %1674 }
 0x27d   : > { %v1538_v9 = vadd.f32 %v4484_v43, %v1514_v6  ;;  %v1677_v46 = vpop.permute.xlu1 %1676 }
 0x27e   : > { %v1680_v29 = vsel %vm1678_vm4, %v1675_v3, %v1677_v46 }
 0x27f   : > { %v1562_v19 = vadd.f32 %v4487_v35, %v1538_v9  ;;  %v1685_v17 = vadd.f32 %v1680_v29, %v1660_v53  ;;  %v1673_v33 = vpop.permute.xlu0 %1672  ;;  %v3306_v53 = vmov 0.0|0.0  }
 0x280   : > { %v1679_v30 = vsel %vm1678_vm4, %v1673_v33, %v1675_v3  ;;  %v2028_v3 = vld [vmem:[%s4837_s5 + $0x8] sm:$0xff] }
 0x281   : > { %v1586_v52 = vadd.f32 %v4490_v40, %v1562_v19  ;;  %v1684_v2 = vadd.f32 %v1679_v30, %v1659_v41  ;;  %v1694_v47 = vadd.f32 %v4499_v54, %v1685_v17  ;;  %v2013_v42 = vpop.permute.xlu1 %2012 }
 0x283   : > { %v1611_v62 = vadd.f32 %v4493_v15, %v1586_v52  ;;  %1700 = vmatprep.subr.mxu1 %v1694_v47  ;;  %v1693_v11 = vadd.f32 %v4499_v54, %v1684_v2 }
 0x285   : > { %v1636_v43 = vadd.f32 %v4495_v38, %v1611_v62  ;;  %1701 = vmatpush1.msra.mxu1 %v1693_v11  ;;  %v2018_v38 = vld [vmem:[%s4836_s4] sm:$0xff]  ;;  %v2038_v9 = vpop.permute.xlu1 %2037 }
 0x286   : > { %2822 = vmatmul.mubr.msk.f32.vlgmr.msra.gmra.mrb[0].mxu1 %vm1696_vm5, %v3304_v50  ;;  %2854 = vmatprep.subr.mxu1 %v3303_v21 }
 0x287   : > { %v1661_v35 = vadd.f32 %v1652_v49, %v1636_v43  ;;  %2856 = vmatprep.mubr.msk.f32.mxu1 %vm3305_vm2, %v3303_v21  ;;  %2021 = vperm.xlu0 %3086, %v2018_v38  }
 0x289   : > { %v1686_v40 = vadd.f32 %v1677_v46, %v1661_v35  ;;  %v2043_v33 = vpop.permute.xlu1 %2042 }
 0x28b   : > { %v1695_v15 = vadd.f32 %v4499_v54, %v1686_v40  ;;  %2047 = vperm.xlu0 %3086, %v2033_v18   ;;  %v2566_v54 = vld [vmem:[%s4840_s8] sm:$0xff] }
 0x28d   : > { %2855 = vmatpush3.msra.mxu1 %v1695_v15 }
 0x28e   : > { %2857 = vmatmul.mubr.msk.f32.vlgmr.msra.gmra.mrb[2].mxu1 %vm1696_vm5, %v3304_v50  ;;  %2859 = vmatprep.subr.mxu1 %v3303_v21 }
 0x28f   : > { %2861 = vmatprep.mubr.msk.f32.mxu1 %vm3305_vm2, %v3303_v21  ;;  %2569 = vperm.xlu0 %3086, %v2566_v54  }
 0x293   : > { %2723 = vrot.lane.b32.xlu0 %v4112_v20, %s4949_s22  ;;  %v2027_v20 = vld [vmem:[%s4837_s5] sm:$0xff] }
 0x297   : > { %2727 = vrot.lane.b32.xlu0 %v4383_v34, %s4949_s22  ;;  %s4790_s22 = scalar_lea.hbm %s4841_s9, %s2898_s14 }
 0x306   : > { %v2022_v28 = vpop.permute.xlu0 %2021 }
 0x359   : > { %v1766_v14 = vpop.f32.mrb[0].mxu1 }
 0x35a   : > { %v1841_v25 = vsub.f32 %v1693_v11, %v1766_v14  ;;  %v1768_v45 = vpop.f32.mrb[1].mxu1 }
 0x35b   : > { %v1842_v10 = vsub.f32 %v1694_v47, %v1768_v45 }
 0x35c   : > { %v1844_v7 = vmul.f32 %v1841_v25, %v1841_v25 }
 0x35d   : > { %v1845_v37 = vmul.f32 %v1842_v10, %v1842_v10 }
 0x35f   : > { %1847 = vmatprep.subr.mxu0 %v1845_v37 }
 0x360   : > { %1848 = vmatpush1.msra.mxu0 %v1844_v7 }
 0x361   : > { %v1837_v59 = vpop.f32.mrb[2].mxu1  ;;  %2824 = vmatmul.mubr.msk.f32.vlgmr.msra.gmra.mrb[0].mxu0 %vm1696_vm5, %v3304_v50 }
 0x362   : > { %v1843_v39 = vsub.f32 %v1695_v15, %v1837_v59  ;;  %v2858_v5 = vpop.f32.mrb[3].mxu1  ;;  %2131 = vmatprep.mubr.f32.mxu0 %v3303_v21 }
 0x364   : > { %v1846_v23 = vmul.f32 %v1843_v39, %v1843_v39 }
 0x366   : > { %2860 = vmatpush3.msra.mxu1 %v1846_v23 }
 0x367   : > { %2862 = vmatmul.mubr.msk.f32.vlgmr.msra.gmra.mrb[4].mxu1 %vm1696_vm5, %v3304_v50 }
 0x368   : > { %2866 = vmatprep.mubr.msk.f32.mxu1 %vm1696_vm5, %v2027_v20 }
 0x434   : > { %v1913_v34 = vpop.f32.mrb[0].mxu0 }
 0x435   : > { %v1988_v51 = vadd.f32 1e-06, %v1913_v34  ;;  %v1915_v48 = vpop.f32.mrb[1].mxu0 }
 0x436   : > { %v1989_v13 = vadd.f32 1e-06, %v1915_v48 }
 0x437   : > { %3087 = vrsqrt.f32 %v1988_v51  ;;  %v4615_v51 = vpop.permute.xlu0 %2047 }
 0x438   : > { %3089 = vrsqrt.f32 %v1989_v13 }
 0x43a   : > { %v1984_v0 = vpop.f32.mrb[4].mxu1 }
 0x43b   : > { %v1990_v22 = vadd.f32 1e-06, %v1984_v0  ;;  %v2863_v49 = vpop.f32.mrb[5].mxu1 }
 0x43d   : > { %3091 = vrsqrt.f32 %v1990_v22 }
 0x441   : > { %v3088_v58 = vpop.eup %3087 }
 0x442   : > { %v3090_v56 = vpop.eup %3089  ;;  %v1997_v4 = vrot.slane %v3088_v58, %v1996_v57 }
 0x443   : > { %v2001_v8 = vrot.slane %v3090_v56, %v1996_v57 }
 0x444   : > { %v2006_v32 = vmul.f32 %v1997_v4, %v1841_v25 }
 0x445   : > { %v2007_v55 = vmul.f32 %v2001_v8, %v1842_v10 }
 0x446   : > { %v2015_v16 = vmul.f32 %v2013_v42, %v2006_v32 }
 0x447   : > { %v3092_v63 = vpop.eup %3091  ;;  %v2016_v24 = vmul.f32 %v2013_v42, %v2007_v55 }
 0x448   : > { %v2005_v61 = vrot.slane %v3092_v63, %v1996_v57  ;;  %v2024_v1 = vadd.f32 %v2022_v28, %v2015_v16 }
 0x449   : > { %v2025_v36 = vadd.f32 %v2022_v28, %v2016_v24 }
 0x44a   : > { %v2008_v27 = vmul.f32 %v2005_v61, %v1843_v39 }
 0x44b   : > { %2067 = vmatprep.subr.mxu0 %v2025_v36 }
 0x44c   : > { %v2017_v26 = vmul.f32 %v2013_v42, %v2008_v27  ;;  %2068 = vmatpush1.msra.mxu0 %v2024_v1 }
 0x44d   : > { %2826 = vmatmul.mubr.msk.f32.vlgmr.msra.gmra.mrb[2].mxu0 %vm1696_vm5, %v2027_v20  ;;  %2891 = vmatprep.subr.bf16.mxu0 %v3306_v53 }
 0x44e   : > { %v2026_v6 = vadd.f32 %v2022_v28, %v2017_v26  ;;  %2137 = vmatprep.mubr.f32.mxu0 %v3303_v21 }
 0x450   : > { %2864 = vmatprep.subr.mxu1 %v2026_v6 }
 0x451   : > { %2827 = vmatmul.mubr.msk.f32.gmra.mrb[4].mxu0 %vm1696_vm5, %v2028_v3  ;;  %2865 = vmatpush3.msra.mxu1 %v2026_v6 }
 0x452   : > { %2867 = vmatmul.mubr.msk.f32.vlgmr.msra.gmra.mrb[6].mxu1 %vm1696_vm5, %v2028_v3  ;;  %2143 = vmatprep.mubr.f32.mxu0 %v3303_v21 }
 0x453   : > { %2869 = vmatprep.mubr.msk.f32.mxu1 %vm1696_vm5, %v2029_v44 }
 0x455   : > { %2828 = vmatmul.mubr.msk.f32.gmra.mrb[6].mxu0 %vm1696_vm5, %v2029_v44 }
 0x456   : > { %2870 = vmatmul.mubr.msk.f32.gmra.mrb[8].mxu1 %vm1696_vm5, %v2030_v12  ;;  %2149 = vmatprep.mubr.f32.mxu0 %v3303_v21 }
 0x457   : > { %2640 = vmatprep.mubr.f32.mxu1 %v3303_v21 }
 0x459   : > { %2829 = vmatmul.mubr.msk.f32.gmra.mrb[8].mxu0 %vm1696_vm5, %v2030_v12  ;;  %vm2740_vm5 = vcmask 785408  }
 0x45a   : > { %2880 = vmatprep.mubr.msk.f32.mxu0 %vm3305_vm2, %v3303_v21 }
 0x520   : > { %v2133_v46 = vpop.f32.mrb[2].mxu0 }
 0x521   : > { %v4581_v29 = vadd.f32 %v2133_v46, %v2038_v9  ;;  %v2135_v41 = vpop.f32.mrb[3].mxu0 }
 0x522   : > { %v4583_v19 = vadd.f32 %v2135_v41, %v2038_v9 }
 0x523   : > { %v4586_v17 = vmul.f32 0.70710677, %v4581_v29 }
 0x524   : > { %v4589_v30 = vmul.f32 0.70710677, %v4583_v19  ;;  %v2139_v52 = vpop.f32.mrb[4].mxu0 }
 0x525   : > { %v2265_v21 = vand.u32 2147483647, %v4586_v17  ;;  %v4592_v2 = vadd.f32 %v2139_v52, %v2043_v33  ;;  %v2141_v47 = vpop.f32.mrb[5].mxu0  ;;  %v2868_v62 = vpop.f32.mrb[6].mxu1  ;;  %vm2505_vm6 = vcmp.ge.f32.partialorder %v4586_v17, 0.0 }
 0x526   : > { %v2266_v11 = vand.u32 2147483647, %v4589_v30  ;;  %v4595_v43 = vadd.f32 %v2141_v47, %v2043_v33  ;;  %v2222_v50 = vpop.f32.mrb[7].mxu1  ;;  %v4605_v37 = vadd.f32 %v2868_v62, %v2043_v33  ;;  %vm2506_vm8 = vcmp.ge.f32.partialorder %v4589_v30, 0.0 }
 0x527   : > { %v2277_v35 = vmul.f32 0.3275911, %v2265_v21  ;;  %v4598_v40 = vmul.f32 0.70710677, %v4592_v2  ;;  %v2433_v31 = vmul.f32 %v2265_v21, %v2265_v21  ;;  %v4620_v0 = vadd.f32 %v2222_v50, %v2038_v9 }
 0x528   : > { %v2278_v15 = vmul.f32 0.3275911, %v2266_v11  ;;  %v4601_v38 = vmul.f32 0.70710677, %v4595_v43  ;;  %v2145_v18 = vpop.f32.mrb[6].mxu0  ;;  %v2434_v49 = vmul.f32 %v2266_v11, %v2266_v11 }
 0x529   : > { %v2289_v54 = vadd.f32 1.0, %v2277_v35  ;;  %v2268_v14 = vand.u32 2147483647, %v4598_v40  ;;  %v2147_v25 = vpop.f32.mrb[7].mxu0  ;;  %v4607_v7 = vpop.f32.mrb[8].mxu1  ;;  %v4623_v60 = vadd.f32 %v2145_v18, %v4615_v51  ;;  %v2445_v4 = vsub.f32 0.0, %v2433_v31 }
 0x52a   : > { %v2290_v45 = vadd.f32 1.0, %v2278_v15  ;;  %v2269_v10 = vand.u32 2147483647, %v4601_v38  ;;  %v4609_v39 = vpop.f32.mrb[9].mxu1  ;;  %v4618_v13 = vmul.f32 0.70710677, %v4605_v37  ;;  %v4642_v27 = vadd.f32 %v2147_v25, %v4615_v51 }
 0x52b   : > { %3093 = vrcp.f32 %v2289_v54  ;;  %v2280_v59 = vmul.f32 0.3275911, %v2268_v14  ;;  %v4627_v57 = vmul.f32 0.70710677, %v4620_v0  ;;  %v4630_v56 = vmul.f32 0.70710677, %v4623_v60 }
 0x52c   : > { %3095 = vrcp.f32 %v2290_v45  ;;  %v2281_v5 = vmul.f32 0.3275911, %v2269_v10  ;;  %v4611_v23 = vpop.f32.mrb[8].mxu0  ;;  %v2270_v22 = vand.u32 2147483647, %v4618_v13  ;;  %v2436_v32 = vmul.f32 %v2268_v14, %v2268_v14 }
 0x52d   : > { %v2292_v20 = vadd.f32 1.0, %v2280_v59  ;;  %v4613_v34 = vpop.f32.mrb[9].mxu0  ;;  %v2267_v8 = vand.u32 2147483647, %v4627_v57  ;;  %v2446_v16 = vsub.f32 0.0, %v2434_v49  ;;  %v2437_v63 = vmul.f32 %v2269_v10, %v2269_v10 }
 0x52e   : > { %v2293_v48 = vadd.f32 1.0, %v2281_v5  ;;  %v2282_v58 = vmul.f32 0.3275911, %v2270_v22  ;;  %v4639_v36 = vand.u32 2147483647, %v4630_v56  ;;  %v2438_v6 = vmul.f32 %v2270_v22, %v2270_v22  ;;  %v4657_v5 = vpop.permute.xlu1 %2052 }
 0x52f   : > { %3097 = vrcp.f32 %v2292_v20  ;;  %v2279_v24 = vmul.f32 0.3275911, %v2267_v8  ;;  %v2457_v1 = vmul.f32 1.442695, %v2445_v4  ;;  %v2448_v12 = vsub.f32 0.0, %v2436_v32 }
 0x530   : > { %3099 = vrcp.f32 %v2293_v48  ;;  %v2294_v42 = vadd.f32 1.0, %v2282_v58  ;;  %v2459_v41 = vmul.f32 1.442695, %v2446_v16  ;;  %v2449_v33 = vsub.f32 0.0, %v2437_v63 }
 0x531   : > { %v2291_v3 = vadd.f32 1.0, %v2279_v24  ;;  %v2283_v62 = vmul.f32 0.3275911, %v4639_v36  ;;  %v4653_v11 = vmul.f32 0.70710677, %v4642_v27  ;;  %v2450_v15 = vsub.f32 0.0, %v2438_v6 }
 0x532   : > { %3101 = vrcp.f32 %v2294_v42  ;;  %v2463_v14 = vmul.f32 1.442695, %v2448_v12  ;;  %v2435_v25 = vmul.f32 %v2267_v8, %v2267_v8  ;;  %v2465_v59 = vmul.f32 1.442695, %v2449_v33 }
 0x533   : > { %3103 = vrcp.f32 %v2291_v3  ;;  %v2295_v31 = vadd.f32 1.0, %v2283_v62  ;;  %v4662_v22 = vand.u32 2147483647, %v4653_v11  ;;  %v2467_v4 = vmul.f32 1.442695, %v2450_v15 }
 0x534   : > { %3105 = vpow2.f32 %v2457_v1  ;;  %v4668_v8 = vadd.f32 %v4607_v7, %v4657_v5  ;;  %v2447_v63 = vsub.f32 0.0, %v2435_v25  ;;  %vm2508_vm7 = vcmp.ge.f32.partialorder %v4598_v40, 0.0 }
 0x535   : > { %v4633_v55 = vpop.eup %3093  ;;  %3107 = vpow2.f32 %v2459_v41  ;;  %v2284_v3 = vmul.f32 0.3275911, %v4662_v22  ;;  %vm2509_vm9 = vcmp.ge.f32.partialorder %v4601_v38, 0.0  ;;  %vm2510_vm11 = vcmp.ge.f32.partialorder %v4618_v13, 0.0 }
 0x536   : > { %v4635_v28 = vpop.eup %3095  ;;  %v2325_v61 = vmul.f32 1.0614054, %v4633_v55  ;;  %3109 = vpow2.f32 %v2463_v14  ;;  %v4681_v41 = vmul.f32 0.70710677, %v4668_v8  ;;  %v2461_v15 = vmul.f32 1.442695, %v2447_v63 }
 0x537   : > { %v2326_v26 = vmul.f32 1.0614054, %v4635_v28  ;;  %3111 = vpow2.f32 %v2465_v59  ;;  %vm2507_vm12 = vcmp.ge.f32.partialorder %v4627_v57, 0.0  ;;  %vm2511_vm14 = vcmp.ge.f32.partialorder %v4630_v56, 0.0 }
 0x538   : > { %v2337_v44 = vadd.f32 -1.4531521, %v2325_v61  ;;  %3113 = vrcp.f32 %v2295_v31  ;;  %vm2516_vm13 = vcmp.ge.f32.partialorder %v4681_v41, 0.0  ;;  %vm2512_vm1 = vcmp.ge.f32.partialorder %v4653_v11, 0.0 }
 0x539   : > { %v4645_v9 = vpop.eup %3097  ;;  %v2338_v46 = vadd.f32 -1.4531521, %v2326_v26  ;;  %3115 = vpow2.f32 %v2467_v4 }
 0x53a   : > { %v4647_v52 = vpop.eup %3099  ;;  %v2349_v21 = vmul.f32 %v4633_v55, %v2337_v44  ;;  %v2328_v47 = vmul.f32 1.0614054, %v4645_v9  ;;  %3117 = vpow2.f32 %v2461_v15 }
 0x53b   : > { %v2350_v50 = vmul.f32 %v4635_v28, %v2338_v46  ;;  %v2329_v35 = vmul.f32 1.0614054, %v4647_v52 }
 0x53c   : > { %v2361_v18 = vadd.f32 1.4214138, %v2349_v21  ;;  %v2340_v54 = vadd.f32 -1.4531521, %v2328_v47  ;;  %v4670_v32 = vpop.eup %3101 }
 0x53d   : > { %v2362_v45 = vadd.f32 1.4214138, %v2350_v50  ;;  %v2341_v10 = vadd.f32 -1.4531521, %v2329_v35  ;;  %v2330_v1 = vmul.f32 1.0614054, %v4670_v32  ;;  %v4676_v7 = vpop.eup %3103 }
 0x53e   : > { %v2373_v20 = vmul.f32 %v4633_v55, %v2361_v18  ;;  %v2352_v48 = vmul.f32 %v4645_v9, %v2340_v54  ;;  %v2327_v47 = vmul.f32 1.0614054, %v4676_v7  ;;  %v3106_v62 = vpop.eup %3105 }
 0x53f   : > { %v2374_v49 = vmul.f32 %v4635_v28, %v2362_v45  ;;  %v2353_v58 = vmul.f32 %v4647_v52, %v2341_v10  ;;  %v2342_v46 = vadd.f32 -1.4531521, %v2330_v1  ;;  %v3108_v45 = vpop.eup %3107 }
 0x540   : > { %v2385_v42 = vadd.f32 -0.28449672, %v2373_v20  ;;  %v2364_v16 = vadd.f32 1.4214138, %v2352_v48  ;;  %v2339_v25 = vadd.f32 -1.4531521, %v2327_v47 }
 0x541   : > { %v2386_v24 = vadd.f32 -0.28449672, %v2374_v49  ;;  %v2365_v61 = vadd.f32 1.4214138, %v2353_v58  ;;  %v2354_v35 = vmul.f32 %v4670_v32, %v2342_v46  ;;  %v2296_v20 = vadd.f32 1.0, %v2284_v3 }
 0x542   : > { %v2397_v26 = vmul.f32 %v4633_v55, %v2385_v42  ;;  %v2376_v6 = vmul.f32 %v4645_v9, %v2364_v16  ;;  %v2351_v49 = vmul.f32 %v4676_v7, %v2339_v25  ;;  %v4690_v58 = vand.u32 2147483647, %v4681_v41  ;;  %v3110_v16 = vpop.eup %3109 }
 0x543   : > { %v2398_v44 = vmul.f32 %v4635_v28, %v2386_v24  ;;  %v2377_v12 = vmul.f32 %v4647_v52, %v2365_v61  ;;  %v2366_v59 = vadd.f32 1.4214138, %v2354_v35  ;;  %v3112_v4 = vpop.eup %3111  ;;  %3119 = vrcp.f32 %v2296_v20 }
 0x544   : > { %v2409_v33 = vadd.f32 0.2548296, %v2397_v26  ;;  %v2388_v21 = vadd.f32 -0.28449672, %v2376_v6  ;;  %v2363_v1 = vadd.f32 1.4214138, %v2351_v49  ;;  %v4696_v3 = vpop.eup %3113  ;;  %v2444_v38 = vmul.f32 %v4690_v58, %v4690_v58 }
 0x545   : > { %v2389_v50 = vadd.f32 -0.28449672, %v2377_v12  ;;  %v2410_v54 = vadd.f32 0.2548296, %v2398_v44  ;;  %v2331_v35 = vmul.f32 1.0614054, %v4696_v3  ;;  %v3116_v25 = vpop.eup %3115 }
 0x546   : > { %v2421_v18 = vmul.f32 %v4633_v55, %v2409_v33  ;;  %v2400_v14 = vmul.f32 %v4645_v9, %v2388_v21  ;;  %v2378_v55 = vmul.f32 %v4670_v32, %v2366_v59  ;;  %v2375_v46 = vmul.f32 %v4676_v7, %v2363_v1 }
 0x547   : > { %v2401_v10 = vmul.f32 %v4647_v52, %v2389_v50  ;;  %v2422_v24 = vmul.f32 %v4635_v28, %v2410_v54  ;;  %v2288_v33 = vmul.f32 0.3275911, %v4690_v58  ;;  %v2244_v49 = vmul.f32 0.5, %v4592_v2 }
 0x548   : > { %v2481_v48 = vmul.f32 %v3106_v62, %v2421_v18  ;;  %v2412_v31 = vadd.f32 0.2548296, %v2400_v14  ;;  %v2390_v6 = vadd.f32 -0.28449672, %v2378_v55  ;;  %v2387_v50 = vadd.f32 -0.28449672, %v2375_v46 }
 0x549   : > { %v2413_v42 = vadd.f32 0.2548296, %v2401_v10  ;;  %v2482_v47 = vmul.f32 %v3108_v45, %v2422_v24  ;;  %v2300_v14 = vadd.f32 1.0, %v2288_v33  ;;  %v2241_v10 = vmul.f32 0.5, %v4581_v29 }
 0x54a   : > { %v2493_v63 = vsub.f32 1.0, %v2481_v48  ;;  %v2424_v61 = vmul.f32 %v4645_v9, %v2412_v31  ;;  %v2402_v28 = vmul.f32 %v4670_v32, %v2390_v6  ;;  %v2399_v54 = vmul.f32 %v4676_v7, %v2387_v50  ;;  %v3118_v31 = vpop.eup %3117 }
 0x54b   : > { %v2425_v26 = vmul.f32 %v4647_v52, %v2413_v42  ;;  %v2494_v20 = vsub.f32 1.0, %v2482_v47  ;;  %v2343_v40 = vadd.f32 -1.4531521, %v2331_v35  ;;  %3121 = vrcp.f32 %v2300_v14 }
 0x54c   : > { %v2517_v44 = vsub.f32 0.0, %v2493_v63  ;;  %v2484_v12 = vmul.f32 %v3110_v16, %v2424_v61  ;;  %v2414_v52 = vadd.f32 0.2548296, %v2402_v28  ;;  %v2411_v48 = vadd.f32 0.2548296, %v2399_v54 }
 0x54d   : > { %v2485_v21 = vmul.f32 %v3112_v4, %v2425_v26  ;;  %v4711_v16 = vadd.f32 %v4609_v39, %v4615_v51  ;;  %v4722_v2 = vadd.f32 %v4611_v23, %v4657_v5  ;;  %v2518_v4 = vsub.f32 0.0, %v2494_v20 }
 0x54e   : > { %v2529_v9 = vsel %vm2505_vm6, %v2493_v63, %v2517_v44  ;;  %v2496_v62 = vsub.f32 1.0, %v2484_v12  ;;  %v2426_v17 = vmul.f32 %v4670_v32, %v2414_v52  ;;  %v2423_v63 = vmul.f32 %v4676_v7, %v2411_v48  ;;  %v4714_v32 = vpop.eup %3119 }
 0x54f   : > { %v2497_v18 = vsub.f32 1.0, %v2485_v21  ;;  %v2541_v59 = vadd.f32 1.0, %v2529_v9  ;;  %v2245_v39 = vmul.f32 0.5, %v4595_v43  ;;  %v2246_v26 = vmul.f32 0.5, %v4605_v37 }
 0x550   : > { %v2520_v15 = vsub.f32 0.0, %v2496_v62  ;;  %v2486_v55 = vmul.f32 %v3116_v25, %v2426_v17  ;;  %v2483_v51 = vmul.f32 %v3118_v31, %v2423_v63  ;;  %v2355_v46 = vmul.f32 %v4696_v3, %v2343_v40 }
 0x551   : > { %v2521_v29 = vsub.f32 0.0, %v2497_v18  ;;  %v4716_v24 = vmul.f32 %v2541_v59, %v2241_v10  ;;  %v4732_v23 = vmul.f32 0.70710677, %v4711_v16  ;;  %v2332_v43 = vmul.f32 1.0614054, %v4714_v32 }
 0x552   : > { %v2532_v45 = vsel %vm2508_vm7, %v2496_v62, %v2520_v15  ;;  %v2498_v1 = vsub.f32 1.0, %v2486_v55  ;;  %v2495_v12 = vsub.f32 1.0, %v2483_v51  ;;  %v4738_v21 = vmul.f32 0.70710677, %v4722_v2 }
 0x553   : > { %v2544_v42 = vadd.f32 1.0, %v2532_v45  ;;  %v2533_v44 = vsel %vm2509_vm9, %v2497_v18, %v2521_v29  ;;  %v2530_v37 = vsel %vm2506_vm8, %v2494_v20, %v2518_v4  ;;  %v2273_v9 = vand.u32 2147483647, %v4732_v23 }
 0x554   : > { %v2522_v6 = vsub.f32 0.0, %v2498_v1  ;;  %v2519_v28 = vsub.f32 0.0, %v2495_v12  ;;  %v2545_v47 = vadd.f32 1.0, %v2533_v44  ;;  %v2243_v62 = vmul.f32 0.5, %v4620_v0 }
 0x555   : > { %v4718_v61 = vmul.f32 %v2544_v42, %v2244_v49  ;;  %v2274_v50 = vand.u32 2147483647, %v4738_v21  ;;  %v2367_v35 = vadd.f32 1.4214138, %v2355_v46  ;;  %v2439_v58 = vmul.f32 %v4639_v36, %v4639_v36  ;;  %v3122_v25 = vpop.eup %3121 }
 0x556   : > { %v2534_v33 = vsel %vm2510_vm11, %v2498_v1, %v2522_v6  ;;  %v2531_v52 = vsel %vm2507_vm12, %v2495_v12, %v2519_v28  ;;  %v2285_v15 = vmul.f32 0.3275911, %v2273_v9  ;;  %v2542_v18 = vadd.f32 1.0, %v2530_v37 }
 0x557   : > { %v2885_v7 = vpack.c.bf16 %v4718_v61, %v4716_v24  ;;  %v2546_v13 = vadd.f32 1.0, %v2534_v33  ;;  %v2543_v54 = vadd.f32 1.0, %v2531_v52  ;;  %v2286_v14 = vmul.f32 0.3275911, %v2274_v50 }
 0x558   : > { %v2242_v10 = vmul.f32 0.5, %v4583_v19  ;;  %v2344_v59 = vadd.f32 -1.4531521, %v2332_v43  ;;  %v2456_v17 = vsub.f32 0.0, %v2444_v38  ;;  %v2297_v0 = vadd.f32 1.0, %v2285_v15 }
 0x559   : > { %v2558_v30 = vmul.f32 %v2546_v13, %v2246_v26  ;;  %v2557_v20 = vmul.f32 %v2545_v47, %v2245_v39  ;;  %v2555_v57 = vmul.f32 %v2543_v54, %v2243_v62  ;;  %v2336_v45 = vmul.f32 1.0614054, %v3122_v25 }
 0x55a   : > { %v4751_v48 = vadd.f32 %v4613_v34, %v4657_v5  ;;  %v2379_v36 = vmul.f32 %v4696_v3, %v2367_v35  ;;  %3123 = vrcp.f32 %v2297_v0  ;;  %v2298_v31 = vadd.f32 1.0, %v2286_v14 }
 0x55b   : > { %v2554_v49 = vmul.f32 %v2542_v18, %v2242_v10  ;;  %v2892_v42 = vpack.c.bf16 %v2558_v30, %v2555_v57  ;;  %v2451_v55 = vsub.f32 0.0, %v2439_v58  ;;  %v2348_v29 = vadd.f32 -1.4531521, %v2336_v45 }
 0x55c   : > { %v2356_v19 = vmul.f32 %v4714_v32, %v2344_v59  ;;  %v2479_v63 = vmul.f32 1.442695, %v2456_v17  ;;  %3125 = vrcp.f32 %v2298_v31  ;;  %v4756_v24 = vmul.f32 0.70710677, %v4751_v48 }
 0x55d   : > { %v2360_v40 = vmul.f32 %v3122_v25, %v2348_v29  ;;  %v2883_v61 = vpack.c.bf16 %v2557_v20, %v2554_v49  ;;  %2893 = vmatpush3.bf16.msra.mxu0 %v2892_v42  ;;  %v2391_v34 = vadd.f32 -0.28449672, %v2379_v36  ;;  %v2469_v5 = vmul.f32 1.442695, %v2451_v55 }
 0x55e   : > { %2894 = vmatprep.subr.bf16.mxu0 %v3306_v53  ;;  %v2275_v4 = vand.u32 2147483647, %v4756_v24  ;;  %v2368_v39 = vadd.f32 1.4214138, %v2356_v19  ;;  %3127 = vpow2.f32 %v2479_v63  ;;  %v2441_v51 = vmul.f32 %v2273_v9, %v2273_v9 }
 0x55f   : > { %v2372_v1 = vadd.f32 1.4214138, %v2360_v40  ;;  %2884 = vmatprep.subr.bf16.mxu1 %v2883_v61  ;;  %v2440_v26 = vmul.f32 %v4662_v22, %v4662_v22  ;;  %v2403_v12 = vmul.f32 %v4696_v3, %v2391_v34  ;;  %v2442_v46 = vmul.f32 %v2274_v50, %v2274_v50 }
 0x560   : > { %2886 = vmatpush1.bf16.msra.mxu1 %v2885_v7  ;;  %v2287_v44 = vmul.f32 0.3275911, %v2275_v4  ;;  %3129 = vpow2.f32 %v2469_v5  ;;  %v2380_v38 = vmul.f32 %v4714_v32, %v2368_v39  ;;  %v2453_v37 = vsub.f32 0.0, %v2441_v51 }
 0x561   : > { %v2384_v6 = vmul.f32 %v3122_v25, %v2372_v1  ;;  %v2452_v13 = vsub.f32 0.0, %v2440_v26  ;;  %v2415_v9 = vadd.f32 0.2548296, %v2403_v12  ;;  %v2454_v62 = vsub.f32 0.0, %v2442_v46 }
 0x562   : > { %v2299_v53 = vadd.f32 1.0, %v2287_v44  ;;  %v2392_v58 = vadd.f32 -0.28449672, %v2380_v38  ;;  %v2473_v15 = vmul.f32 1.442695, %v2453_v37  ;;  %v2443_v57 = vmul.f32 %v2275_v4, %v2275_v4 }
 0x563   : > { %v2396_v33 = vadd.f32 -0.28449672, %v2384_v6  ;;  %v2471_v50 = vmul.f32 1.442695, %v2452_v13  ;;  %v2427_v10 = vmul.f32 %v4696_v3, %v2415_v9  ;;  %v2475_v59 = vmul.f32 1.442695, %v2454_v62 }
 0x564   : > { %v3124_v43 = vpop.eup %3123  ;;  %3131 = vrcp.f32 %v2299_v53  ;;  %v2404_v45 = vmul.f32 %v4714_v32, %v2392_v58  ;;  %v2455_v63 = vsub.f32 0.0, %v2443_v57  ;;  %v2252_v41 = vmul.f32 0.5, %v4668_v8 }
 0x565   : > { %v2408_v28 = vmul.f32 %v3122_v25, %v2396_v33  ;;  %v2333_v47 = vmul.f32 1.0614054, %v3124_v43  ;;  %3133 = vpow2.f32 %v2473_v15  ;;  %vm2513_vm15 = vcmp.ge.f32.partialorder %v4732_v23, 0.0 }
 0x566   : > { %v3126_v7 = vpop.eup %3125  ;;  %3135 = vpow2.f32 %v2471_v50  ;;  %v2416_v3 = vadd.f32 0.2548296, %v2404_v45  ;;  %v2477_v26 = vmul.f32 1.442695, %v2455_v63  ;;  %vm2514_vm0 = vcmp.ge.f32.partialorder %v4738_v21, 0.0 }
 0x567   : > { %v2420_v22 = vadd.f32 0.2548296, %v2408_v28  ;;  %v2345_v52 = vadd.f32 -1.4531521, %v2333_v47  ;;  %v2334_v35 = vmul.f32 1.0614054, %v3126_v7  ;;  %3137 = vpow2.f32 %v2475_v59 }
 0x568   : > { %v3128_v14 = vpop.eup %3127  ;;  %v2428_v6 = vmul.f32 %v4714_v32, %v2416_v3  ;;  %3139 = vpow2.f32 %v2477_v26  ;;  %vm2515_vm4 = vcmp.ge.f32.partialorder %v4756_v24, 0.0  ;;  %v2248_v3 = vmul.f32 0.5, %v4642_v27 }
 0x569   : > { %v2432_v18 = vmul.f32 %v3122_v25, %v2420_v22  ;;  %v2357_v30 = vmul.f32 %v3124_v43, %v2345_v52  ;;  %v2346_v54 = vadd.f32 -1.4531521, %v2334_v35  ;;  %v2251_v11 = vmul.f32 0.5, %v4751_v48 }
 0x56a   : > { %v3130_v36 = vpop.eup %3129 }
 0x56b   : > { %v2492_v17 = vmul.f32 %v3128_v14, %v2432_v18  ;;  %v2369_v0 = vadd.f32 1.4214138, %v2357_v30  ;;  %v2358_v20 = vmul.f32 %v3126_v7, %v2346_v54  ;;  %v2487_v42 = vmul.f32 %v3130_v36, %v2427_v10 }
 0x56d   : > { %v2381_v31 = vmul.f32 %v3124_v43, %v2369_v0  ;;  %v2370_v49 = vadd.f32 1.4214138, %v2358_v20  ;;  %v2504_v55 = vsub.f32 1.0, %v2492_v17  ;;  %v2499_v5 = vsub.f32 1.0, %v2487_v42 }
 0x56e   : > { %v3132_v25 = vpop.eup %3131  ;;  %v2247_v0 = vmul.f32 0.5, %v4623_v60  ;;  %v2250_v20 = vmul.f32 0.5, %v4722_v2  ;;  %v2565_v60 = vld [vmem:[%s4839_s7] sm:$0xff] }
 0x56f   : > { %v2393_v29 = vadd.f32 -0.28449672, %v2381_v31  ;;  %v2382_v19 = vmul.f32 %v3126_v7, %v2370_v49  ;;  %v2335_v40 = vmul.f32 1.0614054, %v3132_v25  ;;  %v2528_v4 = vsub.f32 0.0, %v2504_v55  ;;  %v3134_v33 = vpop.eup %3133 }
 0x570   : > { %v2523_v53 = vsub.f32 0.0, %v2499_v5  ;;  %v3136_v37 = vpop.eup %3135 }
 0x571   : > { %v2405_v61 = vmul.f32 %v3124_v43, %v2393_v29  ;;  %v2394_v34 = vadd.f32 -0.28449672, %v2382_v19  ;;  %v2347_v1 = vadd.f32 -1.4531521, %v2335_v40  ;;  %v2540_v13 = vsel %vm2516_vm13, %v2504_v55, %v2528_v4  ;;  %v3138_v9 = vpop.eup %3137  ;;  %v2722_v4 = vpop.permute.xlu1 %2721 }
 0x572   : > { %v2488_v62 = vmul.f32 %v3136_v37, %v2428_v6  ;;  %v2552_v32 = vadd.f32 1.0, %v2540_v13  ;;  %v2535_v58 = vsel %vm2511_vm14, %v2499_v5, %v2523_v53  ;;  %v3140_v31 = vpop.eup %3139 }
 0x573   : > { %v2417_v39 = vadd.f32 0.2548296, %v2405_v61  ;;  %v2406_v51 = vmul.f32 %v3126_v7, %v2394_v34  ;;  %v2359_v44 = vmul.f32 %v3132_v25, %v2347_v1  ;;  %v2547_v10 = vadd.f32 1.0, %v2535_v58  ;;  %v2570_v1 = vpop.permute.xlu0 %2569 }
 0x574   : > { %v2500_v18 = vsub.f32 1.0, %v2488_v62  ;;  %v2564_v59 = vmul.f32 %v2552_v32, %v2252_v41 }
 0x575   : > { %v2429_v12 = vmul.f32 %v3124_v43, %v2417_v39  ;;  %v2418_v46 = vadd.f32 0.2548296, %v2406_v51  ;;  %v2371_v38 = vadd.f32 1.4214138, %v2359_v44  ;;  %v2559_v49 = vmul.f32 %v2547_v10, %v2247_v0  ;;  %v2726_v51 = vpop.permute.xlu1 %2725 }
 0x576   : > { %v2524_v45 = vsub.f32 0.0, %v2500_v18 }
 0x577   : > { %v2489_v28 = vmul.f32 %v3134_v33, %v2429_v12  ;;  %v2430_v47 = vmul.f32 %v3126_v7, %v2418_v46  ;;  %v2383_v22 = vmul.f32 %v3132_v25, %v2371_v38  ;;  %v2249_v7 = vmul.f32 0.5, %v4711_v16  ;;  %v2724_v39 = vpop.permute.xlu0 %2723 }
 0x578   : > { %v2536_v21 = vsel %vm2512_vm1, %v2500_v18, %v2524_v45  ;;  %v2729_v53 = vsel %vm995_vm10, %v2722_v4, %v2724_v39  ;;  %v2730_v37 = vsel %vm995_vm10, %v2724_v39, %v2726_v51 }
 0x579   : > { %v2501_v52 = vsub.f32 1.0, %v2489_v28  ;;  %v2490_v35 = vmul.f32 %v3138_v9, %v2430_v47  ;;  %v2395_v43 = vadd.f32 -0.28449672, %v2383_v22  ;;  %v2548_v63 = vadd.f32 1.0, %v2536_v21 }
 0x57b   : > { %v2525_v15 = vsub.f32 0.0, %v2501_v52  ;;  %v2502_v50 = vsub.f32 1.0, %v2490_v35  ;;  %v2407_v30 = vmul.f32 %v3132_v25, %v2395_v43  ;;  %v2560_v61 = vmul.f32 %v2548_v63, %v2248_v3  ;;  %v2728_v24 = vpop.permute.xlu0 %2727 }
 0x57c   : > { %v2731_v27 = vsel %vm995_vm10, %v2726_v51, %v2728_v24 }
 0x57d   : > { %v2537_v54 = vsel %vm2513_vm15, %v2501_v52, %v2525_v15  ;;  %v2526_v14 = vsub.f32 0.0, %v2502_v50  ;;  %v2419_v17 = vadd.f32 0.2548296, %v2407_v30 }
 0x57e   : > { %v2549_v56 = vadd.f32 1.0, %v2537_v54 }
 0x57f   : > { %v2538_v57 = vsel %vm2514_vm0, %v2502_v50, %v2526_v14  ;;  %v2431_v23 = vmul.f32 %v3132_v25, %v2419_v17 }
 0x580   : > { %v2561_v8 = vmul.f32 %v2549_v56, %v2249_v7  ;;  %v2550_v36 = vadd.f32 1.0, %v2538_v57 }
 0x581   : > { %v2491_v55 = vmul.f32 %v3140_v31, %v2431_v23 }
 0x582   : > { %v2895_v16 = vpack.c.bf16 %v2564_v59, %v2561_v8  ;;  %v2562_v42 = vmul.f32 %v2550_v36, %v2250_v20 }
 0x583   : > { %v2503_v19 = vsub.f32 1.0, %v2491_v55 }
 0x584   : > { %v2889_v29 = vpack.c.bf16 %v2562_v42, %v2559_v49  ;;  %2896 = vmatpush3.bf16.msra.mxu0 %v2895_v16 }
 0x585   : > { %v2527_v2 = vsub.f32 0.0, %v2503_v19 }
 0x587   : > { %2881 = vmatmul.mubr.msk.f32.vlgmr.msra.gmra.mrb[10].mxu0 %vm2572_vm3, %v2565_v60  ;;  %v2539_v25 = vsel %vm2515_vm4, %v2503_v19, %v2527_v2 }
 0x588   : > { %v2551_v40 = vadd.f32 1.0, %v2539_v25 }
 0x58a   : > { %v2563_v34 = vmul.f32 %v2551_v40, %v2251_v11 }
 0x58c   : > { %v2887_v5 = vpack.c.bf16 %v2563_v34, %v2560_v61 }
 0x58e   : > { %2888 = vmatprep.subr.bf16.mxu1 %v2887_v5 }
 0x58f   : > { %2890 = vmatpush1.bf16.msra.mxu1 %v2889_v29 }
 0x592   : > { %2834 = vmatmul.mubr.msk.f32.vlgmr.msra.gmra.mrb[10].mxu1 %vm2572_vm3, %v2565_v60 }
 0x65a   : > { %v2713_v26 = vpop.f32.mrb[10].mxu0 }
 0x65b   : > { %v2714_v6 = vadd.f32 %v2713_v26, %v2570_v1  ;;  %v2882_v48 = vpop.f32.mrb[11].mxu0 }
 0x65d   : > { %v2737_v44 = vadd.f32 %v2731_v27, %v2714_v6 }
 0x65f   : > { %2741 = vst.msk [vmem:[%s325_s29 + $0x10] sm:$0xff] %vm2740_vm5, %v2737_v44 }
 0x665   : > { %v2642_v12 = vpop.f32.mrb[10].mxu1 }
 0x666   : > { %v2643_v46 = vadd.f32 %v2642_v12, %v2570_v1  ;;  %v2644_v33 = vpop.f32.mrb[11].mxu1 }
 0x667   : > { %v2645_v38 = vadd.f32 %v2644_v33, %v2570_v1 }
 0x668   : > { %v2735_v13 = vadd.f32 %v2729_v53, %v2643_v46 }
 0x669   : > { %v2736_v28 = vadd.f32 %v2730_v37, %v2645_v38 }
 0x66a   : > { %2738 = vst [vmem:[%s325_s29] sm:$0xff] %v2735_v13 }
 0x66b   : > { %2739 = vst [vmem:[%s325_s29 + $0x8] sm:$0xff] %v2736_v28 }
 0x66c   : > { %3158 = shalt.err (!%p3155_p3)
}
 0x66d   : > { %s3159_s26 = scalar_lea.hbm %s4790_s22, 384  ;;  %s3163_s14 = scalar_lea.hbm %s4841_s9, 768 }
 0x66e   : > { %p3160_p4 = scmp.ne.s32.totalorder %s4790_s22, %s3159_s26  ;;  %p3164_p9 = scmp.lt.u32.totalorder %s4790_s22, %s4841_s9 }
 0x66f   : > { %p3165_p10 = scmp.lt.u32.totalorder %s3163_s14, %s3159_s26  ;;  %p3167_p12 = scmp.lt.u32.totalorder %s3159_s26, %s4790_s22 }
 0x670   : > { %p3161_p7 = pnand %p3160_p4, %p3396_p5 }
 0x671   : > { %p3166_p11 = por %p3165_p10, %p3164_p9 }
 0x672   : > { %p3162_p8 = pneg %p3161_p7 }
 0x673   : > { %p3168_p13 = por %p3167_p12, %p3166_p11 }
 0x675   : > { %p3169_p0 = pnand %p3168_p13, %p3162_p8 }
 0x677   : > { %3172 = shalt.err (!%p3169_p0)
}
 0x678   : > { %2899 = dma.vmem_to_hbm [thread:$0]  (%p3396_p5), %s4792_s21, 384, %s4790_s22, %s2743_s13  }
 0x679 PF: > { %p2905_p1 = scmp.ge.s32.totalorder %s3207_s12, 2  ;;  %s2769_s23 = sand.u32 1, %s3195_s30  }
 0x67a   : > { %s2770_s24 = scalar_lea.sflag [#allocation3], %s2769_s23 }
 0x67b   : > { %p2902_p2 = pnand %p2905_p1, %p3400_p6 }
 0x67d   : > { %3190 = dma.done.wait (!%p2902_p2), %s2770_s24, 384  }
 0x67e   : > { %3192 = vsyncadd (!%p2902_p2), %s2770_s24, 4294966912  ;;  %p19_p3 = scmp.ge.s32.totalorder %s3383_s15, 4   ;;  %s4950_s30 = smov %s3199_s10 }
 0x67f   : > { %s4951_s10 = smov %s3203_s11  ;;  %s4952_s11 = smov %s3394_s18 }
 0x680   : > { %s4953_s12 = smov %s3383_s15  ;;  %21 = sbr.rel (!%p19_p3) target bundleno = 3 (0x3), region = 91 }
 0x687   :  { %2775 = vsyncpa [#allocation3], 1 }
 0x688   :  { %2777 = vsyncpa [#allocation3 + $0x1], 1 }

</bundles_post_ra>
